<compile_context>
chip_gen: v6e
topology: v6e:2x2x1
jax: 0.10.0
libtpu: 0.0.40
codegen_flags: <defaults>
</compile_context>

<pallas_src>
import functools

import numpy as np
import jax
import jax.numpy as jnp
from jax.experimental import pallas as pl
from jax.experimental.pallas import tpu as pltpu

MASK_VAL = -1.0
BN_EPS = 1e-5
LEAKY_SLOPE = 0.2
LANE = 128


# ----------------------------------------------------------------------------
# Fused kernel: mask -> hoisted x@Wih0 -> fused 2-layer block-diag LSTM over T
#               -> projection head (BN folded, LeakyReLU, Dropout=identity)
# ----------------------------------------------------------------------------
def fused_encoder_kernel(x_ref, wih0_ref, b0_ref, whh0_ref, wih1_ref, whh1_ref,
                         b1_ref, pw1_ref, pb1_ref, pw2_ref, pb2_ref, out_ref,
                         *, seq_len, batch, fused_w):
    W = fused_w
    B = batch
    f32 = jnp.float32
    bf16 = jnp.bfloat16

    # Masking (x == -1 -> 0), applied once to the whole (T*B, D) series.
    x = x_ref[...]
    x = x * (x != MASK_VAL).astype(x.dtype)

    # Hoisted layer-0 input->gate contribution: ONE MXU call for all timesteps and
    # all stacks, with the layer-0 gate bias folded in.  (T*B, 4W) f32.
    xg0 = jnp.dot(x.astype(bf16), wih0_ref[...],
                  preferred_element_type=f32) + b0_ref[...]

    # Hoist the layer-1 bias broadcast out of the time loop (not CSE'd otherwise).
    b1b = jnp.broadcast_to(b1_ref[...], (B, 4 * W))

    def gate_math(gates, c):
        # Gate-major fused layout [ i | f | o | g ]; each block is W (128-mult) lanes.
        sig = jax.nn.sigmoid(gates[:, 0:3 * W])      # ONE sigmoid over 3W lanes
        g_g = jnp.tanh(gates[:, 3 * W:4 * W])        # ONE tanh over W lanes
        i_g = sig[:, 0:W]
        f_g = sig[:, W:2 * W]
        o_g = sig[:, 2 * W:3 * W]
        c_new = f_g * c + i_g * g_g
        h_new = o_g * jnp.tanh(c_new)
        return h_new, c_new

    h0 = jnp.zeros((B, W), f32)
    c0 = jnp.zeros((B, W), f32)
    h1 = jnp.zeros((B, W), f32)
    c1 = jnp.zeros((B, W), f32)

    for t in range(seq_len):                         # static unroll; T is small
        xg_t = xg0[t * B:(t + 1) * B, :]             # (B, 4W) static slice
        # Layer 0: only the recurrent block-diagonal dot stays inside the loop.
        g0 = xg_t + jnp.dot(h0.astype(bf16), whh0_ref[...],
                            preferred_element_type=f32)
        h0, c0 = gate_math(g0, c0)
        # Layer 1: two dots (no [h0, h1] concat; free in-place add on v7x MRB).
        g1 = (jnp.dot(h0.astype(bf16), wih1_ref[...], preferred_element_type=f32)
              + jnp.dot(h1.astype(bf16), whh1_ref[...], preferred_element_type=f32)
              + b1b)
        h1, c1 = gate_math(g1, c1)
        # TODO(synk): nn.LSTM inter-layer dropout is train-only; identity in eval.

    # Projection head: Linear1+BN1 (folded) -> LeakyReLU(0.2) -> Dropout(identity)
    # -> Linear2+BN2 (folded).  One-shot, kept in f32.
    h = jnp.dot(h1, pw1_ref[...], preferred_element_type=f32) + pb1_ref[...]
    h = jnp.where(h >= 0.0, h, LEAKY_SLOPE * h)
    out = jnp.dot(h, pw2_ref[...], preferred_element_type=f32) + pb2_ref[...]
    out_ref[...] = out                               # single final store


# ----------------------------------------------------------------------------
# Fused layout helpers and parameter packing (one-time host preprocessing)
# ----------------------------------------------------------------------------
def _fused_layout(hidden_dims):
    offsets, off = [], 0
    for h in hidden_dims:
        offsets.append(off)
        off += h
    # W multiple of 128 so every gate block slice is lane-aligned and lane-dense.
    W = max(LANE, ((off + LANE - 1) // LANE) * LANE)
    return offsets, off, W


# fused gate block order [i, f, o, g]  ->  PyTorch chunk index (i, f, g, o)
_GATE_PERM = (0, 1, 3, 2)


def pack_lstm_params(lstm_params_list, D, offsets, W):
    """Pack per-stack 2-layer LSTM weights into fused block-diagonal, gate-major,
    zero-padded arrays (weights bf16 for the MXU, biases f32)."""
    GW = 4 * W
    wih0 = np.zeros((D, GW), np.float32)
    whh0 = np.zeros((W, GW), np.float32)
    wih1 = np.zeros((W, GW), np.float32)
    whh1 = np.zeros((W, GW), np.float32)
    b0 = np.zeros((1, GW), np.float32)
    b1 = np.zeros((1, GW), np.float32)
    for s, p in enumerate(lstm_params_list):
        off = offsets[s]
        H = np.asarray(p["whh0"]).shape[1]
        for gm, gp in enumerate(_GATE_PERM):
            cols = slice(gm * W + off, gm * W + off + H)
            rows = slice(gp * H, (gp + 1) * H)
            wih0[:, cols] = np.asarray(p["wih0"])[rows, :].T
            whh0[off:off + H, cols] = np.asarray(p["whh0"])[rows, :].T
            b0[0, cols] = np.asarray(p["bih0"])[rows] + np.asarray(p["bhh0"])[rows]
            wih1[off:off + H, cols] = np.asarray(p["wih1"])[rows, :].T
            whh1[off:off + H, cols] = np.asarray(p["whh1"])[rows, :].T
            b1[0, cols] = np.asarray(p["bih1"])[rows] + np.asarray(p["bhh1"])[rows]
    as_bf16 = lambda a: jnp.asarray(a).astype(jnp.bfloat16)
    return (as_bf16(wih0), jnp.asarray(b0), as_bf16(whh0),
            as_bf16(wih1), as_bf16(whh1), jnp.asarray(b1))


def pack_projection_params(pp, hidden_dims, offsets, W):
    """Fold eval-mode BatchNorm into the two Linear layers; map Linear1 rows onto
    the fused hidden layout (zero rows for padded lanes)."""
    w1 = np.asarray(pp["w1"]); b1 = np.asarray(pp["b1"])
    g1 = np.asarray(pp["g1"]); be1 = np.asarray(pp["be1"])
    m1 = np.asarray(pp["m1"]); v1 = np.asarray(pp["v1"])
    w2 = np.asarray(pp["w2"]); b2 = np.asarray(pp["b2"])
    g2 = np.asarray(pp["g2"]); be2 = np.asarray(pp["be2"])
    m2 = np.asarray(pp["m2"]); v2 = np.asarray(pp["v2"])

    s1 = g1 / np.sqrt(v1 + BN_EPS)
    w1f = (w1.T * s1[None, :]).astype(np.float32)     # (sum_H, hid)
    b1f = ((b1 - m1) * s1 + be1).astype(np.float32)
    s2 = g2 / np.sqrt(v2 + BN_EPS)
    w2f = (w2.T * s2[None, :]).astype(np.float32)     # (hid, out)
    b2f = ((b2 - m2) * s2 + be2).astype(np.float32)

    hid = w1f.shape[1]
    pw1 = np.zeros((W, hid), np.float32)
    src = 0
    for s, H in enumerate(hidden_dims):
        pw1[offsets[s]:offsets[s] + H, :] = w1f[src:src + H, :]
        src += H
    return (jnp.asarray(pw1), jnp.asarray(b1f[None, :]),
            jnp.asarray(w2f), jnp.asarray(b2f[None, :]))


# ----------------------------------------------------------------------------
# Full forward (single fused pallas_call)
# ----------------------------------------------------------------------------
def multi_lstm_encoder_forward(x_btd, lstm_params_list, proj_params, hidden_dims):
    if x_btd.ndim == 2:                               # matches `x.unsqueeze(1)`
        x_btd = x_btd[:, None, :]
    x_btd = x_btd.astype(jnp.float32)
    B, T, D = x_btd.shape

    offsets, _, W = _fused_layout(hidden_dims)
    wih0, b0, whh0, wih1, whh1, b1 = pack_lstm_params(lstm_params_list, D, offsets, W)
    pw1, pb1, pw2, pb2 = pack_projection_params(proj_params, hidden_dims, offsets, W)
    hid, out_dim = pw2.shape[0], pw2.shape[1]
    GW = 4 * W

    # Time-major and flattened to (T*B, D): the hoisted x @ Wih0 term is one 2-D dot
    # and each per-step slab is a static row slice (no in-kernel reshape / relayout).
    x_2d = jnp.transpose(x_btd, (1, 0, 2)).reshape(T * B, D)

    cost = pl.CostEstimate(
        flops=2 * (T * B * D * GW + 3 * T * B * W * GW + B * W * hid + B * hid * out_dim),
        transcendentals=T * 2 * B * 5 * W,
        bytes_accessed=int(x_2d.size * 4
                           + (wih0.size + whh0.size + wih1.size + whh1.size) * 2
                           + (b0.size + b1.size) * 4
                           + (pw1.size + pb1.size + pw2.size + pb2.size) * 4
                           + B * out_dim * 4),
    )

    kernel = functools.partial(fused_encoder_kernel, seq_len=T, batch=B, fused_w=W)
    vmem = lambda: pl.BlockSpec(memory_space=pltpu.MemorySpace.VMEM)
    # TODO(synk): on v7x with nontrivial batch (> a few hundred rows), add a 1-D grid
    # over B with dimension_semantics=("parallel",) to use both TensorCores; pointless
    # at B=2 and a no-op on v5e/v6e (1 TC).
    return pl.pallas_call(
        kernel,
        out_shape=jax.ShapeDtypeStruct((B, out_dim), jnp.float32),
        in_specs=[vmem() for _ in range(11)],
        out_specs=vmem(),
        cost_estimate=cost,
    )(x_2d, wih0, b0, whh0, wih1, whh1, b1, pw1, pb1, pw2, pb2)


# ----------------------------------------------------------------------------
# Deterministic synthetic parameter init (PyTorch nn.LSTM / nn.Linear / BN layout)
# ----------------------------------------------------------------------------
def init_lstm_params(key, D, H, scale=0.1):
    ks = jax.random.split(key, 8)
    nrm = lambda k, s: (jax.random.normal(k, s) * scale).astype(jnp.float32)
    return dict(
        wih0=nrm(ks[0], (4 * H, D)), whh0=nrm(ks[1], (4 * H, H)),
        bih0=nrm(ks[2], (4 * H,)), bhh0=nrm(ks[3], (4 * H,)),
        wih1=nrm(ks[4], (4 * H, H)), whh1=nrm(ks[5], (4 * H, H)),
        bih1=nrm(ks[6], (4 * H,)), bhh1=nrm(ks[7], (4 * H,)),
    )


def init_proj_params(key, total_dim, out_dim, scale=0.1):
    hid = total_dim // 2
    ks = jax.random.split(key, 12)
    nrm = lambda k, s: (jax.random.normal(k, s) * scale).astype(jnp.float32)
    return dict(
        w1=nrm(ks[0], (hid, total_dim)), b1=nrm(ks[1], (hid,)),
        g1=1.0 + nrm(ks[2], (hid,)), be1=nrm(ks[3], (hid,)),
        m1=nrm(ks[4], (hid,)), v1=1.0 + jnp.abs(nrm(ks[5], (hid,))),
        w2=nrm(ks[6], (out_dim, hid)), b2=nrm(ks[7], (out_dim,)),
        g2=1.0 + nrm(ks[8], (out_dim,)), be2=nrm(ks[9], (out_dim,)),
        m2=nrm(ks[10], (out_dim,)), v2=1.0 + jnp.abs(nrm(ks[11], (out_dim,))),
    )


# ----------------------------------------------------------------------------
# Pure-JAX reference (unfused, unfolded, f32 HIGHEST precision) for correctness
# ----------------------------------------------------------------------------
def _lstm2_ref(x_btd, p):
    B = x_btd.shape[0]
    H = p["whh0"].shape[1]
    hp = jax.lax.Precision.HIGHEST

    def cell(inp, h, c, wih, whh, bih, bhh):
        gates = (jnp.dot(inp, wih.T, precision=hp) + jnp.dot(h, whh.T, precision=hp)
                 + bih + bhh)
        i = jax.nn.sigmoid(gates[:, 0:H]); f = jax.nn.sigmoid(gates[:, H:2 * H])
        g = jnp.tanh(gates[:, 2 * H:3 * H]); o = jax.nn.sigmoid(gates[:, 3 * H:4 * H])
        c_new = f * c + i * g
        return o * jnp.tanh(c_new), c_new

    def step(carry, xt):
        h0, c0, h1, c1 = carry
        h0, c0 = cell(xt, h0, c0, p["wih0"], p["whh0"], p["bih0"], p["bhh0"])
        h1, c1 = cell(h0, h1, c1, p["wih1"], p["whh1"], p["bih1"], p["bhh1"])
        return (h0, c0, h1, c1), None

    init = tuple(jnp.zeros((B, H), jnp.float32) for _ in range(4))
    (_, _, h1, _), _ = jax.lax.scan(step, init, jnp.transpose(x_btd, (1, 0, 2)))
    return h1


def _forward_ref(x_btd, lstm_params_list, pp):
    hp = jax.lax.Precision.HIGHEST
    xm = x_btd * (x_btd != MASK_VAL).astype(x_btd.dtype)
    h = jnp.concatenate([_lstm2_ref(xm, p) for p in lstm_params_list], axis=1)
    h = jnp.dot(h, pp["w1"].T, precision=hp) + pp["b1"]
    h = (h - pp["m1"]) * jax.lax.rsqrt(pp["v1"] + BN_EPS) * pp["g1"] + pp["be1"]
    h = jnp.where(h >= 0, h, LEAKY_SLOPE * h)
    h = jnp.dot(h, pp["w2"].T, precision=hp) + pp["b2"]
    h = (h - pp["m2"]) * jax.lax.rsqrt(pp["v2"] + BN_EPS) * pp["g2"] + pp["be2"]
    return h


if __name__ == "__main__":
    B, T, D = 2, 8, 4                    # batch, seq, ts_dim
    hidden_dims = [32, 16, 8]
    output_dim = 16

    key = jax.random.PRNGKey(0)
    k_x, k_p = jax.random.split(key)
    x = jax.random.normal(k_x, (B, T, D), dtype=jnp.float32)
    # put a few exact mask values in to exercise the masking path
    x = x.at[0, 0, 0].set(MASK_VAL)
    x = x.at[1, 3, 2].set(MASK_VAL)

    keys = jax.random.split(k_p, len(hidden_dims) + 1)
    lstm_params = [init_lstm_params(keys[i], D, h) for i, h in enumerate(hidden_dims)]
    proj_params = init_proj_params(keys[-1], sum(hidden_dims), output_dim)

    out = multi_lstm_encoder_forward(x, lstm_params, proj_params, hidden_dims)
    out = jax.block_until_ready(out)

    ref = _forward_ref(x, lstm_params, proj_params)
    assert out.shape == (B, output_dim), out.shape
    # bf16 MXU operands (per perf review) leave ~1e-3-level absolute error vs the
    # f32 HIGHEST-precision reference; 1e-2 tolerance documents that choice.
    max_err = float(jnp.max(jnp.abs(out - ref)))
    assert jnp.allclose(out, ref, atol=1e-2, rtol=1e-2), max_err

    print("KERNEL_OK")
</pallas_src>

<mosaic_0001>
module attributes {stable_mosaic.version = 11 : i64} {
  func.func @fused_encoder_kernel(%arg0: memref<16x4xf32, #tpu.memory_space<vmem>>, %arg1: memref<4x512xbf16, #tpu.memory_space<vmem>>, %arg2: memref<1x512xf32, #tpu.memory_space<vmem>>, %arg3: memref<128x512xbf16, #tpu.memory_space<vmem>>, %arg4: memref<128x512xbf16, #tpu.memory_space<vmem>>, %arg5: memref<128x512xbf16, #tpu.memory_space<vmem>>, %arg6: memref<1x512xf32, #tpu.memory_space<vmem>>, %arg7: memref<128x28xf32, #tpu.memory_space<vmem>>, %arg8: memref<1x28xf32, #tpu.memory_space<vmem>>, %arg9: memref<28x16xf32, #tpu.memory_space<vmem>>, %arg10: memref<1x16xf32, #tpu.memory_space<vmem>>, %arg11: memref<2x16xf32, #tpu.memory_space<vmem>>) attributes {dimension_semantics = [], scalar_prefetch = 0 : i64, scratch_operands = 0 : i64, tpu.core_type = #tpu.core_type<tc>} {
    %c0 = arith.constant 0 : index
    %c0_0 = arith.constant 0 : index
    %0 = vector.load %arg0[%c0, %c0_0] : memref<16x4xf32, #tpu.memory_space<vmem>>, vector<16x4xf32>
    %cst = arith.constant -1.000000e+00 : f32
    %1 = vector.broadcast %cst : f32 to vector<16x4xf32>
    %2 = arith.cmpf one, %0, %1 : vector<16x4xf32>
    %3 = arith.extui %2 : vector<16x4xi1> to vector<16x4xi32>
    %4 = arith.sitofp %3 : vector<16x4xi32> to vector<16x4xf32>
    %5 = arith.mulf %0, %4 : vector<16x4xf32>
    %6 = arith.truncf %5 : vector<16x4xf32> to vector<16x4xbf16>
    %c0_1 = arith.constant 0 : index
    %c0_2 = arith.constant 0 : index
    %7 = vector.load %arg1[%c0_1, %c0_2] : memref<4x512xbf16, #tpu.memory_space<vmem>>, vector<4x512xbf16>
    %cst_3 = arith.constant dense<0.000000e+00> : vector<16x512xf32>
    %8 = tpu.matmul %6, %7, %cst_3 {dimension_numbers = #tpu.dot_dimension_numbers<[1], [0], [0], [1], [0, 0, 1, 1], [], []>} : vector<16x4xbf16>, vector<4x512xbf16>, vector<16x512xf32> -> vector<16x512xf32>
    %c0_4 = arith.constant 0 : index
    %c0_5 = arith.constant 0 : index
    %9 = vector.load %arg2[%c0_4, %c0_5] : memref<1x512xf32, #tpu.memory_space<vmem>>, vector<1x512xf32>
    %10 = vector.broadcast %9 : vector<1x512xf32> to vector<16x512xf32>
    %11 = arith.addf %8, %10 : vector<16x512xf32>
    %c0_6 = arith.constant 0 : index
    %c0_7 = arith.constant 0 : index
    %12 = vector.load %arg6[%c0_6, %c0_7] : memref<1x512xf32, #tpu.memory_space<vmem>>, vector<1x512xf32>
    %13 = vector.shape_cast %12 : vector<1x512xf32> to vector<1x512xf32>
    %14 = vector.broadcast %13 : vector<1x512xf32> to vector<2x512xf32>
    %cst_8 = arith.constant 0.000000e+00 : f32
    %15 = vector.broadcast %cst_8 : f32 to vector<2x128xf32>
    %cst_9 = arith.constant 0.000000e+00 : f32
    %16 = vector.broadcast %cst_9 : f32 to vector<2x128xf32>
    %cst_10 = arith.constant 0.000000e+00 : f32
    %17 = vector.broadcast %cst_10 : f32 to vector<2x128xf32>
    %cst_11 = arith.constant 0.000000e+00 : f32
    %18 = vector.broadcast %cst_11 : f32 to vector<2x128xf32>
    %19 = vector.extract_strided_slice %11 {offsets = [0, 0], sizes = [2, 512], strides = [1, 1]} : vector<16x512xf32> to vector<2x512xf32>
    %20 = arith.truncf %15 : vector<2x128xf32> to vector<2x128xbf16>
    %c0_12 = arith.constant 0 : index
    %c0_13 = arith.constant 0 : index
    %21 = vector.load %arg3[%c0_12, %c0_13] : memref<128x512xbf16, #tpu.memory_space<vmem>>, vector<128x512xbf16>
    %cst_14 = arith.constant dense<0.000000e+00> : vector<2x512xf32>
    %22 = tpu.matmul %20, %21, %cst_14 {dimension_numbers = #tpu.dot_dimension_numbers<[1], [0], [0], [1], [0, 0, 1, 1], [], []>} : vector<2x128xbf16>, vector<128x512xbf16>, vector<2x512xf32> -> vector<2x512xf32>
    %23 = arith.addf %19, %22 : vector<2x512xf32>
    %24 = vector.extract_strided_slice %23 {offsets = [0, 0], sizes = [2, 384], strides = [1, 1]} : vector<2x512xf32> to vector<2x384xf32>
    %25 = arith.negf %24 : vector<2x384xf32>
    %26 = math.exp %25 : vector<2x384xf32>
    %cst_15 = arith.constant 1.000000e+00 : f32
    %27 = vector.broadcast %cst_15 : f32 to vector<2x384xf32>
    %28 = arith.addf %27, %26 : vector<2x384xf32>
    %29 = arith.divf %27, %28 : vector<2x384xf32>
    %30 = vector.extract_strided_slice %23 {offsets = [0, 384], sizes = [2, 128], strides = [1, 1]} : vector<2x512xf32> to vector<2x128xf32>
    %31 = math.tanh %30 : vector<2x128xf32>
    %32 = vector.extract_strided_slice %29 {offsets = [0, 0], sizes = [2, 128], strides = [1, 1]} : vector<2x384xf32> to vector<2x128xf32>
    %33 = vector.extract_strided_slice %29 {offsets = [0, 128], sizes = [2, 128], strides = [1, 1]} : vector<2x384xf32> to vector<2x128xf32>
    %34 = vector.extract_strided_slice %29 {offsets = [0, 256], sizes = [2, 128], strides = [1, 1]} : vector<2x384xf32> to vector<2x128xf32>
    %35 = arith.mulf %33, %16 : vector<2x128xf32>
    %36 = arith.mulf %32, %31 : vector<2x128xf32>
    %37 = arith.addf %35, %36 : vector<2x128xf32>
    %38 = math.tanh %37 : vector<2x128xf32>
    %39 = arith.mulf %34, %38 : vector<2x128xf32>
    %40 = arith.truncf %39 : vector<2x128xf32> to vector<2x128xbf16>
    %c0_16 = arith.constant 0 : index
    %c0_17 = arith.constant 0 : index
    %41 = vector.load %arg4[%c0_16, %c0_17] : memref<128x512xbf16, #tpu.memory_space<vmem>>, vector<128x512xbf16>
    %cst_18 = arith.constant dense<0.000000e+00> : vector<2x512xf32>
    %42 = tpu.matmul %40, %41, %cst_18 {dimension_numbers = #tpu.dot_dimension_numbers<[1], [0], [0], [1], [0, 0, 1, 1], [], []>} : vector<2x128xbf16>, vector<128x512xbf16>, vector<2x512xf32> -> vector<2x512xf32>
    %43 = arith.truncf %17 : vector<2x128xf32> to vector<2x128xbf16>
    %c0_19 = arith.constant 0 : index
    %c0_20 = arith.constant 0 : index
    %44 = vector.load %arg5[%c0_19, %c0_20] : memref<128x512xbf16, #tpu.memory_space<vmem>>, vector<128x512xbf16>
    %cst_21 = arith.constant dense<0.000000e+00> : vector<2x512xf32>
    %45 = tpu.matmul %43, %44, %cst_21 {dimension_numbers = #tpu.dot_dimension_numbers<[1], [0], [0], [1], [0, 0, 1, 1], [], []>} : vector<2x128xbf16>, vector<128x512xbf16>, vector<2x512xf32> -> vector<2x512xf32>
    %46 = arith.addf %42, %45 : vector<2x512xf32>
    %47 = arith.addf %46, %14 : vector<2x512xf32>
    %48 = vector.extract_strided_slice %47 {offsets = [0, 0], sizes = [2, 384], strides = [1, 1]} : vector<2x512xf32> to vector<2x384xf32>
    %49 = arith.negf %48 : vector<2x384xf32>
    %50 = math.exp %49 : vector<2x384xf32>
    %cst_22 = arith.constant 1.000000e+00 : f32
    %51 = vector.broadcast %cst_22 : f32 to vector<2x384xf32>
    %52 = arith.addf %51, %50 : vector<2x384xf32>
    %53 = arith.divf %51, %52 : vector<2x384xf32>
    %54 = vector.extract_strided_slice %47 {offsets = [0, 384], sizes = [2, 128], strides = [1, 1]} : vector<2x512xf32> to vector<2x128xf32>
    %55 = math.tanh %54 : vector<2x128xf32>
    %56 = vector.extract_strided_slice %53 {offsets = [0, 0], sizes = [2, 128], strides = [1, 1]} : vector<2x384xf32> to vector<2x128xf32>
    %57 = vector.extract_strided_slice %53 {offsets = [0, 128], sizes = [2, 128], strides = [1, 1]} : vector<2x384xf32> to vector<2x128xf32>
    %58 = vector.extract_strided_slice %53 {offsets = [0, 256], sizes = [2, 128], strides = [1, 1]} : vector<2x384xf32> to vector<2x128xf32>
    %59 = arith.mulf %57, %18 : vector<2x128xf32>
    %60 = arith.mulf %56, %55 : vector<2x128xf32>
    %61 = arith.addf %59, %60 : vector<2x128xf32>
    %62 = math.tanh %61 : vector<2x128xf32>
    %63 = arith.mulf %58, %62 : vector<2x128xf32>
    %64 = vector.extract_strided_slice %11 {offsets = [2, 0], sizes = [2, 512], strides = [1, 1]} : vector<16x512xf32> to vector<2x512xf32>
    %65 = arith.truncf %39 : vector<2x128xf32> to vector<2x128xbf16>
    %c0_23 = arith.constant 0 : index
    %c0_24 = arith.constant 0 : index
    %66 = vector.load %arg3[%c0_23, %c0_24] : memref<128x512xbf16, #tpu.memory_space<vmem>>, vector<128x512xbf16>
    %cst_25 = arith.constant dense<0.000000e+00> : vector<2x512xf32>
    %67 = tpu.matmul %65, %66, %cst_25 {dimension_numbers = #tpu.dot_dimension_numbers<[1], [0], [0], [1], [0, 0, 1, 1], [], []>} : vector<2x128xbf16>, vector<128x512xbf16>, vector<2x512xf32> -> vector<2x512xf32>
    %68 = arith.addf %64, %67 : vector<2x512xf32>
    %69 = vector.extract_strided_slice %68 {offsets = [0, 0], sizes = [2, 384], strides = [1, 1]} : vector<2x512xf32> to vector<2x384xf32>
    %70 = arith.negf %69 : vector<2x384xf32>
    %71 = math.exp %70 : vector<2x384xf32>
    %cst_26 = arith.constant 1.000000e+00 : f32
    %72 = vector.broadcast %cst_26 : f32 to vector<2x384xf32>
    %73 = arith.addf %72, %71 : vector<2x384xf32>
    %74 = arith.divf %72, %73 : vector<2x384xf32>
    %75 = vector.extract_strided_slice %68 {offsets = [0, 384], sizes = [2, 128], strides = [1, 1]} : vector<2x512xf32> to vector<2x128xf32>
    %76 = math.tanh %75 : vector<2x128xf32>
    %77 = vector.extract_strided_slice %74 {offsets = [0, 0], sizes = [2, 128], strides = [1, 1]} : vector<2x384xf32> to vector<2x128xf32>
    %78 = vector.extract_strided_slice %74 {offsets = [0, 128], sizes = [2, 128], strides = [1, 1]} : vector<2x384xf32> to vector<2x128xf32>
    %79 = vector.extract_strided_slice %74 {offsets = [0, 256], sizes = [2, 128], strides = [1, 1]} : vector<2x384xf32> to vector<2x128xf32>
    %80 = arith.mulf %78, %37 : vector<2x128xf32>
    %81 = arith.mulf %77, %76 : vector<2x128xf32>
    %82 = arith.addf %80, %81 : vector<2x128xf32>
    %83 = math.tanh %82 : vector<2x128xf32>
    %84 = arith.mulf %79, %83 : vector<2x128xf32>
    %85 = arith.truncf %84 : vector<2x128xf32> to vector<2x128xbf16>
    %c0_27 = arith.constant 0 : index
    %c0_28 = arith.constant 0 : index
    %86 = vector.load %arg4[%c0_27, %c0_28] : memref<128x512xbf16, #tpu.memory_space<vmem>>, vector<128x512xbf16>
    %cst_29 = arith.constant dense<0.000000e+00> : vector<2x512xf32>
    %87 = tpu.matmul %85, %86, %cst_29 {dimension_numbers = #tpu.dot_dimension_numbers<[1], [0], [0], [1], [0, 0, 1, 1], [], []>} : vector<2x128xbf16>, vector<128x512xbf16>, vector<2x512xf32> -> vector<2x512xf32>
    %88 = arith.truncf %63 : vector<2x128xf32> to vector<2x128xbf16>
    %c0_30 = arith.constant 0 : index
    %c0_31 = arith.constant 0 : index
    %89 = vector.load %arg5[%c0_30, %c0_31] : memref<128x512xbf16, #tpu.memory_space<vmem>>, vector<128x512xbf16>
    %cst_32 = arith.constant dense<0.000000e+00> : vector<2x512xf32>
    %90 = tpu.matmul %88, %89, %cst_32 {dimension_numbers = #tpu.dot_dimension_numbers<[1], [0], [0], [1], [0, 0, 1, 1], [], []>} : vector<2x128xbf16>, vector<128x512xbf16>, vector<2x512xf32> -> vector<2x512xf32>
    %91 = arith.addf %87, %90 : vector<2x512xf32>
    %92 = arith.addf %91, %14 : vector<2x512xf32>
    %93 = vector.extract_strided_slice %92 {offsets = [0, 0], sizes = [2, 384], strides = [1, 1]} : vector<2x512xf32> to vector<2x384xf32>
    %94 = arith.negf %93 : vector<2x384xf32>
    %95 = math.exp %94 : vector<2x384xf32>
    %cst_33 = arith.constant 1.000000e+00 : f32
    %96 = vector.broadcast %cst_33 : f32 to vector<2x384xf32>
    %97 = arith.addf %96, %95 : vector<2x384xf32>
    %98 = arith.divf %96, %97 : vector<2x384xf32>
    %99 = vector.extract_strided_slice %92 {offsets = [0, 384], sizes = [2, 128], strides = [1, 1]} : vector<2x512xf32> to vector<2x128xf32>
    %100 = math.tanh %99 : vector<2x128xf32>
    %101 = vector.extract_strided_slice %98 {offsets = [0, 0], sizes = [2, 128], strides = [1, 1]} : vector<2x384xf32> to vector<2x128xf32>
    %102 = vector.extract_strided_slice %98 {offsets = [0, 128], sizes = [2, 128], strides = [1, 1]} : vector<2x384xf32> to vector<2x128xf32>
    %103 = vector.extract_strided_slice %98 {offsets = [0, 256], sizes = [2, 128], strides = [1, 1]} : vector<2x384xf32> to vector<2x128xf32>
    %104 = arith.mulf %102, %61 : vector<2x128xf32>
    %105 = arith.mulf %101, %100 : vector<2x128xf32>
    %106 = arith.addf %104, %105 : vector<2x128xf32>
    %107 = math.tanh %106 : vector<2x128xf32>
    %108 = arith.mulf %103, %107 : vector<2x128xf32>
    %109 = vector.extract_strided_slice %11 {offsets = [4, 0], sizes = [2, 512], strides = [1, 1]} : vector<16x512xf32> to vector<2x512xf32>
    %110 = arith.truncf %84 : vector<2x128xf32> to vector<2x128xbf16>
    %c0_34 = arith.constant 0 : index
    %c0_35 = arith.constant 0 : index
    %111 = vector.load %arg3[%c0_34, %c0_35] : memref<128x512xbf16, #tpu.memory_space<vmem>>, vector<128x512xbf16>
    %cst_36 = arith.constant dense<0.000000e+00> : vector<2x512xf32>
    %112 = tpu.matmul %110, %111, %cst_36 {dimension_numbers = #tpu.dot_dimension_numbers<[1], [0], [0], [1], [0, 0, 1, 1], [], []>} : vector<2x128xbf16>, vector<128x512xbf16>, vector<2x512xf32> -> vector<2x512xf32>
    %113 = arith.addf %109, %112 : vector<2x512xf32>
    %114 = vector.extract_strided_slice %113 {offsets = [0, 0], sizes = [2, 384], strides = [1, 1]} : vector<2x512xf32> to vector<2x384xf32>
    %115 = arith.negf %114 : vector<2x384xf32>
    %116 = math.exp %115 : vector<2x384xf32>
    %cst_37 = arith.constant 1.000000e+00 : f32
    %117 = vector.broadcast %cst_37 : f32 to vector<2x384xf32>
    %118 = arith.addf %117, %116 : vector<2x384xf32>
    %119 = arith.divf %117, %118 : vector<2x384xf32>
    %120 = vector.extract_strided_slice %113 {offsets = [0, 384], sizes = [2, 128], strides = [1, 1]} : vector<2x512xf32> to vector<2x128xf32>
    %121 = math.tanh %120 : vector<2x128xf32>
    %122 = vector.extract_strided_slice %119 {offsets = [0, 0], sizes = [2, 128], strides = [1, 1]} : vector<2x384xf32> to vector<2x128xf32>
    %123 = vector.extract_strided_slice %119 {offsets = [0, 128], sizes = [2, 128], strides = [1, 1]} : vector<2x384xf32> to vector<2x128xf32>
    %124 = vector.extract_strided_slice %119 {offsets = [0, 256], sizes = [2, 128], strides = [1, 1]} : vector<2x384xf32> to vector<2x128xf32>
    %125 = arith.mulf %123, %82 : vector<2x128xf32>
    %126 = arith.mulf %122, %121 : vector<2x128xf32>
    %127 = arith.addf %125, %126 : vector<2x128xf32>
    %128 = math.tanh %127 : vector<2x128xf32>
    %129 = arith.mulf %124, %128 : vector<2x128xf32>
    %130 = arith.truncf %129 : vector<2x128xf32> to vector<2x128xbf16>
    %c0_38 = arith.constant 0 : index
    %c0_39 = arith.constant 0 : index
    %131 = vector.load %arg4[%c0_38, %c0_39] : memref<128x512xbf16, #tpu.memory_space<vmem>>, vector<128x512xbf16>
    %cst_40 = arith.constant dense<0.000000e+00> : vector<2x512xf32>
    %132 = tpu.matmul %130, %131, %cst_40 {dimension_numbers = #tpu.dot_dimension_numbers<[1], [0], [0], [1], [0, 0, 1, 1], [], []>} : vector<2x128xbf16>, vector<128x512xbf16>, vector<2x512xf32> -> vector<2x512xf32>
    %133 = arith.truncf %108 : vector<2x128xf32> to vector<2x128xbf16>
    %c0_41 = arith.constant 0 : index
    %c0_42 = arith.constant 0 : index
    %134 = vector.load %arg5[%c0_41, %c0_42] : memref<128x512xbf16, #tpu.memory_space<vmem>>, vector<128x512xbf16>
    %cst_43 = arith.constant dense<0.000000e+00> : vector<2x512xf32>
    %135 = tpu.matmul %133, %134, %cst_43 {dimension_numbers = #tpu.dot_dimension_numbers<[1], [0], [0], [1], [0, 0, 1, 1], [], []>} : vector<2x128xbf16>, vector<128x512xbf16>, vector<2x512xf32> -> vector<2x512xf32>
    %136 = arith.addf %132, %135 : vector<2x512xf32>
    %137 = arith.addf %136, %14 : vector<2x512xf32>
    %138 = vector.extract_strided_slice %137 {offsets = [0, 0], sizes = [2, 384], strides = [1, 1]} : vector<2x512xf32> to vector<2x384xf32>
    %139 = arith.negf %138 : vector<2x384xf32>
    %140 = math.exp %139 : vector<2x384xf32>
    %cst_44 = arith.constant 1.000000e+00 : f32
    %141 = vector.broadcast %cst_44 : f32 to vector<2x384xf32>
    %142 = arith.addf %141, %140 : vector<2x384xf32>
    %143 = arith.divf %141, %142 : vector<2x384xf32>
    %144 = vector.extract_strided_slice %137 {offsets = [0, 384], sizes = [2, 128], strides = [1, 1]} : vector<2x512xf32> to vector<2x128xf32>
    %145 = math.tanh %144 : vector<2x128xf32>
    %146 = vector.extract_strided_slice %143 {offsets = [0, 0], sizes = [2, 128], strides = [1, 1]} : vector<2x384xf32> to vector<2x128xf32>
    %147 = vector.extract_strided_slice %143 {offsets = [0, 128], sizes = [2, 128], strides = [1, 1]} : vector<2x384xf32> to vector<2x128xf32>
    %148 = vector.extract_strided_slice %143 {offsets = [0, 256], sizes = [2, 128], strides = [1, 1]} : vector<2x384xf32> to vector<2x128xf32>
    %149 = arith.mulf %147, %106 : vector<2x128xf32>
    %150 = arith.mulf %146, %145 : vector<2x128xf32>
    %151 = arith.addf %149, %150 : vector<2x128xf32>
    %152 = math.tanh %151 : vector<2x128xf32>
    %153 = arith.mulf %148, %152 : vector<2x128xf32>
    %154 = vector.extract_strided_slice %11 {offsets = [6, 0], sizes = [2, 512], strides = [1, 1]} : vector<16x512xf32> to vector<2x512xf32>
    %155 = arith.truncf %129 : vector<2x128xf32> to vector<2x128xbf16>
    %c0_45 = arith.constant 0 : index
    %c0_46 = arith.constant 0 : index
    %156 = vector.load %arg3[%c0_45, %c0_46] : memref<128x512xbf16, #tpu.memory_space<vmem>>, vector<128x512xbf16>
    %cst_47 = arith.constant dense<0.000000e+00> : vector<2x512xf32>
    %157 = tpu.matmul %155, %156, %cst_47 {dimension_numbers = #tpu.dot_dimension_numbers<[1], [0], [0], [1], [0, 0, 1, 1], [], []>} : vector<2x128xbf16>, vector<128x512xbf16>, vector<2x512xf32> -> vector<2x512xf32>
    %158 = arith.addf %154, %157 : vector<2x512xf32>
    %159 = vector.extract_strided_slice %158 {offsets = [0, 0], sizes = [2, 384], strides = [1, 1]} : vector<2x512xf32> to vector<2x384xf32>
    %160 = arith.negf %159 : vector<2x384xf32>
    %161 = math.exp %160 : vector<2x384xf32>
    %cst_48 = arith.constant 1.000000e+00 : f32
    %162 = vector.broadcast %cst_48 : f32 to vector<2x384xf32>
    %163 = arith.addf %162, %161 : vector<2x384xf32>
    %164 = arith.divf %162, %163 : vector<2x384xf32>
    %165 = vector.extract_strided_slice %158 {offsets = [0, 384], sizes = [2, 128], strides = [1, 1]} : vector<2x512xf32> to vector<2x128xf32>
    %166 = math.tanh %165 : vector<2x128xf32>
    %167 = vector.extract_strided_slice %164 {offsets = [0, 0], sizes = [2, 128], strides = [1, 1]} : vector<2x384xf32> to vector<2x128xf32>
    %168 = vector.extract_strided_slice %164 {offsets = [0, 128], sizes = [2, 128], strides = [1, 1]} : vector<2x384xf32> to vector<2x128xf32>
    %169 = vector.extract_strided_slice %164 {offsets = [0, 256], sizes = [2, 128], strides = [1, 1]} : vector<2x384xf32> to vector<2x128xf32>
    %170 = arith.mulf %168, %127 : vector<2x128xf32>
    %171 = arith.mulf %167, %166 : vector<2x128xf32>
    %172 = arith.addf %170, %171 : vector<2x128xf32>
    %173 = math.tanh %172 : vector<2x128xf32>
    %174 = arith.mulf %169, %173 : vector<2x128xf32>
    %175 = arith.truncf %174 : vector<2x128xf32> to vector<2x128xbf16>
    %c0_49 = arith.constant 0 : index
    %c0_50 = arith.constant 0 : index
    %176 = vector.load %arg4[%c0_49, %c0_50] : memref<128x512xbf16, #tpu.memory_space<vmem>>, vector<128x512xbf16>
    %cst_51 = arith.constant dense<0.000000e+00> : vector<2x512xf32>
    %177 = tpu.matmul %175, %176, %cst_51 {dimension_numbers = #tpu.dot_dimension_numbers<[1], [0], [0], [1], [0, 0, 1, 1], [], []>} : vector<2x128xbf16>, vector<128x512xbf16>, vector<2x512xf32> -> vector<2x512xf32>
    %178 = arith.truncf %153 : vector<2x128xf32> to vector<2x128xbf16>
    %c0_52 = arith.constant 0 : index
    %c0_53 = arith.constant 0 : index
    %179 = vector.load %arg5[%c0_52, %c0_53] : memref<128x512xbf16, #tpu.memory_space<vmem>>, vector<128x512xbf16>
    %cst_54 = arith.constant dense<0.000000e+00> : vector<2x512xf32>
    %180 = tpu.matmul %178, %179, %cst_54 {dimension_numbers = #tpu.dot_dimension_numbers<[1], [0], [0], [1], [0, 0, 1, 1], [], []>} : vector<2x128xbf16>, vector<128x512xbf16>, vector<2x512xf32> -> vector<2x512xf32>
    %181 = arith.addf %177, %180 : vector<2x512xf32>
    %182 = arith.addf %181, %14 : vector<2x512xf32>
    %183 = vector.extract_strided_slice %182 {offsets = [0, 0], sizes = [2, 384], strides = [1, 1]} : vector<2x512xf32> to vector<2x384xf32>
    %184 = arith.negf %183 : vector<2x384xf32>
    %185 = math.exp %184 : vector<2x384xf32>
    %cst_55 = arith.constant 1.000000e+00 : f32
    %186 = vector.broadcast %cst_55 : f32 to vector<2x384xf32>
    %187 = arith.addf %186, %185 : vector<2x384xf32>
    %188 = arith.divf %186, %187 : vector<2x384xf32>
    %189 = vector.extract_strided_slice %182 {offsets = [0, 384], sizes = [2, 128], strides = [1, 1]} : vector<2x512xf32> to vector<2x128xf32>
    %190 = math.tanh %189 : vector<2x128xf32>
    %191 = vector.extract_strided_slice %188 {offsets = [0, 0], sizes = [2, 128], strides = [1, 1]} : vector<2x384xf32> to vector<2x128xf32>
    %192 = vector.extract_strided_slice %188 {offsets = [0, 128], sizes = [2, 128], strides = [1, 1]} : vector<2x384xf32> to vector<2x128xf32>
    %193 = vector.extract_strided_slice %188 {offsets = [0, 256], sizes = [2, 128], strides = [1, 1]} : vector<2x384xf32> to vector<2x128xf32>
    %194 = arith.mulf %192, %151 : vector<2x128xf32>
    %195 = arith.mulf %191, %190 : vector<2x128xf32>
    %196 = arith.addf %194, %195 : vector<2x128xf32>
    %197 = math.tanh %196 : vector<2x128xf32>
    %198 = arith.mulf %193, %197 : vector<2x128xf32>
    %199 = vector.extract_strided_slice %11 {offsets = [8, 0], sizes = [2, 512], strides = [1, 1]} : vector<16x512xf32> to vector<2x512xf32>
    %200 = arith.truncf %174 : vector<2x128xf32> to vector<2x128xbf16>
    %c0_56 = arith.constant 0 : index
    %c0_57 = arith.constant 0 : index
    %201 = vector.load %arg3[%c0_56, %c0_57] : memref<128x512xbf16, #tpu.memory_space<vmem>>, vector<128x512xbf16>
    %cst_58 = arith.constant dense<0.000000e+00> : vector<2x512xf32>
    %202 = tpu.matmul %200, %201, %cst_58 {dimension_numbers = #tpu.dot_dimension_numbers<[1], [0], [0], [1], [0, 0, 1, 1], [], []>} : vector<2x128xbf16>, vector<128x512xbf16>, vector<2x512xf32> -> vector<2x512xf32>
    %203 = arith.addf %199, %202 : vector<2x512xf32>
    %204 = vector.extract_strided_slice %203 {offsets = [0, 0], sizes = [2, 384], strides = [1, 1]} : vector<2x512xf32> to vector<2x384xf32>
    %205 = arith.negf %204 : vector<2x384xf32>
    %206 = math.exp %205 : vector<2x384xf32>
    %cst_59 = arith.constant 1.000000e+00 : f32
    %207 = vector.broadcast %cst_59 : f32 to vector<2x384xf32>
    %208 = arith.addf %207, %206 : vector<2x384xf32>
    %209 = arith.divf %207, %208 : vector<2x384xf32>
    %210 = vector.extract_strided_slice %203 {offsets = [0, 384], sizes = [2, 128], strides = [1, 1]} : vector<2x512xf32> to vector<2x128xf32>
    %211 = math.tanh %210 : vector<2x128xf32>
    %212 = vector.extract_strided_slice %209 {offsets = [0, 0], sizes = [2, 128], strides = [1, 1]} : vector<2x384xf32> to vector<2x128xf32>
    %213 = vector.extract_strided_slice %209 {offsets = [0, 128], sizes = [2, 128], strides = [1, 1]} : vector<2x384xf32> to vector<2x128xf32>
    %214 = vector.extract_strided_slice %209 {offsets = [0, 256], sizes = [2, 128], strides = [1, 1]} : vector<2x384xf32> to vector<2x128xf32>
    %215 = arith.mulf %213, %172 : vector<2x128xf32>
    %216 = arith.mulf %212, %211 : vector<2x128xf32>
    %217 = arith.addf %215, %216 : vector<2x128xf32>
    %218 = math.tanh %217 : vector<2x128xf32>
    %219 = arith.mulf %214, %218 : vector<2x128xf32>
    %220 = arith.truncf %219 : vector<2x128xf32> to vector<2x128xbf16>
    %c0_60 = arith.constant 0 : index
    %c0_61 = arith.constant 0 : index
    %221 = vector.load %arg4[%c0_60, %c0_61] : memref<128x512xbf16, #tpu.memory_space<vmem>>, vector<128x512xbf16>
    %cst_62 = arith.constant dense<0.000000e+00> : vector<2x512xf32>
    %222 = tpu.matmul %220, %221, %cst_62 {dimension_numbers = #tpu.dot_dimension_numbers<[1], [0], [0], [1], [0, 0, 1, 1], [], []>} : vector<2x128xbf16>, vector<128x512xbf16>, vector<2x512xf32> -> vector<2x512xf32>
    %223 = arith.truncf %198 : vector<2x128xf32> to vector<2x128xbf16>
    %c0_63 = arith.constant 0 : index
    %c0_64 = arith.constant 0 : index
    %224 = vector.load %arg5[%c0_63, %c0_64] : memref<128x512xbf16, #tpu.memory_space<vmem>>, vector<128x512xbf16>
    %cst_65 = arith.constant dense<0.000000e+00> : vector<2x512xf32>
    %225 = tpu.matmul %223, %224, %cst_65 {dimension_numbers = #tpu.dot_dimension_numbers<[1], [0], [0], [1], [0, 0, 1, 1], [], []>} : vector<2x128xbf16>, vector<128x512xbf16>, vector<2x512xf32> -> vector<2x512xf32>
    %226 = arith.addf %222, %225 : vector<2x512xf32>
    %227 = arith.addf %226, %14 : vector<2x512xf32>
    %228 = vector.extract_strided_slice %227 {offsets = [0, 0], sizes = [2, 384], strides = [1, 1]} : vector<2x512xf32> to vector<2x384xf32>
    %229 = arith.negf %228 : vector<2x384xf32>
    %230 = math.exp %229 : vector<2x384xf32>
    %cst_66 = arith.constant 1.000000e+00 : f32
    %231 = vector.broadcast %cst_66 : f32 to vector<2x384xf32>
    %232 = arith.addf %231, %230 : vector<2x384xf32>
    %233 = arith.divf %231, %232 : vector<2x384xf32>
    %234 = vector.extract_strided_slice %227 {offsets = [0, 384], sizes = [2, 128], strides = [1, 1]} : vector<2x512xf32> to vector<2x128xf32>
    %235 = math.tanh %234 : vector<2x128xf32>
    %236 = vector.extract_strided_slice %233 {offsets = [0, 0], sizes = [2, 128], strides = [1, 1]} : vector<2x384xf32> to vector<2x128xf32>
    %237 = vector.extract_strided_slice %233 {offsets = [0, 128], sizes = [2, 128], strides = [1, 1]} : vector<2x384xf32> to vector<2x128xf32>
    %238 = vector.extract_strided_slice %233 {offsets = [0, 256], sizes = [2, 128], strides = [1, 1]} : vector<2x384xf32> to vector<2x128xf32>
    %239 = arith.mulf %237, %196 : vector<2x128xf32>
    %240 = arith.mulf %236, %235 : vector<2x128xf32>
    %241 = arith.addf %239, %240 : vector<2x128xf32>
    %242 = math.tanh %241 : vector<2x128xf32>
    %243 = arith.mulf %238, %242 : vector<2x128xf32>
    %244 = vector.extract_strided_slice %11 {offsets = [10, 0], sizes = [2, 512], strides = [1, 1]} : vector<16x512xf32> to vector<2x512xf32>
    %245 = arith.truncf %219 : vector<2x128xf32> to vector<2x128xbf16>
    %c0_67 = arith.constant 0 : index
    %c0_68 = arith.constant 0 : index
    %246 = vector.load %arg3[%c0_67, %c0_68] : memref<128x512xbf16, #tpu.memory_space<vmem>>, vector<128x512xbf16>
    %cst_69 = arith.constant dense<0.000000e+00> : vector<2x512xf32>
    %247 = tpu.matmul %245, %246, %cst_69 {dimension_numbers = #tpu.dot_dimension_numbers<[1], [0], [0], [1], [0, 0, 1, 1], [], []>} : vector<2x128xbf16>, vector<128x512xbf16>, vector<2x512xf32> -> vector<2x512xf32>
    %248 = arith.addf %244, %247 : vector<2x512xf32>
    %249 = vector.extract_strided_slice %248 {offsets = [0, 0], sizes = [2, 384], strides = [1, 1]} : vector<2x512xf32> to vector<2x384xf32>
    %250 = arith.negf %249 : vector<2x384xf32>
    %251 = math.exp %250 : vector<2x384xf32>
    %cst_70 = arith.constant 1.000000e+00 : f32
    %252 = vector.broadcast %cst_70 : f32 to vector<2x384xf32>
    %253 = arith.addf %252, %251 : vector<2x384xf32>
    %254 = arith.divf %252, %253 : vector<2x384xf32>
    %255 = vector.extract_strided_slice %248 {offsets = [0, 384], sizes = [2, 128], strides = [1, 1]} : vector<2x512xf32> to vector<2x128xf32>
    %256 = math.tanh %255 : vector<2x128xf32>
    %257 = vector.extract_strided_slice %254 {offsets = [0, 0], sizes = [2, 128], strides = [1, 1]} : vector<2x384xf32> to vector<2x128xf32>
    %258 = vector.extract_strided_slice %254 {offsets = [0, 128], sizes = [2, 128], strides = [1, 1]} : vector<2x384xf32> to vector<2x128xf32>
    %259 = vector.extract_strided_slice %254 {offsets = [0, 256], sizes = [2, 128], strides = [1, 1]} : vector<2x384xf32> to vector<2x128xf32>
    %260 = arith.mulf %258, %217 : vector<2x128xf32>
    %261 = arith.mulf %257, %256 : vector<2x128xf32>
    %262 = arith.addf %260, %261 : vector<2x128xf32>
    %263 = math.tanh %262 : vector<2x128xf32>
    %264 = arith.mulf %259, %263 : vector<2x128xf32>
    %265 = arith.truncf %264 : vector<2x128xf32> to vector<2x128xbf16>
    %c0_71 = arith.constant 0 : index
    %c0_72 = arith.constant 0 : index
    %266 = vector.load %arg4[%c0_71, %c0_72] : memref<128x512xbf16, #tpu.memory_space<vmem>>, vector<128x512xbf16>
    %cst_73 = arith.constant dense<0.000000e+00> : vector<2x512xf32>
    %267 = tpu.matmul %265, %266, %cst_73 {dimension_numbers = #tpu.dot_dimension_numbers<[1], [0], [0], [1], [0, 0, 1, 1], [], []>} : vector<2x128xbf16>, vector<128x512xbf16>, vector<2x512xf32> -> vector<2x512xf32>
    %268 = arith.truncf %243 : vector<2x128xf32> to vector<2x128xbf16>
    %c0_74 = arith.constant 0 : index
    %c0_75 = arith.constant 0 : index
    %269 = vector.load %arg5[%c0_74, %c0_75] : memref<128x512xbf16, #tpu.memory_space<vmem>>, vector<128x512xbf16>
    %cst_76 = arith.constant dense<0.000000e+00> : vector<2x512xf32>
    %270 = tpu.matmul %268, %269, %cst_76 {dimension_numbers = #tpu.dot_dimension_numbers<[1], [0], [0], [1], [0, 0, 1, 1], [], []>} : vector<2x128xbf16>, vector<128x512xbf16>, vector<2x512xf32> -> vector<2x512xf32>
    %271 = arith.addf %267, %270 : vector<2x512xf32>
    %272 = arith.addf %271, %14 : vector<2x512xf32>
    %273 = vector.extract_strided_slice %272 {offsets = [0, 0], sizes = [2, 384], strides = [1, 1]} : vector<2x512xf32> to vector<2x384xf32>
    %274 = arith.negf %273 : vector<2x384xf32>
    %275 = math.exp %274 : vector<2x384xf32>
    %cst_77 = arith.constant 1.000000e+00 : f32
    %276 = vector.broadcast %cst_77 : f32 to vector<2x384xf32>
    %277 = arith.addf %276, %275 : vector<2x384xf32>
    %278 = arith.divf %276, %277 : vector<2x384xf32>
    %279 = vector.extract_strided_slice %272 {offsets = [0, 384], sizes = [2, 128], strides = [1, 1]} : vector<2x512xf32> to vector<2x128xf32>
    %280 = math.tanh %279 : vector<2x128xf32>
    %281 = vector.extract_strided_slice %278 {offsets = [0, 0], sizes = [2, 128], strides = [1, 1]} : vector<2x384xf32> to vector<2x128xf32>
    %282 = vector.extract_strided_slice %278 {offsets = [0, 128], sizes = [2, 128], strides = [1, 1]} : vector<2x384xf32> to vector<2x128xf32>
    %283 = vector.extract_strided_slice %278 {offsets = [0, 256], sizes = [2, 128], strides = [1, 1]} : vector<2x384xf32> to vector<2x128xf32>
    %284 = arith.mulf %282, %241 : vector<2x128xf32>
    %285 = arith.mulf %281, %280 : vector<2x128xf32>
    %286 = arith.addf %284, %285 : vector<2x128xf32>
    %287 = math.tanh %286 : vector<2x128xf32>
    %288 = arith.mulf %283, %287 : vector<2x128xf32>
    %289 = vector.extract_strided_slice %11 {offsets = [12, 0], sizes = [2, 512], strides = [1, 1]} : vector<16x512xf32> to vector<2x512xf32>
    %290 = arith.truncf %264 : vector<2x128xf32> to vector<2x128xbf16>
    %c0_78 = arith.constant 0 : index
    %c0_79 = arith.constant 0 : index
    %291 = vector.load %arg3[%c0_78, %c0_79] : memref<128x512xbf16, #tpu.memory_space<vmem>>, vector<128x512xbf16>
    %cst_80 = arith.constant dense<0.000000e+00> : vector<2x512xf32>
    %292 = tpu.matmul %290, %291, %cst_80 {dimension_numbers = #tpu.dot_dimension_numbers<[1], [0], [0], [1], [0, 0, 1, 1], [], []>} : vector<2x128xbf16>, vector<128x512xbf16>, vector<2x512xf32> -> vector<2x512xf32>
    %293 = arith.addf %289, %292 : vector<2x512xf32>
    %294 = vector.extract_strided_slice %293 {offsets = [0, 0], sizes = [2, 384], strides = [1, 1]} : vector<2x512xf32> to vector<2x384xf32>
    %295 = arith.negf %294 : vector<2x384xf32>
    %296 = math.exp %295 : vector<2x384xf32>
    %cst_81 = arith.constant 1.000000e+00 : f32
    %297 = vector.broadcast %cst_81 : f32 to vector<2x384xf32>
    %298 = arith.addf %297, %296 : vector<2x384xf32>
    %299 = arith.divf %297, %298 : vector<2x384xf32>
    %300 = vector.extract_strided_slice %293 {offsets = [0, 384], sizes = [2, 128], strides = [1, 1]} : vector<2x512xf32> to vector<2x128xf32>
    %301 = math.tanh %300 : vector<2x128xf32>
    %302 = vector.extract_strided_slice %299 {offsets = [0, 0], sizes = [2, 128], strides = [1, 1]} : vector<2x384xf32> to vector<2x128xf32>
    %303 = vector.extract_strided_slice %299 {offsets = [0, 128], sizes = [2, 128], strides = [1, 1]} : vector<2x384xf32> to vector<2x128xf32>
    %304 = vector.extract_strided_slice %299 {offsets = [0, 256], sizes = [2, 128], strides = [1, 1]} : vector<2x384xf32> to vector<2x128xf32>
    %305 = arith.mulf %303, %262 : vector<2x128xf32>
    %306 = arith.mulf %302, %301 : vector<2x128xf32>
    %307 = arith.addf %305, %306 : vector<2x128xf32>
    %308 = math.tanh %307 : vector<2x128xf32>
    %309 = arith.mulf %304, %308 : vector<2x128xf32>
    %310 = arith.truncf %309 : vector<2x128xf32> to vector<2x128xbf16>
    %c0_82 = arith.constant 0 : index
    %c0_83 = arith.constant 0 : index
    %311 = vector.load %arg4[%c0_82, %c0_83] : memref<128x512xbf16, #tpu.memory_space<vmem>>, vector<128x512xbf16>
    %cst_84 = arith.constant dense<0.000000e+00> : vector<2x512xf32>
    %312 = tpu.matmul %310, %311, %cst_84 {dimension_numbers = #tpu.dot_dimension_numbers<[1], [0], [0], [1], [0, 0, 1, 1], [], []>} : vector<2x128xbf16>, vector<128x512xbf16>, vector<2x512xf32> -> vector<2x512xf32>
    %313 = arith.truncf %288 : vector<2x128xf32> to vector<2x128xbf16>
    %c0_85 = arith.constant 0 : index
    %c0_86 = arith.constant 0 : index
    %314 = vector.load %arg5[%c0_85, %c0_86] : memref<128x512xbf16, #tpu.memory_space<vmem>>, vector<128x512xbf16>
    %cst_87 = arith.constant dense<0.000000e+00> : vector<2x512xf32>
    %315 = tpu.matmul %313, %314, %cst_87 {dimension_numbers = #tpu.dot_dimension_numbers<[1], [0], [0], [1], [0, 0, 1, 1], [], []>} : vector<2x128xbf16>, vector<128x512xbf16>, vector<2x512xf32> -> vector<2x512xf32>
    %316 = arith.addf %312, %315 : vector<2x512xf32>
    %317 = arith.addf %316, %14 : vector<2x512xf32>
    %318 = vector.extract_strided_slice %317 {offsets = [0, 0], sizes = [2, 384], strides = [1, 1]} : vector<2x512xf32> to vector<2x384xf32>
    %319 = arith.negf %318 : vector<2x384xf32>
    %320 = math.exp %319 : vector<2x384xf32>
    %cst_88 = arith.constant 1.000000e+00 : f32
    %321 = vector.broadcast %cst_88 : f32 to vector<2x384xf32>
    %322 = arith.addf %321, %320 : vector<2x384xf32>
    %323 = arith.divf %321, %322 : vector<2x384xf32>
    %324 = vector.extract_strided_slice %317 {offsets = [0, 384], sizes = [2, 128], strides = [1, 1]} : vector<2x512xf32> to vector<2x128xf32>
    %325 = math.tanh %324 : vector<2x128xf32>
    %326 = vector.extract_strided_slice %323 {offsets = [0, 0], sizes = [2, 128], strides = [1, 1]} : vector<2x384xf32> to vector<2x128xf32>
    %327 = vector.extract_strided_slice %323 {offsets = [0, 128], sizes = [2, 128], strides = [1, 1]} : vector<2x384xf32> to vector<2x128xf32>
    %328 = vector.extract_strided_slice %323 {offsets = [0, 256], sizes = [2, 128], strides = [1, 1]} : vector<2x384xf32> to vector<2x128xf32>
    %329 = arith.mulf %327, %286 : vector<2x128xf32>
    %330 = arith.mulf %326, %325 : vector<2x128xf32>
    %331 = arith.addf %329, %330 : vector<2x128xf32>
    %332 = math.tanh %331 : vector<2x128xf32>
    %333 = arith.mulf %328, %332 : vector<2x128xf32>
    %334 = vector.extract_strided_slice %11 {offsets = [14, 0], sizes = [2, 512], strides = [1, 1]} : vector<16x512xf32> to vector<2x512xf32>
    %335 = arith.truncf %309 : vector<2x128xf32> to vector<2x128xbf16>
    %c0_89 = arith.constant 0 : index
    %c0_90 = arith.constant 0 : index
    %336 = vector.load %arg3[%c0_89, %c0_90] : memref<128x512xbf16, #tpu.memory_space<vmem>>, vector<128x512xbf16>
    %cst_91 = arith.constant dense<0.000000e+00> : vector<2x512xf32>
    %337 = tpu.matmul %335, %336, %cst_91 {dimension_numbers = #tpu.dot_dimension_numbers<[1], [0], [0], [1], [0, 0, 1, 1], [], []>} : vector<2x128xbf16>, vector<128x512xbf16>, vector<2x512xf32> -> vector<2x512xf32>
    %338 = arith.addf %334, %337 : vector<2x512xf32>
    %339 = vector.extract_strided_slice %338 {offsets = [0, 0], sizes = [2, 384], strides = [1, 1]} : vector<2x512xf32> to vector<2x384xf32>
    %340 = arith.negf %339 : vector<2x384xf32>
    %341 = math.exp %340 : vector<2x384xf32>
    %cst_92 = arith.constant 1.000000e+00 : f32
    %342 = vector.broadcast %cst_92 : f32 to vector<2x384xf32>
    %343 = arith.addf %342, %341 : vector<2x384xf32>
    %344 = arith.divf %342, %343 : vector<2x384xf32>
    %345 = vector.extract_strided_slice %338 {offsets = [0, 384], sizes = [2, 128], strides = [1, 1]} : vector<2x512xf32> to vector<2x128xf32>
    %346 = math.tanh %345 : vector<2x128xf32>
    %347 = vector.extract_strided_slice %344 {offsets = [0, 0], sizes = [2, 128], strides = [1, 1]} : vector<2x384xf32> to vector<2x128xf32>
    %348 = vector.extract_strided_slice %344 {offsets = [0, 128], sizes = [2, 128], strides = [1, 1]} : vector<2x384xf32> to vector<2x128xf32>
    %349 = vector.extract_strided_slice %344 {offsets = [0, 256], sizes = [2, 128], strides = [1, 1]} : vector<2x384xf32> to vector<2x128xf32>
    %350 = arith.mulf %348, %307 : vector<2x128xf32>
    %351 = arith.mulf %347, %346 : vector<2x128xf32>
    %352 = arith.addf %350, %351 : vector<2x128xf32>
    %353 = math.tanh %352 : vector<2x128xf32>
    %354 = arith.mulf %349, %353 : vector<2x128xf32>
    %355 = arith.truncf %354 : vector<2x128xf32> to vector<2x128xbf16>
    %c0_93 = arith.constant 0 : index
    %c0_94 = arith.constant 0 : index
    %356 = vector.load %arg4[%c0_93, %c0_94] : memref<128x512xbf16, #tpu.memory_space<vmem>>, vector<128x512xbf16>
    %cst_95 = arith.constant dense<0.000000e+00> : vector<2x512xf32>
    %357 = tpu.matmul %355, %356, %cst_95 {dimension_numbers = #tpu.dot_dimension_numbers<[1], [0], [0], [1], [0, 0, 1, 1], [], []>} : vector<2x128xbf16>, vector<128x512xbf16>, vector<2x512xf32> -> vector<2x512xf32>
    %358 = arith.truncf %333 : vector<2x128xf32> to vector<2x128xbf16>
    %c0_96 = arith.constant 0 : index
    %c0_97 = arith.constant 0 : index
    %359 = vector.load %arg5[%c0_96, %c0_97] : memref<128x512xbf16, #tpu.memory_space<vmem>>, vector<128x512xbf16>
    %cst_98 = arith.constant dense<0.000000e+00> : vector<2x512xf32>
    %360 = tpu.matmul %358, %359, %cst_98 {dimension_numbers = #tpu.dot_dimension_numbers<[1], [0], [0], [1], [0, 0, 1, 1], [], []>} : vector<2x128xbf16>, vector<128x512xbf16>, vector<2x512xf32> -> vector<2x512xf32>
    %361 = arith.addf %357, %360 : vector<2x512xf32>
    %362 = arith.addf %361, %14 : vector<2x512xf32>
    %363 = vector.extract_strided_slice %362 {offsets = [0, 0], sizes = [2, 384], strides = [1, 1]} : vector<2x512xf32> to vector<2x384xf32>
    %364 = arith.negf %363 : vector<2x384xf32>
    %365 = math.exp %364 : vector<2x384xf32>
    %cst_99 = arith.constant 1.000000e+00 : f32
    %366 = vector.broadcast %cst_99 : f32 to vector<2x384xf32>
    %367 = arith.addf %366, %365 : vector<2x384xf32>
    %368 = arith.divf %366, %367 : vector<2x384xf32>
    %369 = vector.extract_strided_slice %362 {offsets = [0, 384], sizes = [2, 128], strides = [1, 1]} : vector<2x512xf32> to vector<2x128xf32>
    %370 = math.tanh %369 : vector<2x128xf32>
    %371 = vector.extract_strided_slice %368 {offsets = [0, 0], sizes = [2, 128], strides = [1, 1]} : vector<2x384xf32> to vector<2x128xf32>
    %372 = vector.extract_strided_slice %368 {offsets = [0, 128], sizes = [2, 128], strides = [1, 1]} : vector<2x384xf32> to vector<2x128xf32>
    %373 = vector.extract_strided_slice %368 {offsets = [0, 256], sizes = [2, 128], strides = [1, 1]} : vector<2x384xf32> to vector<2x128xf32>
    %374 = arith.mulf %372, %331 : vector<2x128xf32>
    %375 = arith.mulf %371, %370 : vector<2x128xf32>
    %376 = arith.addf %374, %375 : vector<2x128xf32>
    %377 = math.tanh %376 : vector<2x128xf32>
    %378 = arith.mulf %373, %377 : vector<2x128xf32>
    %c0_100 = arith.constant 0 : index
    %c0_101 = arith.constant 0 : index
    %379 = vector.load %arg7[%c0_100, %c0_101] : memref<128x28xf32, #tpu.memory_space<vmem>>, vector<128x28xf32>
    %cst_102 = arith.constant dense<0.000000e+00> : vector<2x28xf32>
    %380 = tpu.matmul %378, %379, %cst_102 {dimension_numbers = #tpu.dot_dimension_numbers<[1], [0], [0], [1], [0, 0, 1, 1], [], []>} : vector<2x128xf32>, vector<128x28xf32>, vector<2x28xf32> -> vector<2x28xf32>
    %c0_103 = arith.constant 0 : index
    %c0_104 = arith.constant 0 : index
    %381 = vector.load %arg8[%c0_103, %c0_104] : memref<1x28xf32, #tpu.memory_space<vmem>>, vector<1x28xf32>
    %382 = vector.broadcast %381 : vector<1x28xf32> to vector<2x28xf32>
    %383 = arith.addf %380, %382 : vector<2x28xf32>
    %cst_105 = arith.constant 0.000000e+00 : f32
    %384 = vector.broadcast %cst_105 : f32 to vector<2x28xf32>
    %385 = arith.cmpf oge, %383, %384 : vector<2x28xf32>
    %cst_106 = arith.constant 2.000000e-01 : f32
    %386 = vector.broadcast %cst_106 : f32 to vector<2x28xf32>
    %387 = arith.mulf %386, %383 : vector<2x28xf32>
    %388 = arith.select %385, %383, %387 : vector<2x28xi1>, vector<2x28xf32>
    %c0_107 = arith.constant 0 : index
    %c0_108 = arith.constant 0 : index
    %389 = vector.load %arg9[%c0_107, %c0_108] : memref<28x16xf32, #tpu.memory_space<vmem>>, vector<28x16xf32>
    %cst_109 = arith.constant dense<0.000000e+00> : vector<2x16xf32>
    %390 = tpu.matmul %388, %389, %cst_109 {dimension_numbers = #tpu.dot_dimension_numbers<[1], [0], [0], [1], [0, 0, 1, 1], [], []>} : vector<2x28xf32>, vector<28x16xf32>, vector<2x16xf32> -> vector<2x16xf32>
    %c0_110 = arith.constant 0 : index
    %c0_111 = arith.constant 0 : index
    %391 = vector.load %arg10[%c0_110, %c0_111] : memref<1x16xf32, #tpu.memory_space<vmem>>, vector<1x16xf32>
    %392 = vector.broadcast %391 : vector<1x16xf32> to vector<2x16xf32>
    %393 = arith.addf %390, %392 : vector<2x16xf32>
    %c0_112 = arith.constant 0 : index
    %c0_113 = arith.constant 0 : index
    %394 = vector.load %arg11[%c0_112, %c0_113] : memref<2x16xf32, #tpu.memory_space<vmem>>, vector<2x16xf32>
    tpu.vector_store %arg11[%c0_112, %c0_113], %393 {strides = array<i32>} : memref<2x16xf32, #tpu.memory_space<vmem>>, vector<2x16xf32>,
    return
  }
}

</mosaic_0001>

<bundles_post_ra>
// kernel: tpu_custom_call.1
= control target key start
LH: loop header
LB: loop body
LE: loop exit
PB: predicated region body
PF: predicated region fallthrough
CT: control target
= control target key end

     0   :  { %16 = vsyncpa [#allocation3], 0  ;;  %s6248_s0 = inlined_call_operand.vmem [shape: f32[16,4], index: 0, kind: input, shape index: {}]   ;;  %s6249_s1 = inlined_call_operand.vmem [shape: bf16[4,512], index: 1, kind: input, shape index: {}]   ;;  %s6250_s2 = inlined_call_operand.vmem [shape: f32[1,512], index: 2, kind: input, shape index: {}]   ;;  %s6251_s3 = inlined_call_operand.hbm [shape: bf16[128,512], index: 3, kind: input, shape index: {}]   ;;  %s6252_s4 = inlined_call_operand.hbm [shape: bf16[128,512], index: 4, kind: input, shape index: {}]   ;;  %s6253_s5 = inlined_call_operand.hbm [shape: bf16[128,512], index: 5, kind: input, shape index: {}]   ;;  %s6254_s6 = inlined_call_operand.vmem [shape: f32[1,512], index: 6, kind: input, shape index: {}]   ;;  %s6255_s7 = inlined_call_operand.vmem [shape: f32[128,28], index: 7, kind: input, shape index: {}]   ;;  %s6256_s8 = inlined_call_operand.vmem [shape: f32[1,28], index: 8, kind: input, shape index: {}]   ;;  %s6257_s9 = inlined_call_operand.vmem [shape: f32[28,16], index: 9, kind: input, shape index: {}]   ;;  %s6258_s10 = inlined_call_operand.vmem [shape: f32[1,16], index: 10, kind: input, shape index: {}]   ;;  %s6259_s11 = inlined_call_operand.hbm [shape: f32[2,16], index: 11, kind: output, shape index: {}]  }
   0x1   :  { %17 = vsyncpa [#allocation6], 0 }
   0x2   :  { %18 = vsyncpa [#allocation4], 0  ;;  %s4490_s17 = smov [#allocation5]   ;;  %s4491_s19 = smov [#allocation2]  }
   0x3   :  { %s42_s18 = sshll.u32 %s4490_s17, 4  ;;  %s30_s20 = sshll.u32 %s4491_s19, 4  ;;  %s43_s18 = int_to_ptr.vmem [resolvable:$true] %s42_s18  ;;  %s31_s20 = int_to_ptr.vmem [resolvable:$true] %s30_s20 }
   0x4   :  { %s4412_s21 = scalar_lea.vmem %s43_s18, 4096  ;;  %p4417_p1 = scmp.lt.s32.totalorder %s43_s18, %s43_s18 }
   0x5   :  { %p4413_p0 = scmp.ne.s32.totalorder %s43_s18, %s4412_s21  ;;  %p4418_p2 = scmp.lt.s32.totalorder %s4412_s21, %s4412_s21 }
   0x7   :  { %p4419_p3 = por %p4418_p2, %p4417_p1 }
   0x9   :  { %p4420_p4 = pnand %p4419_p3, %p4413_p0 }
   0xb   :  { %4423 = shalt.err (!%p4420_p4)
}
   0xc   :  { %s4492_s22 = smov 256   ;;  %s4493_s23 = smov 16  }
   0xd   :  { %48 = dma.hbm_to_vmem [thread:$0]  %s6252_s4, 4096, %s43_s18, [#allocation6], %s4492_s22, %s4492_s22, %s4493_s23  }
   0xe   :  { %s4432_s26 = scalar_lea.vmem %s31_s20, 4096  ;;  %p4437_p6 = scmp.lt.s32.totalorder %s31_s20, %s31_s20 }
   0xf   :  { %p4433_p5 = scmp.ne.s32.totalorder %s31_s20, %s4432_s26  ;;  %p4438_p7 = scmp.lt.s32.totalorder %s4432_s26, %s4432_s26 }
  0x11   :  { %p4439_p8 = por %p4438_p7, %p4437_p6 }
  0x13   :  { %p4440_p9 = pnand %p4439_p8, %p4433_p5 }
  0x15   :  { %4443 = shalt.err (!%p4440_p9)
}
  0x16   :  { %36 = dma.hbm_to_vmem [thread:$0]  %s6251_s3, 4096, %s31_s20, [#allocation3], %s4492_s22, %s4492_s22, %s4493_s23  }
  0x17   :  { %s4494_s29 = smov [#allocation7]  }
  0x18   :  { %s54_s30 = sshll.u32 %s4494_s29, 4  ;;  %s55_s30 = int_to_ptr.vmem [resolvable:$true] %s54_s30 }
  0x19   :  { %s4452_s12 = scalar_lea.vmem %s55_s30, 4096  ;;  %p4457_p11 = scmp.lt.s32.totalorder %s55_s30, %s55_s30 }
  0x1a   :  { %p4453_p10 = scmp.ne.s32.totalorder %s55_s30, %s4452_s12  ;;  %p4458_p12 = scmp.lt.s32.totalorder %s4452_s12, %s4452_s12 }
  0x1c   :  { %p4459_p13 = por %p4458_p12, %p4457_p11 }
  0x1e   :  { %p4460_p0 = pnand %p4459_p13, %p4453_p10 }
  0x20   :  { %4463 = shalt.err (!%p4460_p0)
}
  0x21   :  { %60 = dma.hbm_to_vmem [thread:$0]  %s6253_s5, 4096, %s55_s30, [#allocation6], %s4492_s22, %s4492_s22, %s4493_s23  }
  0x22   :  { %4484 = dma.done.wait [#allocation3], 4096  }
  0x23   :  { %4485 = vsyncadd [#allocation3], 4294963200 }
  0x24   :  { %4486 = dma.done.wait [#allocation6], 8192  }
  0x25   :  { %4487 = vsyncadd [#allocation6], 4294959104  ;;  %v95_v0 = vlaneseq  ;;  %v4495_v1 = vmov 1983009808   ;;  %v6262_v3 = vmov 0   ;;  %v92_v9 = vld [vmem:[%s6249_s1] sm:$0xff] }
  0x26   :  { %v118_v2 = vunpack.c.l.s4 %v4495_v1  ;;  %182 = vmatprep.mubr.bf16.mxu1 %v6262_v3  ;;  %482 = vmatprep.mubr.bf16.mxu0 %v6262_v3  ;;  %v4574_v7 = vld [vmem:[#allocation2 + $0xe4] ss:$16 sps:$4 sm:$0xff]   ;;  %v4576_v8 = vld [vmem:[#allocation2 + $0xe0] ss:$16 sps:$4 sm:$0xff]   ;;  %vm137_vm0 = vcmask 1041408   ;;  %v116_v10 = vcombine.high %v92_v9, %v92_v9  ;;  %v82_v15 = vld [vmem:[%s6248_s0 + $0x8] sm:$0xff] }
  0x27   :  { %v4571_v4 = vshrl.u32 %v95_v0, 7  ;;  %450 = vmatprep.subr.bf16.mxu0 %v4574_v7  ;;  %v4582_v12 = vld [vmem:[#allocation2 + $0xc4] ss:$16 sps:$4 sm:$0xff]   ;;  %v4584_v13 = vld [vmem:[#allocation2 + $0xc0] ss:$16 sps:$4 sm:$0xff]   ;;  %vm84_vm2 = vcmp.ne.f32.partialorder %v82_v15, -1.0 }
  0x28   :  { %v119_v5 = vunpack.c.0.s8 %v118_v2  ;;  %451 = vmatpush1.bf16.msra.mxu0 %v4576_v8  ;;  %v81_v14 = vld [vmem:[%s6248_s0] sm:$0xff]  ;;  %v6260_v20 = vmov 0.0   ;;  %vm133_vm3 = vcmask 31744   ;;  %v4608_v30 = vld [vmem:[#allocation2 + $0xec] ss:$16 sps:$4 sm:$0xff]   ;;  %vm4498_vm4 = vmmov 0  }
  0x29   :  { %6586 = vst [vmem:[#allocation12_spill] sm:$0xff] %v4571_v4  ;;  %452 = vmatprep.subr.bf16.mxu0 %v4582_v12  ;;  %vm83_vm1 = vcmp.ne.f32.partialorder %v81_v14, -1.0  ;;  %v4595_v19 = vld [vmem:[#allocation2 + $0xa4] ss:$16 sps:$4 sm:$0xff]   ;;  %v3580_v22 = vsel %vm84_vm2, 1.0, %v6260_v20  ;;  %vm3487_vm5 = vcmask 1043456  }
  0x2a   :  { %v122_v6 = vsub.s32 %v119_v5, %v4571_v4  ;;  %v3579_v21 = vsel %vm83_vm1, 1.0, %v6260_v20  ;;  %v90_v25 = vmul.f32 %v3580_v22, %v82_v15  ;;  %v4601_v26 = vld [vmem:[#allocation2 + $0xa0] ss:$16 sps:$4 sm:$0xff]   ;;  %v4605_v27 = vld [vmem:[#allocation2 + $0x84] ss:$16 sps:$4 sm:$0xff]   ;;  %vm3483_vm7 = vcmask 228352  }
  0x2b   :  { %v89_v23 = vmul.f32 %v3579_v21, %v81_v14  ;;  %v4612_v31 = vld [vmem:[#allocation2 + $0x80] ss:$16 sps:$4 sm:$0xff]   ;;  %v4615_v32 = vld [vmem:[#allocation2 + $0x64] ss:$16 sps:$4 sm:$0xff]   ;;  %v4620_v33 = vld [vmem:[#allocation2 + $0xe8] ss:$16 sps:$4 sm:$0xff]  }
  0x2c   :  { %v123_v11 = vrot.slane %v92_v9, %v122_v6  ;;  %v130_v16 = vrot.slane %v116_v10, %v122_v6  ;;  %453 = vmatpush1.bf16.msra.mxu0 %v4584_v13  ;;  %v4622_v34 = vld [vmem:[#allocation2 + $0x60] ss:$16 sps:$4 sm:$0xff]   ;;  %v4625_v35 = vld [vmem:[#allocation2 + $0x44] ss:$16 sps:$4 sm:$0xff]   ;;  %v4627_v36 = vld [vmem:[#allocation2 + $0xcc] ss:$16 sps:$4 sm:$0xff]  }
  0x2d   :  { %454 = vmatprep.subr.bf16.mxu0 %v4595_v19  ;;  %v91_v28 = vpack.c.bf16 %v90_v25, %v89_v23  ;;  %v4631_v37 = vld [vmem:[#allocation2 + $0xc8] ss:$16 sps:$4 sm:$0xff]   ;;  %v4633_v38 = vld [vmem:[#allocation2 + $0x40] ss:$16 sps:$4 sm:$0xff]   ;;  %v4637_v39 = vld [vmem:[#allocation2 + $0x24] ss:$16 sps:$4 sm:$0xff]  }
  0x2e   :  { %v131_v17 = vcombine.high %v123_v11, %v123_v11  ;;  %v139_v18 = vsel %vm137_vm0, %v123_v11, 0  ;;  %v132_v24 = vcombine.high %v130_v16, %v130_v16  ;;  %v145_v29 = vsel %vm137_vm0, %v130_v16, 0  ;;  %v4640_v40 = vld [vmem:[#allocation2 + $0xac] ss:$16 sps:$4 sm:$0xff]   ;;  %v4643_v41 = vld [vmem:[#allocation2 + $0xa8] ss:$16 sps:$4 sm:$0xff]  }
  0x2f   :  { %v4645_v42 = vld [vmem:[#allocation2 + $0x20] ss:$16 sps:$4 sm:$0xff]   ;;  %v4647_v43 = vld [vmem:[#allocation2 + $0x4] ss:$16 sps:$4 sm:$0xff]   ;;  %v4650_v44 = vld [vmem:[#allocation2 + $0x8c] ss:$16 sps:$4 sm:$0xff]  }
  0x30   :  { %3581 = vmatprep.subr.msk.bf16.mxu1 %vm137_vm0, %v131_v17  ;;  %455 = vmatpush1.bf16.msra.mxu0 %v4601_v26  ;;  %v4655_v45 = vld [vmem:[#allocation2] ss:$16 sps:$4 sm:$0xff]   ;;  %v4657_v46 = vld [vmem:[#allocation2 + $0x88] ss:$16 sps:$4 sm:$0xff]   ;;  %v4660_v47 = vld [vmem:[#allocation2 + $0x6c] ss:$16 sps:$4 sm:$0xff]  }
  0x31   :  { %165 = vmatpush1.bf16.msra.mxu1 %v139_v18  ;;  %456 = vmatprep.subr.bf16.mxu0 %v4605_v27  ;;  %v4665_v48 = vld [vmem:[#allocation2 + $0x68] ss:$16 sps:$4 sm:$0xff]   ;;  %v4668_v49 = vld [vmem:[#allocation2 + $0x4c] ss:$16 sps:$4 sm:$0xff]   ;;  %v4693_v55 = vld [vmem:[#allocation7 + $0xe4] ss:$16 sps:$4 sm:$0xff]  }
  0x32   :  { %3583 = vmatprep.subr.msk.bf16.mxu1 %vm137_vm0, %v132_v24  ;;  %v4673_v50 = vld [vmem:[#allocation2 + $0x48] ss:$16 sps:$4 sm:$0xff]   ;;  %v4675_v51 = vld [vmem:[#allocation2 + $0x2c] ss:$16 sps:$4 sm:$0xff]   ;;  %v4695_v56 = vld [vmem:[#allocation7 + $0xe0] ss:$16 sps:$4 sm:$0xff]  }
  0x33   :  { %v4680_v52 = vld [vmem:[#allocation2 + $0x28] ss:$16 sps:$4 sm:$0xff]   ;;  %v4682_v53 = vld [vmem:[#allocation2 + $0xc] ss:$16 sps:$4 sm:$0xff]   ;;  %v4698_v57 = vld [vmem:[#allocation7 + $0xc4] ss:$16 sps:$4 sm:$0xff]  }
  0x34   :  { %3582 = vmatmul.mubr.msk.bf16.vlgmr.msra.gmra.mxu1 %vm133_vm3, %v91_v28  ;;  %457 = vmatpush1.bf16.msra.mxu0 %v4612_v31  ;;  %v4687_v54 = vld [vmem:[#allocation2 + $0x8] ss:$16 sps:$4 sm:$0xff]   ;;  %v4700_v58 = vld [vmem:[#allocation7 + $0xec] ss:$16 sps:$4 sm:$0xff]   ;;  %v4703_v59 = vld [vmem:[#allocation7 + $0xc0] ss:$16 sps:$4 sm:$0xff]  }
  0x35   :  { %208 = vmatpush1.bf16.msra.mxu1 %v145_v29  ;;  %225 = vmatprep.mubr.bf16.mxu1 %v6262_v3  ;;  %v4705_v60 = vld [vmem:[#allocation7 + $0xe8] ss:$16 sps:$4 sm:$0xff]   ;;  %v4709_v61 = vld [vmem:[#allocation7 + $0xa4] ss:$16 sps:$4 sm:$0xff]   ;;  %v4711_v62 = vld [vmem:[#allocation7 + $0xcc] ss:$16 sps:$4 sm:$0xff]  }
  0x36   :  { %491 = vmatprep.subr.bf16.mxu1 %v4608_v30  ;;  %458 = vmatprep.subr.bf16.mxu0 %v4615_v32  ;;  %v4714_v63 = vld [vmem:[#allocation7 + $0xc8] ss:$16 sps:$4 sm:$0xff]   ;;  %v4718_v0 = vld [vmem:[#allocation7 + $0xa0] ss:$16 sps:$4 sm:$0xff]   ;;  %v4723_v1 = vld [vmem:[#allocation7 + $0x84] ss:$16 sps:$4 sm:$0xff]  }
  0x37   :  { %6587 = vst [vmem:[#allocation13_spill] sm:$0xff] %v4718_v0  ;;  %6588 = vst [vmem:[#allocation14_spill] sm:$0xff] %v4723_v1  ;;  %v4725_v2 = vld [vmem:[#allocation7 + $0x80] ss:$16 sps:$4 sm:$0xff]   ;;  %v4727_v5 = vld [vmem:[#allocation7 + $0xac] ss:$16 sps:$4 sm:$0xff]  }
  0x38   :  { %459 = vmatpush1.bf16.msra.mxu0 %v4622_v34  ;;  %6589 = vst [vmem:[#allocation15_spill] sm:$0xff] %v4725_v2  ;;  %v4730_v6 = vld [vmem:[#allocation7 + $0xa8] ss:$16 sps:$4 sm:$0xff]   ;;  %v4735_v9 = vld [vmem:[#allocation7 + $0x64] ss:$16 sps:$4 sm:$0xff]   ;;  %vm3561_vm8 = vcmask 123904  }
  0x39   :  { %460 = vmatprep.subr.bf16.mxu0 %v4625_v35  ;;  %6590 = vst [vmem:[#allocation16_spill] sm:$0xff] %v4730_v6  ;;  %6591 = vst [vmem:[#allocation17_spill] sm:$0xff] %v4735_v9  ;;  %v4737_v10 = vld [vmem:[#allocation7 + $0x60] ss:$16 sps:$4 sm:$0xff]   ;;  %v4739_v11 = vld [vmem:[#allocation7 + $0x8c] ss:$16 sps:$4 sm:$0xff]  }
  0x3a   :  { %6592 = vst [vmem:[#allocation18_spill] sm:$0xff] %v4737_v10  ;;  %6593 = vst [vmem:[#allocation19_spill] sm:$0xff] %v4739_v11  ;;  %v4742_v14 = vld [vmem:[#allocation7 + $0x88] ss:$16 sps:$4 sm:$0xff]   ;;  %v4747_v15 = vld [vmem:[#allocation7 + $0x44] ss:$16 sps:$4 sm:$0xff]  }
  0x3b   :  { %6594 = vst [vmem:[#allocation20_spill] sm:$0xff] %v4742_v14  ;;  %6595 = vst [vmem:[#allocation21_spill] sm:$0xff] %v4747_v15  ;;  %v4749_v16 = vld [vmem:[#allocation7 + $0x40] ss:$16 sps:$4 sm:$0xff]   ;;  %v4751_v17 = vld [vmem:[#allocation7 + $0x6c] ss:$16 sps:$4 sm:$0xff]  }
  0x3c   :  { %3584 = vmatmul.mubr.msk.bf16.vlgmr.msra.gmra.mxu1 %vm133_vm3, %v91_v28  ;;  %461 = vmatpush1.bf16.msra.mxu0 %v4633_v38  ;;  %6596 = vst [vmem:[#allocation22_spill] sm:$0xff] %v4749_v16  ;;  %6597 = vst [vmem:[#allocation23_spill] sm:$0xff] %v4751_v17  ;;  %v4754_v18 = vld [vmem:[#allocation7 + $0x68] ss:$16 sps:$4 sm:$0xff]   ;;  %v4759_v21 = vld [vmem:[#allocation7 + $0x24] ss:$16 sps:$4 sm:$0xff]  }
  0x3d   :  { %492 = vmatpush1.bf16.msra.mxu1 %v4620_v33  ;;  %523 = vmatprep.mubr.bf16.mxu1 %v6262_v3  ;;  %6598 = vst [vmem:[#allocation24_spill] sm:$0xff] %v4754_v18  ;;  %6599 = vst [vmem:[#allocation25_spill] sm:$0xff] %v4759_v21  ;;  %v4761_v22 = vld [vmem:[#allocation7 + $0x20] ss:$16 sps:$4 sm:$0xff]   ;;  %v4763_v23 = vld [vmem:[#allocation7 + $0x4c] ss:$16 sps:$4 sm:$0xff]  }
  0x3e   :  { %493 = vmatprep.subr.bf16.mxu1 %v4627_v36  ;;  %462 = vmatprep.subr.bf16.mxu0 %v4637_v39  ;;  %6600 = vst [vmem:[#allocation26_spill] sm:$0xff] %v4761_v22  ;;  %6601 = vst [vmem:[#allocation27_spill] sm:$0xff] %v4763_v23  ;;  %v4768_v24 = vld [vmem:[#allocation7 + $0x48] ss:$16 sps:$4 sm:$0xff]   ;;  %v4771_v25 = vld [vmem:[#allocation7 + $0x4] ss:$16 sps:$4 sm:$0xff]  }
  0x3f   :  { %6602 = vst [vmem:[#allocation28_spill] sm:$0xff] %v4768_v24  ;;  %6603 = vst [vmem:[#allocation29_spill] sm:$0xff] %v4771_v25  ;;  %v4773_v28 = vld [vmem:[#allocation7] ss:$16 sps:$4 sm:$0xff]   ;;  %v4775_v29 = vld [vmem:[#allocation7 + $0x2c] ss:$16 sps:$4 sm:$0xff]  }
  0x40   :  { %463 = vmatpush1.bf16.msra.mxu0 %v4645_v42  ;;  %6604 = vst [vmem:[#allocation30_spill] sm:$0xff] %v4773_v28  ;;  %6605 = vst [vmem:[#allocation31_spill] sm:$0xff] %v4775_v29  ;;  %v4778_v20 = vld [vmem:[#allocation7 + $0x28] ss:$16 sps:$4 sm:$0xff]  }
  0x41   :  { %494 = vmatpush1.bf16.msra.mxu1 %v4631_v37  ;;  %464 = vmatprep.subr.bf16.mxu0 %v4647_v43  ;;  %6606 = vst [vmem:[#allocation32_spill] sm:$0xff] %v4778_v20 }
  0x42   :  { %495 = vmatprep.subr.bf16.mxu1 %v4640_v40 }
  0x44   :  { %465 = vmatpush1.bf16.msra.mxu0 %v4655_v45 }
  0x45   :  { %496 = vmatpush1.bf16.msra.mxu1 %v4643_v41  ;;  %785 = vmatprep.subr.bf16.mxu0 %v4693_v55 }
  0x46   :  { %497 = vmatprep.subr.bf16.mxu1 %v4650_v44 }
  0x47   :  { %483 = vmatmul.mubr.bf16.vlgmr.msra.gmra.mxu0 %v6262_v3 }
  0x48   :  { %817 = vmatprep.mubr.bf16.mxu0 %v6262_v3  ;;  %786 = vmatpush1.bf16.msra.mxu0 %v4695_v56 }
  0x49   :  { %498 = vmatpush1.bf16.msra.mxu1 %v4657_v46  ;;  %787 = vmatprep.subr.bf16.mxu0 %v4698_v57 }
  0x4a   :  { %499 = vmatprep.subr.bf16.mxu1 %v4660_v47 }
  0x4c   :  { %788 = vmatpush1.bf16.msra.mxu0 %v4703_v59 }
  0x4d   :  { %500 = vmatpush1.bf16.msra.mxu1 %v4665_v48  ;;  %789 = vmatprep.subr.bf16.mxu0 %v4709_v61 }
  0x4e   :  { %501 = vmatprep.subr.bf16.mxu1 %v4668_v49 }
  0x50   :  { %790 = vmatpush1.bf16.msra.mxu0 %v4718_v0 }
  0x51   :  { %502 = vmatpush1.bf16.msra.mxu1 %v4673_v50  ;;  %791 = vmatprep.subr.bf16.mxu0 %v4723_v1 }
  0x52   :  { %503 = vmatprep.subr.bf16.mxu1 %v4675_v51 }
  0x54   :  { %792 = vmatpush1.bf16.msra.mxu0 %v4725_v2 }
  0x55   :  { %504 = vmatpush1.bf16.msra.mxu1 %v4680_v52  ;;  %793 = vmatprep.subr.bf16.mxu0 %v4735_v9 }
  0x56   :  { %505 = vmatprep.subr.bf16.mxu1 %v4682_v53 }
  0x58   :  { %794 = vmatpush1.bf16.msra.mxu0 %v4737_v10 }
  0x59   :  { %506 = vmatpush1.bf16.msra.mxu1 %v4687_v54  ;;  %795 = vmatprep.subr.bf16.mxu0 %v4747_v15  ;;  %v4853_v15 = vld [vmem:[#allocation5 + $0x4c] ss:$16 sps:$4 sm:$0xff]  }
  0x5a   :  { %826 = vmatprep.subr.bf16.mxu1 %v4700_v58  ;;  %6631 = vst [vmem:[#allocation56_spill] sm:$0xff] %v4853_v15 }
  0x5c   :  { %524 = vmatmul.mubr.bf16.vlgmr.msra.gmra.mxu1 %v6262_v3  ;;  %796 = vmatpush1.bf16.msra.mxu0 %v4749_v16  ;;  %v4811_v16 = vld [vmem:[#allocation5 + $0xc8] ss:$16 sps:$4 sm:$0xff]  }
  0x5d   :  { %858 = vmatprep.mubr.bf16.mxu1 %v6262_v3  ;;  %827 = vmatpush1.bf16.msra.mxu1 %v4705_v60  ;;  %v4783_v3 = vld [vmem:[#allocation7 + $0xc] ss:$16 sps:$4 sm:$0xff]   ;;  %6617 = vst [vmem:[#allocation42_spill] sm:$0xff] %v4811_v16 }
  0x5e   :  { %828 = vmatprep.subr.bf16.mxu1 %v4711_v62  ;;  %797 = vmatprep.subr.bf16.mxu0 %v4759_v21  ;;  %6607 = vst [vmem:[#allocation33_spill] sm:$0xff] %v4783_v3  ;;  %v4786_v21 = vld [vmem:[#allocation7 + $0x8] ss:$16 sps:$4 sm:$0xff]  }
  0x5f   :  { %6609 = vst [vmem:[#allocation34_spill] sm:$0xff] %v4786_v21 }
  0x60   :  { %798 = vmatpush1.bf16.msra.mxu0 %v4761_v22  ;;  %v6608_v22 = vmov 0  }
  0x61   :  { %829 = vmatpush1.bf16.msra.mxu1 %v4714_v63  ;;  %799 = vmatprep.subr.bf16.mxu0 %v4771_v25  ;;  %v4791_v25 = vld [vmem:[#allocation5 + $0xe4] ss:$16 sps:$4 sm:$0xff]  }
  0x62   :  { %830 = vmatprep.subr.bf16.mxu1 %v4727_v5  ;;  %6610 = vst [vmem:[#allocation35_spill] sm:$0xff] %v4791_v25 }
  0x64   :  { %800 = vmatpush1.bf16.msra.mxu0 %v4773_v28  ;;  %v4795_v28 = vld [vmem:[#allocation5 + $0xe0] ss:$16 sps:$4 sm:$0xff]  }
  0x65   :  { %831 = vmatpush1.bf16.msra.mxu1 %v4730_v6  ;;  %6612 = vst [vmem:[#allocation37_spill] sm:$0xff] %v4795_v28  ;;  %1027 = vmatprep.subr.bf16.mxu0 %v4791_v25  ;;  %v4823_v25 = vld [vmem:[#allocation5 + $0xa8] ss:$16 sps:$4 sm:$0xff]  }
  0x66   :  { %832 = vmatprep.subr.bf16.mxu1 %v4739_v11  ;;  %6621 = vst [vmem:[#allocation46_spill] sm:$0xff] %v4823_v25 }
  0x67   :  { %818 = vmatmul.mubr.bf16.vlgmr.msra.gmra.mxu0 %v6608_v22 }
  0x68   :  { %1059 = vmatprep.mubr.bf16.mxu0 %v6608_v22  ;;  %1028 = vmatpush1.bf16.msra.mxu0 %v4795_v28  ;;  %v4817_v28 = vld [vmem:[#allocation5 + $0xa4] ss:$16 sps:$4 sm:$0xff]  }
  0x69   :  { %833 = vmatpush1.bf16.msra.mxu1 %v4742_v14  ;;  %6618 = vst [vmem:[#allocation43_spill] sm:$0xff] %v4817_v28 }
  0x6a   :  { %834 = vmatprep.subr.bf16.mxu1 %v4751_v17 }
  0x6d   :  { %835 = vmatpush1.bf16.msra.mxu1 %v4754_v18 }
  0x6e   :  { %836 = vmatprep.subr.bf16.mxu1 %v4763_v23  ;;  %v4837_v23 = vld [vmem:[#allocation5 + $0x64] ss:$16 sps:$4 sm:$0xff]  }
  0x6f   :  { %6626 = vst [vmem:[#allocation51_spill] sm:$0xff] %v4837_v23 }
  0x71   :  { %837 = vmatpush1.bf16.msra.mxu1 %v4768_v24  ;;  %v4793_v24 = vld [vmem:[#allocation5 + $0xec] ss:$16 sps:$4 sm:$0xff]  }
  0x72   :  { %838 = vmatprep.subr.bf16.mxu1 %v4775_v29  ;;  %6611 = vst [vmem:[#allocation36_spill] sm:$0xff] %v4793_v24  ;;  %v4797_v29 = vld [vmem:[#allocation5 + $0xe8] ss:$16 sps:$4 sm:$0xff]  }
  0x73   :  { %6613 = vst [vmem:[#allocation38_spill] sm:$0xff] %v4797_v29 }
  0x75   :  { %839 = vmatpush1.bf16.msra.mxu1 %v4778_v20  ;;  %v4809_v20 = vld [vmem:[#allocation5 + $0xc0] ss:$16 sps:$4 sm:$0xff]  }
  0x76   :  { %840 = vmatprep.subr.bf16.mxu1 %v4783_v3  ;;  %v4804_v3 = vld [vmem:[#allocation5 + $0xc4] ss:$16 sps:$4 sm:$0xff]   ;;  %6616 = vst [vmem:[#allocation41_spill] sm:$0xff] %v4809_v20 }
  0x77   :  { %6614 = vst [vmem:[#allocation39_spill] sm:$0xff] %v4804_v3  ;;  %1029 = vmatprep.subr.bf16.mxu0 %v4804_v3  ;;  %v4835_v3 = vld [vmem:[#allocation5 + $0x88] ss:$16 sps:$4 sm:$0xff]  }
  0x78   :  { %1030 = vmatpush1.bf16.msra.mxu0 %v4809_v20  ;;  %v4831_v20 = vld [vmem:[#allocation5 + $0x8c] ss:$16 sps:$4 sm:$0xff]   ;;  %6625 = vst [vmem:[#allocation50_spill] sm:$0xff] %v4835_v3 }
  0x79   :  { %841 = vmatpush1.bf16.msra.mxu1 %v4786_v21  ;;  %v4806_v21 = vld [vmem:[#allocation5 + $0xcc] ss:$16 sps:$4 sm:$0xff]   ;;  %1031 = vmatprep.subr.bf16.mxu0 %v4817_v28  ;;  %6623 = vst [vmem:[#allocation48_spill] sm:$0xff] %v4831_v20 }
  0x7a   :  { %1068 = vmatprep.subr.bf16.mxu1 %v4793_v24  ;;  %6615 = vst [vmem:[#allocation40_spill] sm:$0xff] %v4806_v21  ;;  %v4821_v24 = vld [vmem:[#allocation5 + $0xa0] ss:$16 sps:$4 sm:$0xff]   ;;  %v4841_v28 = vld [vmem:[#allocation5 + $0x6c] ss:$16 sps:$4 sm:$0xff]  }
  0x7b   :  { %6620 = vst [vmem:[#allocation45_spill] sm:$0xff] %v4821_v24  ;;  %6627 = vst [vmem:[#allocation52_spill] sm:$0xff] %v4841_v28 }
  0x7c   :  { %859 = vmatmul.mubr.bf16.vlgmr.msra.gmra.mxu1 %v6608_v22  ;;  %1032 = vmatpush1.bf16.msra.mxu0 %v4821_v24  ;;  %v4844_v24 = vld [vmem:[#allocation5 + $0x60] ss:$16 sps:$4 sm:$0xff]  }
  0x7d   :  { %1069 = vmatpush1.bf16.msra.mxu1 %v4797_v29  ;;  %1100 = vmatprep.mubr.bf16.mxu1 %v6608_v22  ;;  %v4819_v29 = vld [vmem:[#allocation5 + $0xac] ss:$16 sps:$4 sm:$0xff]   ;;  %6628 = vst [vmem:[#allocation53_spill] sm:$0xff] %v4844_v24 }
  0x7e   :  { %1070 = vmatprep.subr.bf16.mxu1 %v4806_v21  ;;  %6619 = vst [vmem:[#allocation44_spill] sm:$0xff] %v4819_v29  ;;  %v4829_v21 = vld [vmem:[#allocation5 + $0x84] ss:$16 sps:$4 sm:$0xff]  }
  0x7f   :  { %6622 = vst [vmem:[#allocation47_spill] sm:$0xff] %v4829_v21  ;;  %1033 = vmatprep.subr.bf16.mxu0 %v4829_v21 }
  0x81   :  { %1071 = vmatpush1.bf16.msra.mxu1 %v4811_v16  ;;  %v4833_v16 = vld [vmem:[#allocation5 + $0x80] ss:$16 sps:$4 sm:$0xff]  }
  0x82   :  { %1072 = vmatprep.subr.bf16.mxu1 %v4819_v29  ;;  %6624 = vst [vmem:[#allocation49_spill] sm:$0xff] %v4833_v16  ;;  %1034 = vmatpush1.bf16.msra.mxu0 %v4833_v16  ;;  %v4850_v29 = vld [vmem:[#allocation5 + $0x44] ss:$16 sps:$4 sm:$0xff]   ;;  %v4860_v16 = vld [vmem:[#allocation5 + $0x48] ss:$16 sps:$4 sm:$0xff]  }
  0x83   :  { %1035 = vmatprep.subr.bf16.mxu0 %v4837_v23  ;;  %6630 = vst [vmem:[#allocation55_spill] sm:$0xff] %v4850_v29  ;;  %6633 = vst [vmem:[#allocation58_spill] sm:$0xff] %v4860_v16  ;;  %v4865_v23 = vld [vmem:[#allocation5 + $0x2c] ss:$16 sps:$4 sm:$0xff]  }
  0x84   :  { %6635 = vst [vmem:[#allocation60_spill] sm:$0xff] %v4865_v23 }
  0x85   :  { %1073 = vmatpush1.bf16.msra.mxu1 %v4823_v25  ;;  %v4848_v25 = vld [vmem:[#allocation5 + $0x68] ss:$16 sps:$4 sm:$0xff]  }
  0x86   :  { %1074 = vmatprep.subr.bf16.mxu1 %v4831_v20  ;;  %6629 = vst [vmem:[#allocation54_spill] sm:$0xff] %v4848_v25  ;;  %1036 = vmatpush1.bf16.msra.mxu0 %v4844_v24  ;;  %v4856_v20 = vld [vmem:[#allocation5 + $0x40] ss:$16 sps:$4 sm:$0xff]   ;;  %v4872_v24 = vld [vmem:[#allocation5 + $0x28] ss:$16 sps:$4 sm:$0xff]  }
  0x87   :  { %6632 = vst [vmem:[#allocation57_spill] sm:$0xff] %v4856_v20  ;;  %1037 = vmatprep.subr.bf16.mxu0 %v4850_v29  ;;  %6637 = vst [vmem:[#allocation62_spill] sm:$0xff] %v4872_v24  ;;  %v4877_v29 = vld [vmem:[#allocation5 + $0xc] ss:$16 sps:$4 sm:$0xff]  }
  0x88   :  { %6639 = vst [vmem:[#allocation64_spill] sm:$0xff] %v4877_v29 }
  0x89   :  { %1075 = vmatpush1.bf16.msra.mxu1 %v4835_v3  ;;  %v4862_v3 = vld [vmem:[#allocation5 + $0x24] ss:$16 sps:$4 sm:$0xff]  }
  0x8a   :  { %1076 = vmatprep.subr.bf16.mxu1 %v4841_v28  ;;  %6634 = vst [vmem:[#allocation59_spill] sm:$0xff] %v4862_v3  ;;  %1038 = vmatpush1.bf16.msra.mxu0 %v4856_v20  ;;  %v4868_v28 = vld [vmem:[#allocation5 + $0x20] ss:$16 sps:$4 sm:$0xff]   ;;  %v4884_v20 = vld [vmem:[#allocation5 + $0x8] ss:$16 sps:$4 sm:$0xff]  }
  0x8b   :  { %6636 = vst [vmem:[#allocation61_spill] sm:$0xff] %v4868_v28  ;;  %1039 = vmatprep.subr.bf16.mxu0 %v4862_v3  ;;  %6641 = vst [vmem:[#allocation66_spill] sm:$0xff] %v4884_v20 }
  0x8d   :  { %1077 = vmatpush1.bf16.msra.mxu1 %v4848_v25  ;;  %v4874_v25 = vld [vmem:[#allocation5 + $0x4] ss:$16 sps:$4 sm:$0xff]  }
  0x8e   :  { %1078 = vmatprep.subr.bf16.mxu1 %v4853_v15  ;;  %6638 = vst [vmem:[#allocation63_spill] sm:$0xff] %v4874_v25  ;;  %1040 = vmatpush1.bf16.msra.mxu0 %v4868_v28  ;;  %v4880_v15 = vld [vmem:[#allocation5] ss:$16 sps:$4 sm:$0xff]   ;;  %v6356_v28 = vsub.s32 0, %v4571_v4 }
  0x8f   :  { %6640 = vst [vmem:[#allocation65_spill] sm:$0xff] %v4880_v15  ;;  %1041 = vmatprep.subr.bf16.mxu0 %v4874_v25 }
  0x91   :  { %1079 = vmatpush1.bf16.msra.mxu1 %v4860_v16 }
  0x92   :  { %1080 = vmatprep.subr.bf16.mxu1 %v4865_v23  ;;  %1042 = vmatpush1.bf16.msra.mxu0 %v4880_v15 }
  0x93   :  { %1137 = vmatprep.subr.bf16.mxu0 %v4574_v7 }
  0x95   :  { %1081 = vmatpush1.bf16.msra.mxu1 %v4872_v24  ;;  %v93_v24 = vld [vmem:[%s6250_s2] sm:$0xf] }
  0x96   :  { %1082 = vmatprep.subr.bf16.mxu1 %v4877_v29  ;;  %v98_v25 = vrot.slane %v93_v24, %v6356_v28  ;;  %v6365_v29 = vsub.s32 1, %v4571_v4  ;;  %v6379_v28 = vsub.s32 3, %v4571_v4 }
  0x98   :  { %v110_v14 = vrot.slane %v93_v24, %v6379_v28 }
  0x99   :  { %1083 = vmatpush1.bf16.msra.mxu1 %v4884_v20  ;;  %v102_v20 = vrot.slane %v93_v24, %v6365_v29 }
  0x9a   :  { %1178 = vmatprep.subr.bf16.mxu1 %v4608_v30  ;;  %v6370_v30 = vsub.s32 2, %v4571_v4 }
  0x9c   :  { %v106_v10 = vrot.slane %v93_v24, %v6370_v30 }
  0xf4   :  { %v184_v23 = vpop.f32.mrf.mxu1 }
  0xf6   :  { %v186_v3 = vpop.f32.mrf.mxu1 }
  0xf8   :  { %v188_v15 = vpop.f32.mrf.mxu1 }
  0xf9   :  { %v4900_v7 = vadd.f32 %v188_v15, %v98_v25 }
  0xfa   :  { %v190_v16 = vpop.f32.mrf.mxu1 }
  0xfb   :  { %6642 = vst [vmem:[#allocation67_spill] sm:$0xff] %v4900_v7  ;;  %v4903_v21 = vadd.f32 %v190_v16, %v102_v20  ;;  %v4914_v7 = vadd.f32 %v184_v23, %v98_v25 }
  0xfc   :  { %v227_v18 = vpop.f32.mrf.mxu1 }
  0xfd   :  { %6643 = vst [vmem:[#allocation68_spill] sm:$0xff] %v4903_v21  ;;  %v4916_v21 = vadd.f32 %v186_v3, %v102_v20 }
  0xfe   :  { %v229_v17 = vpop.f32.mrf.mxu1 }
  0xff   :  { %v4922_v23 = vadd.f32 %v229_v17, %v110_v14 }
 0x100   :  { %v231_v9 = vpop.f32.mrf.mxu1 }
 0x101   :  { %v4910_v2 = vadd.f32 %v231_v9, %v106_v10  ;;  %v4920_v9 = vadd.f32 %v227_v18, %v106_v10 }
 0x102   :  { %v233_v15 = vpop.f32.mrf.mxu1 }
 0x103   :  { %6644 = vst [vmem:[#allocation69_spill] sm:$0xff] %v4910_v2  ;;  %v4912_v29 = vadd.f32 %v233_v15, %v110_v14 }
 0x105   :  { %6645 = vst [vmem:[#allocation70_spill] sm:$0xff] %v4912_v29 }
 0x107   :  { %v484_v16 = vpop.f32.mrf.mxu0 }
 0x108   :  { %v532_v11 = vadd.f32 %v484_v16, %v4914_v7 }
 0x109   :  { %v486_v30 = vpop.f32.mrf.mxu0 }
 0x10a   :  { %v3617_v1 = vmul.f32 -1.442695, %v532_v11  ;;  %v533_v6 = vadd.f32 %v486_v30, %v4916_v21 }
 0x10b   :  { %v488_v0 = vpop.f32.mrf.mxu0 }
 0x10c   :  { %3956 = vpow2.f32 %v3617_v1  ;;  %v3618_v4 = vmul.f32 -1.442695, %v533_v6 }
 0x10d   :  { %v489_v24 = vpop.f32.mrf.mxu0 }
 0x10e   :  { %3958 = vpow2.f32 %v3618_v4 }
 0x119   :  { %v3957_v28 = vpop.eup %3956 }
 0x11a   :  { %v545_v20 = vadd.f32 1.0, %v3957_v28 }
 0x11b   :  { %v3959_v16 = vpop.eup %3958 }
 0x11c   :  { %v525_v15 = vpop.f32.mrf.mxu1  ;;  %3960 = vrcp.f32 %v545_v20  ;;  %v546_v0 = vadd.f32 1.0, %v3959_v16  ;;  %v6660_v16 = vld [vmem:[#allocation25_spill] sm:$0xff] }
 0x11d   :  { %v534_v3 = vadd.f32 %v525_v15, %v4920_v9 }
 0x11e   :  { %v527_v25 = vpop.f32.mrf.mxu1 }
 0x11f   :  { %v3619_v29 = vmul.f32 -1.442695, %v534_v3  ;;  %v535_v11 = vadd.f32 %v527_v25, %v4922_v23 }
 0x120   :  { %v529_v1 = vpop.f32.mrf.mxu1 }
 0x121   :  { %3962 = vpow2.f32 %v3619_v29  ;;  %v6659_v29 = vld [vmem:[#allocation28_spill] sm:$0xff] }
 0x122   :  { %3964 = vrcp.f32 %v546_v0  ;;  %v530_v4 = vpop.f32.mrf.mxu1  ;;  %v6662_v0 = vld [vmem:[#allocation26_spill] sm:$0xff]  ;;  %v6663_v1 = vld [vmem:[#allocation32_spill] sm:$0xff] }
 0x123   :  { %3966 = vtanh.f32 %v535_v11  ;;  %v6661_v11 = vld [vmem:[#allocation31_spill] sm:$0xff]  ;;  %v6664_v4 = vld [vmem:[#allocation29_spill] sm:$0xff] }
 0x129   :  { %v3961_v6 = vpop.eup %3960 }
 0x12e   :  { %v3963_v10 = vpop.eup %3962 }
 0x12f   :  { %v3965_v18 = vpop.eup %3964  ;;  %v547_v30 = vadd.f32 1.0, %v3963_v10  ;;  %v6666_v10 = vld [vmem:[#allocation30_spill] sm:$0xff] }
 0x130   :  { %v3967_v14 = vpop.eup %3966  ;;  %v555_v17 = vmul.f32 0.0, %v3965_v18  ;;  %v6667_v18 = vld [vmem:[#allocation34_spill] sm:$0xff] }
 0x131   :  { %v556_v24 = vmul.f32 %v3967_v14, %v3961_v6  ;;  %3968 = vrcp.f32 %v547_v30  ;;  %v6665_v6 = vld [vmem:[#allocation33_spill] sm:$0xff]  ;;  %v6668_v14 = vld [vmem:[#allocation35_spill] sm:$0xff] }
 0x132   :  { %v236_v30 = vld [vmem:[%s6254_s6] sm:$0xf] }
 0x133   :  { %v4926_v28 = vadd.f32 %v556_v24, %v555_v17  ;;  %v6669_v17 = vld [vmem:[#allocation36_spill] sm:$0xff] }
 0x134   :  { %v6670_v24 = vld [vmem:[#allocation12_spill] sm:$0xff] }
 0x135   :  { %3970 = vtanh.f32 %v4926_v28 }
 0x13e   :  { %v3969_v15 = vpop.eup %3968 }
 0x142   :  { %v3971_v3 = vpop.eup %3970 }
 0x143   :  { %v559_v20 = vmul.f32 %v3971_v3, %v3969_v15  ;;  %v6671_v15 = vsub.s32 0, %v6670_v24 }
 0x145   :  { %v560_v25 = vpack.c.bf16 %v559_v20, %v559_v20  ;;  %v5002_v3 = vrot.slane %v236_v30, %v6671_v15 }
 0x147   :  { %1060 = vmatmul.mubr.bf16.vlgmr.msra.gmra.mxu0 %v560_v25  ;;  %1101 = vmatmul.mubr.bf16.vlgmr.msra.gmra.mxu1 %v560_v25 }
 0x148   :  { %1138 = vmatpush1.bf16.msra.mxu0 %v4576_v8  ;;  %1179 = vmatpush1.bf16.msra.mxu1 %v4620_v33  ;;  %v819_v8 = vpop.f32.mrf.mxu0  ;;  %v6647_v33 = vld [vmem:[#allocation16_spill] sm:$0xff] }
 0x149   :  { %1139 = vmatprep.subr.bf16.mxu0 %v4582_v12  ;;  %1180 = vmatprep.subr.bf16.mxu1 %v4627_v36  ;;  %v6649_v36 = vld [vmem:[#allocation19_spill] sm:$0xff] }
 0x14a   :  { %1169 = vmatprep.mubr.bf16.mxu0 %v6608_v22  ;;  %1210 = vmatprep.mubr.bf16.mxu1 %v6608_v22  ;;  %v821_v12 = vpop.f32.mrf.mxu0 }
 0x14c   :  { %1140 = vmatpush1.bf16.msra.mxu0 %v4584_v13  ;;  %1181 = vmatpush1.bf16.msra.mxu1 %v4631_v37  ;;  %v823_v13 = vpop.f32.mrf.mxu0  ;;  %v6650_v37 = vld [vmem:[#allocation15_spill] sm:$0xff] }
 0x14d   :  { %1141 = vmatprep.subr.bf16.mxu0 %v4595_v19  ;;  %1182 = vmatprep.subr.bf16.mxu1 %v4640_v40  ;;  %v6653_v40 = vld [vmem:[#allocation23_spill] sm:$0xff]  ;;  %v6672_v13 = vsub.s32 1, %v6670_v24 }
 0x14e   :  { %v824_v19 = vpop.f32.mrf.mxu0 }
 0x14f   :  { %v5006_v19 = vrot.slane %v236_v30, %v6672_v13 }
 0x150   :  { %1142 = vmatpush1.bf16.msra.mxu0 %v4601_v26  ;;  %1183 = vmatpush1.bf16.msra.mxu1 %v4643_v41  ;;  %v860_v26 = vpop.f32.mrf.mxu1  ;;  %v6654_v41 = vld [vmem:[#allocation18_spill] sm:$0xff] }
 0x151   :  { %1143 = vmatprep.subr.bf16.mxu0 %v4605_v27  ;;  %1184 = vmatprep.subr.bf16.mxu1 %v4650_v44  ;;  %v6657_v44 = vld [vmem:[#allocation27_spill] sm:$0xff] }
 0x152   :  { %v862_v27 = vpop.f32.mrf.mxu1 }
 0x154   :  { %1144 = vmatpush1.bf16.msra.mxu0 %v4612_v31  ;;  %1185 = vmatpush1.bf16.msra.mxu1 %v4657_v46  ;;  %v864_v31 = vpop.f32.mrf.mxu1 }
 0x155   :  { %1145 = vmatprep.subr.bf16.mxu0 %v4615_v32  ;;  %1186 = vmatprep.subr.bf16.mxu1 %v4660_v47  ;;  %v6646_v32 = vld [vmem:[#allocation13_spill] sm:$0xff] }
 0x158   :  { %1146 = vmatpush1.bf16.msra.mxu0 %v4622_v34  ;;  %1187 = vmatpush1.bf16.msra.mxu1 %v4665_v48  ;;  %v865_v34 = vpop.f32.mrf.mxu1 }
 0x159   :  { %1147 = vmatprep.subr.bf16.mxu0 %v4625_v35  ;;  %1188 = vmatprep.subr.bf16.mxu1 %v4668_v49  ;;  %v6648_v35 = vld [vmem:[#allocation14_spill] sm:$0xff] }
 0x15c   :  { %1148 = vmatpush1.bf16.msra.mxu0 %v4633_v38  ;;  %1189 = vmatpush1.bf16.msra.mxu1 %v4673_v50  ;;  %v6651_v38 = vld [vmem:[#allocation20_spill] sm:$0xff] }
 0x15d   :  { %1149 = vmatprep.subr.bf16.mxu0 %v4637_v39  ;;  %1190 = vmatprep.subr.bf16.mxu1 %v4675_v51  ;;  %v6652_v39 = vld [vmem:[#allocation17_spill] sm:$0xff] }
 0x160   :  { %1150 = vmatpush1.bf16.msra.mxu0 %v4645_v42  ;;  %1191 = vmatpush1.bf16.msra.mxu1 %v4680_v52  ;;  %v6655_v42 = vld [vmem:[#allocation24_spill] sm:$0xff] }
 0x161   :  { %1151 = vmatprep.subr.bf16.mxu0 %v4647_v43  ;;  %1192 = vmatprep.subr.bf16.mxu1 %v4682_v53  ;;  %v6656_v43 = vld [vmem:[#allocation21_spill] sm:$0xff] }
 0x164   :  { %1152 = vmatpush1.bf16.msra.mxu0 %v4655_v45  ;;  %1193 = vmatpush1.bf16.msra.mxu1 %v4687_v54  ;;  %v6658_v45 = vld [vmem:[#allocation22_spill] sm:$0xff] }
 0x165   :  { %1264 = vmatprep.subr.bf16.mxu0 %v4693_v55  ;;  %1305 = vmatprep.subr.bf16.mxu1 %v4700_v58 }
 0x167   :  { %1170 = vmatmul.mubr.bf16.vlgmr.msra.gmra.mxu0 %v560_v25  ;;  %1211 = vmatmul.mubr.bf16.vlgmr.msra.gmra.mxu1 %v560_v25 }
 0x168   :  { %1265 = vmatpush1.bf16.msra.mxu0 %v4695_v56  ;;  %1306 = vmatpush1.bf16.msra.mxu1 %v4705_v60 }
 0x169   :  { %1266 = vmatprep.subr.bf16.mxu0 %v4698_v57  ;;  %1307 = vmatprep.subr.bf16.mxu1 %v4711_v62 }
 0x16a   :  { %1296 = vmatprep.mubr.bf16.mxu0 %v6608_v22  ;;  %1337 = vmatprep.mubr.bf16.mxu1 %v6608_v22 }
 0x16c   :  { %1267 = vmatpush1.bf16.msra.mxu0 %v4703_v59  ;;  %1308 = vmatpush1.bf16.msra.mxu1 %v4714_v63 }
 0x16d   :  { %1268 = vmatprep.subr.bf16.mxu0 %v4709_v61  ;;  %1309 = vmatprep.subr.bf16.mxu1 %v4727_v5 }
 0x170   :  { %1269 = vmatpush1.bf16.msra.mxu0 %v6646_v32  ;;  %1310 = vmatpush1.bf16.msra.mxu1 %v6647_v33 }
 0x171   :  { %1270 = vmatprep.subr.bf16.mxu0 %v6648_v35  ;;  %1311 = vmatprep.subr.bf16.mxu1 %v6649_v36 }
 0x174   :  { %1271 = vmatpush1.bf16.msra.mxu0 %v6650_v37  ;;  %1312 = vmatpush1.bf16.msra.mxu1 %v6651_v38 }
 0x175   :  { %1272 = vmatprep.subr.bf16.mxu0 %v6652_v39  ;;  %1313 = vmatprep.subr.bf16.mxu1 %v6653_v40 }
 0x178   :  { %1273 = vmatpush1.bf16.msra.mxu0 %v6654_v41  ;;  %1314 = vmatpush1.bf16.msra.mxu1 %v6655_v42 }
 0x179   :  { %1274 = vmatprep.subr.bf16.mxu0 %v6656_v43  ;;  %1315 = vmatprep.subr.bf16.mxu1 %v6657_v44 }
 0x17c   :  { %1275 = vmatpush1.bf16.msra.mxu0 %v6658_v45  ;;  %1316 = vmatpush1.bf16.msra.mxu1 %v6659_v29 }
 0x17d   :  { %1276 = vmatprep.subr.bf16.mxu0 %v6660_v16  ;;  %1317 = vmatprep.subr.bf16.mxu1 %v6661_v11  ;;  %v6673_v11 = vsub.s32 2, %v6670_v24 }
 0x17f   :  { %v5012_v13 = vrot.slane %v236_v30, %v6673_v11 }
 0x180   :  { %1277 = vmatpush1.bf16.msra.mxu0 %v6662_v0  ;;  %1318 = vmatpush1.bf16.msra.mxu1 %v6663_v1 }
 0x181   :  { %1278 = vmatprep.subr.bf16.mxu0 %v6664_v4  ;;  %1319 = vmatprep.subr.bf16.mxu1 %v6665_v6 }
 0x184   :  { %1279 = vmatpush1.bf16.msra.mxu0 %v6666_v10  ;;  %1320 = vmatpush1.bf16.msra.mxu1 %v6667_v18 }
 0x185   :  { %1349 = vmatprep.subr.bf16.mxu0 %v6668_v14  ;;  %1390 = vmatprep.subr.bf16.mxu1 %v6669_v17 }
 0x207   :  { %v1061_v20 = vpop.f32.mrf.mxu0  ;;  %v1102_v25 = vpop.f32.mrf.mxu1 }
 0x208   :  { %v1062_v31 = vadd.f32 %v1061_v20, %v819_v8  ;;  %v1103_v8 = vadd.f32 %v1102_v25, %v860_v26 }
 0x209   :  { %v1063_v34 = vpop.f32.mrf.mxu0  ;;  %v1104_v2 = vpop.f32.mrf.mxu1 }
 0x20a   :  { %v1109_v14 = vadd.f32 %v1062_v31, %v5002_v3  ;;  %v1064_v17 = vadd.f32 %v1063_v34, %v821_v12  ;;  %v1111_v20 = vadd.f32 %v1103_v8, %v5012_v13  ;;  %v6674_v31 = vsub.s32 3, %v6670_v24 }
 0x20b   :  { %v1065_v18 = vpop.f32.mrf.mxu0  ;;  %v1106_v10 = vpop.f32.mrf.mxu1 }
 0x20c   :  { %v3684_v6 = vmul.f32 -1.442695, %v1109_v14  ;;  %v1110_v4 = vadd.f32 %v1064_v17, %v5006_v19  ;;  %v5017_v12 = vrot.slane %v236_v30, %v6674_v31  ;;  %v1105_v10 = vadd.f32 %v1104_v2, %v862_v27 }
 0x20d   :  { %v1066_v1 = vpop.f32.mrf.mxu0  ;;  %v1107_v15 = vpop.f32.mrf.mxu1  ;;  %v3686_v18 = vmul.f32 -1.442695, %v1111_v20 }
 0x20e   :  { %3972 = vpow2.f32 %v3684_v6  ;;  %v3685_v0 = vmul.f32 -1.442695, %v1110_v4  ;;  %6675 = vst [vmem:[#allocation13_spill] sm:$0xff] %v5017_v12  ;;  %v1112_v1 = vadd.f32 %v1105_v10, %v5017_v12 }
 0x210   :  { %3974 = vpow2.f32 %v3685_v0 }
 0x211   :  { %3976 = vpow2.f32 %v3686_v18 }
 0x21b   :  { %v3973_v14 = vpop.eup %3972 }
 0x21c   :  { %v1122_v17 = vadd.f32 1.0, %v3973_v14 }
 0x21d   :  { %v3975_v6 = vpop.eup %3974 }
 0x21e   :  { %3978 = vrcp.f32 %v1122_v17  ;;  %v1123_v0 = vadd.f32 1.0, %v3975_v6  ;;  %v3977_v24 = vpop.eup %3976 }
 0x21f   :  { %3980 = vtanh.f32 %v1112_v1  ;;  %v1124_v14 = vadd.f32 1.0, %v3977_v24 }
 0x220   :  { %3982 = vrcp.f32 %v1123_v0 }
 0x227   :  { %v1171_v11 = vpop.f32.mrf.mxu0  ;;  %v1212_v26 = vpop.f32.mrf.mxu1 }
 0x228   :  { %v1223_v4 = vrot.slane %v1171_v11, 6 }
 0x229   :  { %v1173_v25 = vpop.f32.mrf.mxu0  ;;  %v1214_v34 = vpop.f32.mrf.mxu1 }
 0x22a   :  { %v1231_v30 = vadd.f32 %v1223_v4, %v4914_v7  ;;  %v1224_v2 = vrot.slane %v1173_v25, 6  ;;  %v1225_v4 = vrot.slane %v1212_v26, 6 }
 0x22b   :  { %v3979_v27 = vpop.eup %3978  ;;  %v1175_v15 = vpop.f32.mrf.mxu0 }
 0x22c   :  { %v1216_v8 = vpop.f32.mrf.mxu1  ;;  %v3981_v20 = vpop.eup %3980  ;;  %v3687_v31 = vmul.f32 -1.442695, %v1231_v30  ;;  %v1232_v10 = vadd.f32 %v1224_v2, %v4916_v21  ;;  %v1233_v25 = vadd.f32 %v1225_v4, %v4920_v9  ;;  %v1226_v30 = vrot.slane %v1214_v34, 6  ;;  %v6677_v34 = vld [vmem:[#allocation38_spill] sm:$0xff]  ;;  %v6682_v4 = vld [vmem:[#allocation43_spill] sm:$0xff] }
 0x22d   :  { %v3983_v18 = vpop.eup %3982  ;;  %v1176_v1 = vpop.f32.mrf.mxu0  ;;  %v1133_v0 = vmul.f32 %v3981_v20, %v3979_v27 }
 0x22e   :  { %v1217_v17 = vpop.f32.mrf.mxu1  ;;  %v1132_v6 = vmul.f32 0.0, %v3983_v18  ;;  %3984 = vpow2.f32 %v3687_v31  ;;  %v3688_v11 = vmul.f32 -1.442695, %v1232_v10  ;;  %v3689_v15 = vmul.f32 -1.442695, %v1233_v25  ;;  %v6676_v18 = vld [vmem:[#allocation37_spill] sm:$0xff] }
 0x22f   :  { %v1234_v24 = vadd.f32 %v1226_v30, %v4922_v23  ;;  %v6679_v17 = vld [vmem:[#allocation40_spill] sm:$0xff] }
 0x230   :  { %v5022_v12 = vadd.f32 %v1133_v0, %v1132_v6  ;;  %3986 = vpow2.f32 %v3688_v11  ;;  %v6680_v6 = vld [vmem:[#allocation41_spill] sm:$0xff]  ;;  %v6681_v0 = vld [vmem:[#allocation42_spill] sm:$0xff]  ;;  %v6683_v25 = vld [vmem:[#allocation44_spill] sm:$0xff] }
 0x231   :  { %3988 = vrcp.f32 %v1124_v14  ;;  %v6678_v14 = vld [vmem:[#allocation39_spill] sm:$0xff] }
 0x232   :  { %3990 = vtanh.f32 %v5022_v12 }
 0x233   :  { %3992 = vpow2.f32 %v3689_v15 }
 0x23b   :  { %v3985_v2 = vpop.eup %3984 }
 0x23c   :  { %v1244_v8 = vadd.f32 1.0, %v3985_v2  ;;  %v1255_v2 = vrot.slane %v4926_v28, 6  ;;  %v6690_v28 = vld [vmem:[#allocation51_spill] sm:$0xff] }
 0x23d   :  { %v3987_v1 = vpop.eup %3986 }
 0x23e   :  { %v3989_v27 = vpop.eup %3988  ;;  %3994 = vrcp.f32 %v1244_v8  ;;  %v1245_v20 = vadd.f32 1.0, %v3987_v1  ;;  %v6684_v1 = vld [vmem:[#allocation45_spill] sm:$0xff] }
 0x23f   :  { %v3991_v31 = vpop.eup %3990  ;;  %3996 = vtanh.f32 %v1234_v24 }
 0x240   :  { %3998 = vrcp.f32 %v1245_v20  ;;  %v1136_v10 = vmul.f32 %v3991_v31, %v3989_v27  ;;  %v3993_v11 = vpop.eup %3992  ;;  %v6685_v27 = vld [vmem:[#allocation46_spill] sm:$0xff] }
 0x241   :  { %v1246_v8 = vadd.f32 1.0, %v3993_v11  ;;  %v6691_v11 = vld [vmem:[#allocation52_spill] sm:$0xff] }
 0x242   :  { %v1263_v26 = vpack.c.bf16 %v1136_v10, %v1136_v10  ;;  %v6686_v10 = vld [vmem:[#allocation47_spill] sm:$0xff] }
 0x243   :  { %4000 = vrcp.f32 %v1246_v8  ;;  %v6697_v8 = vld [vmem:[#allocation58_spill] sm:$0xff] }
 0x244   :  { %1297 = vmatmul.mubr.bf16.vlgmr.msra.gmra.mxu0 %v1263_v26  ;;  %1338 = vmatmul.mubr.bf16.vlgmr.msra.gmra.mxu1 %v1263_v26  ;;  %v6687_v26 = vld [vmem:[#allocation48_spill] sm:$0xff] }
 0x245   :  { %1350 = vmatpush1.bf16.msra.mxu0 %v6676_v18  ;;  %1391 = vmatpush1.bf16.msra.mxu1 %v6677_v34 }
 0x246   :  { %1351 = vmatprep.subr.bf16.mxu0 %v6678_v14  ;;  %1392 = vmatprep.subr.bf16.mxu1 %v6679_v17 }
 0x247   :  { %1381 = vmatprep.mubr.bf16.mxu0 %v6608_v22  ;;  %1422 = vmatprep.mubr.bf16.mxu1 %v6608_v22 }
 0x249   :  { %1352 = vmatpush1.bf16.msra.mxu0 %v6680_v6  ;;  %1393 = vmatpush1.bf16.msra.mxu1 %v6681_v0 }
 0x24a   :  { %1353 = vmatprep.subr.bf16.mxu0 %v6682_v4  ;;  %1394 = vmatprep.subr.bf16.mxu1 %v6683_v25  ;;  %v6688_v25 = vld [vmem:[#allocation49_spill] sm:$0xff]  ;;  %v6689_v4 = vld [vmem:[#allocation50_spill] sm:$0xff] }
 0x24b   :  { %v3995_v30 = vpop.eup %3994 }
 0x24c   :  { %v3997_v15 = vpop.eup %3996 }
 0x24d   :  { %v3999_v24 = vpop.eup %3998  ;;  %1354 = vmatpush1.bf16.msra.mxu0 %v6684_v1  ;;  %1395 = vmatpush1.bf16.msra.mxu1 %v6685_v27  ;;  %v1258_v31 = vmul.f32 %v3997_v15, %v3995_v30  ;;  %v6692_v27 = vld [vmem:[#allocation53_spill] sm:$0xff]  ;;  %v6693_v30 = vld [vmem:[#allocation54_spill] sm:$0xff]  ;;  %v6694_v15 = vld [vmem:[#allocation55_spill] sm:$0xff] }
 0x24e   :  { %v1257_v20 = vmul.f32 %v3999_v24, %v1255_v2  ;;  %1355 = vmatprep.subr.bf16.mxu0 %v6686_v10  ;;  %1396 = vmatprep.subr.bf16.mxu1 %v6687_v26  ;;  %v6695_v2 = vld [vmem:[#allocation56_spill] sm:$0xff]  ;;  %v6696_v24 = vld [vmem:[#allocation57_spill] sm:$0xff] }
 0x250   :  { %v5042_v0 = vadd.f32 %v1258_v31, %v1257_v20  ;;  %v6698_v20 = vld [vmem:[#allocation59_spill] sm:$0xff]  ;;  %v6699_v31 = vld [vmem:[#allocation60_spill] sm:$0xff] }
 0x251   :  { %1356 = vmatpush1.bf16.msra.mxu0 %v6688_v25  ;;  %1397 = vmatpush1.bf16.msra.mxu1 %v6689_v4  ;;  %v6700_v4 = vld [vmem:[#allocation61_spill] sm:$0xff] }
 0x252   :  { %4002 = vtanh.f32 %v5042_v0  ;;  %1357 = vmatprep.subr.bf16.mxu0 %v6690_v28  ;;  %1398 = vmatprep.subr.bf16.mxu1 %v6691_v11  ;;  %v6701_v28 = vld [vmem:[#allocation62_spill] sm:$0xff]  ;;  %v4001_v11 = vpop.eup %4000 }
 0x255   :  { %1358 = vmatpush1.bf16.msra.mxu0 %v6692_v27  ;;  %1399 = vmatpush1.bf16.msra.mxu1 %v6693_v30  ;;  %v6702_v27 = vld [vmem:[#allocation63_spill] sm:$0xff]  ;;  %v6703_v30 = vld [vmem:[#allocation64_spill] sm:$0xff] }
 0x256   :  { %1359 = vmatprep.subr.bf16.mxu0 %v6694_v15  ;;  %1400 = vmatprep.subr.bf16.mxu1 %v6695_v2  ;;  %v6704_v2 = vld [vmem:[#allocation65_spill] sm:$0xff] }
 0x259   :  { %1360 = vmatpush1.bf16.msra.mxu0 %v6696_v24  ;;  %1401 = vmatpush1.bf16.msra.mxu1 %v6697_v8  ;;  %v6705_v24 = vld [vmem:[#allocation66_spill] sm:$0xff] }
 0x25a   :  { %1361 = vmatprep.subr.bf16.mxu0 %v6698_v20  ;;  %1402 = vmatprep.subr.bf16.mxu1 %v6699_v31  ;;  %v5063_v8 = vld [vmem:[#allocation2 + $0xe4] ss:$16 sps:$4 sm:$0xff]   ;;  %v5066_v31 = vld [vmem:[#allocation2 + $0xec] ss:$16 sps:$4 sm:$0xff]  }
 0x25b   :  { %6706 = vst [vmem:[#allocation16_spill] sm:$0xff] %v5063_v8 }
 0x25d   :  { %1362 = vmatpush1.bf16.msra.mxu0 %v6700_v4  ;;  %1403 = vmatpush1.bf16.msra.mxu1 %v6701_v28 }
 0x25e   :  { %1363 = vmatprep.subr.bf16.mxu0 %v6702_v27  ;;  %1404 = vmatprep.subr.bf16.mxu1 %v6703_v30  ;;  %v5069_v27 = vld [vmem:[#allocation2 + $0xe0] ss:$16 sps:$4 sm:$0xff]  }
 0x25f   :  { %v4003_v15 = vpop.eup %4002  ;;  %6707 = vst [vmem:[#allocation14_spill] sm:$0xff] %v5069_v27 }
 0x260   :  { %v1261_v25 = vmul.f32 %v4003_v15, %v4001_v11  ;;  %v5072_v11 = vld [vmem:[#allocation2 + $0xe8] ss:$16 sps:$4 sm:$0xff]   ;;  %v5075_v15 = vld [vmem:[#allocation2 + $0xc4] ss:$16 sps:$4 sm:$0xff]  }
 0x261   :  { %1364 = vmatpush1.bf16.msra.mxu0 %v6704_v2  ;;  %1405 = vmatpush1.bf16.msra.mxu1 %v6705_v24  ;;  %6708 = vst [vmem:[#allocation19_spill] sm:$0xff] %v5072_v11  ;;  %6709 = vst [vmem:[#allocation15_spill] sm:$0xff] %v5075_v15 }
 0x262   :  { %1459 = vmatprep.subr.bf16.mxu0 %v5063_v8  ;;  %1500 = vmatprep.subr.bf16.mxu1 %v5066_v31  ;;  %v1262_v28 = vpack.c.bf16 %v1261_v25, %v1261_v25  ;;  %v5078_v8 = vld [vmem:[#allocation2 + $0xcc] ss:$16 sps:$4 sm:$0xff]   ;;  %v5083_v25 = vld [vmem:[#allocation2 + $0xc0] ss:$16 sps:$4 sm:$0xff]  }
 0x263   :  { %6710 = vst [vmem:[#allocation20_spill] sm:$0xff] %v5078_v8  ;;  %6711 = vst [vmem:[#allocation17_spill] sm:$0xff] %v5083_v25 }
 0x264   :  { %v1347_v4 = vrot.slane %v1262_v28, 1  ;;  %v5086_v28 = vld [vmem:[#allocation2 + $0xc8] ss:$16 sps:$4 sm:$0xff]  }
 0x265   :  { %6712 = vst [vmem:[#allocation23_spill] sm:$0xff] %v5086_v28 }
 0x266   :  { %1382 = vmatmul.mubr.bf16.vlgmr.msra.gmra.mxu0 %v1347_v4  ;;  %1423 = vmatmul.mubr.bf16.vlgmr.msra.gmra.mxu1 %v1347_v4 }
 0x267   :  { %1460 = vmatpush1.bf16.msra.mxu0 %v5069_v27  ;;  %1501 = vmatpush1.bf16.msra.mxu1 %v5072_v11  ;;  %v5089_v11 = vld [vmem:[#allocation2 + $0xa4] ss:$16 sps:$4 sm:$0xff]   ;;  %v5098_v27 = vld [vmem:[#allocation2 + $0xa8] ss:$16 sps:$4 sm:$0xff]  }
 0x268   :  { %1461 = vmatprep.subr.bf16.mxu0 %v5075_v15  ;;  %1502 = vmatprep.subr.bf16.mxu1 %v5078_v8  ;;  %6713 = vst [vmem:[#allocation18_spill] sm:$0xff] %v5089_v11  ;;  %v5092_v15 = vld [vmem:[#allocation2 + $0xac] ss:$16 sps:$4 sm:$0xff]   ;;  %v5095_v8 = vld [vmem:[#allocation2 + $0xa0] ss:$16 sps:$4 sm:$0xff]   ;;  %6715 = vst [vmem:[#allocation21_spill] sm:$0xff] %v5098_v27 }
 0x269   :  { %1491 = vmatprep.mubr.bf16.mxu0 %v6608_v22  ;;  %1532 = vmatprep.mubr.bf16.mxu1 %v6608_v22  ;;  %6714 = vst [vmem:[#allocation24_spill] sm:$0xff] %v5092_v15 }
 0x26b   :  { %1462 = vmatpush1.bf16.msra.mxu0 %v5083_v25  ;;  %1503 = vmatpush1.bf16.msra.mxu1 %v5086_v28  ;;  %v5101_v25 = vld [vmem:[#allocation2 + $0x84] ss:$16 sps:$4 sm:$0xff]   ;;  %v5104_v28 = vld [vmem:[#allocation2 + $0x8c] ss:$16 sps:$4 sm:$0xff]  }
 0x26c   :  { %1463 = vmatprep.subr.bf16.mxu0 %v5089_v11  ;;  %1504 = vmatprep.subr.bf16.mxu1 %v5092_v15  ;;  %6716 = vst [vmem:[#allocation27_spill] sm:$0xff] %v5101_v25  ;;  %v5107_v11 = vld [vmem:[#allocation2 + $0x80] ss:$16 sps:$4 sm:$0xff]   ;;  %v5111_v15 = vld [vmem:[#allocation2 + $0x64] ss:$16 sps:$4 sm:$0xff]  }
 0x26d   :  { %6717 = vst [vmem:[#allocation22_spill] sm:$0xff] %v5107_v11 }
 0x26f   :  { %1464 = vmatpush1.bf16.msra.mxu0 %v5095_v8  ;;  %1505 = vmatpush1.bf16.msra.mxu1 %v5098_v27  ;;  %v5115_v27 = vld [vmem:[#allocation2 + $0x60] ss:$16 sps:$4 sm:$0xff]  }
 0x270   :  { %1465 = vmatprep.subr.bf16.mxu0 %v5101_v25  ;;  %1506 = vmatprep.subr.bf16.mxu1 %v5104_v28  ;;  %v5119_v25 = vld [vmem:[#allocation2 + $0x44] ss:$16 sps:$4 sm:$0xff]  }
 0x273   :  { %1466 = vmatpush1.bf16.msra.mxu0 %v5107_v11  ;;  %1507 = vmatpush1.bf16.msra.mxu1 %v4657_v46  ;;  %v5123_v11 = vld [vmem:[#allocation2 + $0x40] ss:$16 sps:$4 sm:$0xff]   ;;  %v5127_v46 = vld [vmem:[#allocation2 + $0x24] ss:$16 sps:$4 sm:$0xff]  }
 0x274   :  { %1467 = vmatprep.subr.bf16.mxu0 %v5111_v15  ;;  %1508 = vmatprep.subr.bf16.mxu1 %v4660_v47  ;;  %v5131_v47 = vld [vmem:[#allocation2 + $0x20] ss:$16 sps:$4 sm:$0xff]  }
 0x277   :  { %1468 = vmatpush1.bf16.msra.mxu0 %v5115_v27  ;;  %1509 = vmatpush1.bf16.msra.mxu1 %v4665_v48  ;;  %v5135_v48 = vld [vmem:[#allocation2 + $0x4] ss:$16 sps:$4 sm:$0xff]  }
 0x278   :  { %1469 = vmatprep.subr.bf16.mxu0 %v5119_v25  ;;  %1510 = vmatprep.subr.bf16.mxu1 %v4668_v49  ;;  %v5139_v49 = vld [vmem:[#allocation2] ss:$16 sps:$4 sm:$0xff]  }
 0x27b   :  { %1470 = vmatpush1.bf16.msra.mxu0 %v5123_v11  ;;  %1511 = vmatpush1.bf16.msra.mxu1 %v4673_v50  ;;  %v6718_v50 = vld [vmem:[#allocation31_spill] sm:$0xff] }
 0x27c   :  { %1471 = vmatprep.subr.bf16.mxu0 %v5127_v46  ;;  %1512 = vmatprep.subr.bf16.mxu1 %v4675_v51  ;;  %v6719_v51 = vld [vmem:[#allocation26_spill] sm:$0xff] }
 0x27f   :  { %1472 = vmatpush1.bf16.msra.mxu0 %v5131_v47  ;;  %1513 = vmatpush1.bf16.msra.mxu1 %v4680_v52  ;;  %v6720_v52 = vld [vmem:[#allocation32_spill] sm:$0xff] }
 0x280   :  { %1473 = vmatprep.subr.bf16.mxu0 %v5135_v48  ;;  %1514 = vmatprep.subr.bf16.mxu1 %v4682_v53  ;;  %v6721_v53 = vld [vmem:[#allocation29_spill] sm:$0xff] }
 0x283   :  { %1474 = vmatpush1.bf16.msra.mxu0 %v5139_v49  ;;  %1515 = vmatpush1.bf16.msra.mxu1 %v4687_v54  ;;  %v6722_v54 = vld [vmem:[#allocation33_spill] sm:$0xff] }
 0x284   :  { %1586 = vmatprep.subr.bf16.mxu0 %v4693_v55  ;;  %1627 = vmatprep.subr.bf16.mxu1 %v4700_v58  ;;  %v6723_v55 = vld [vmem:[#allocation30_spill] sm:$0xff]  ;;  %v6726_v58 = vld [vmem:[#allocation36_spill] sm:$0xff] }
 0x286   :  { %1492 = vmatmul.mubr.bf16.vlgmr.msra.gmra.mxu0 %v1347_v4  ;;  %1533 = vmatmul.mubr.bf16.vlgmr.msra.gmra.mxu1 %v1347_v4 }
 0x287   :  { %1587 = vmatpush1.bf16.msra.mxu0 %v4695_v56  ;;  %1628 = vmatpush1.bf16.msra.mxu1 %v4705_v60  ;;  %v6724_v56 = vld [vmem:[#allocation34_spill] sm:$0xff] }
 0x288   :  { %1588 = vmatprep.subr.bf16.mxu0 %v4698_v57  ;;  %1629 = vmatprep.subr.bf16.mxu1 %v4711_v62  ;;  %v6725_v57 = vld [vmem:[#allocation35_spill] sm:$0xff] }
 0x289   :  { %1618 = vmatprep.mubr.bf16.mxu0 %v6608_v22  ;;  %1659 = vmatprep.mubr.bf16.mxu1 %v6608_v22 }
 0x28b   :  { %1589 = vmatpush1.bf16.msra.mxu0 %v4703_v59  ;;  %1630 = vmatpush1.bf16.msra.mxu1 %v4714_v63 }
 0x28c   :  { %1590 = vmatprep.subr.bf16.mxu0 %v4709_v61  ;;  %1631 = vmatprep.subr.bf16.mxu1 %v4727_v5 }
 0x28f   :  { %1591 = vmatpush1.bf16.msra.mxu0 %v6646_v32  ;;  %1632 = vmatpush1.bf16.msra.mxu1 %v6647_v33 }
 0x290   :  { %1592 = vmatprep.subr.bf16.mxu0 %v6648_v35  ;;  %1633 = vmatprep.subr.bf16.mxu1 %v6649_v36 }
 0x293   :  { %1593 = vmatpush1.bf16.msra.mxu0 %v6650_v37  ;;  %1634 = vmatpush1.bf16.msra.mxu1 %v6651_v38 }
 0x294   :  { %1594 = vmatprep.subr.bf16.mxu0 %v6652_v39  ;;  %1635 = vmatprep.subr.bf16.mxu1 %v6653_v40 }
 0x297   :  { %1595 = vmatpush1.bf16.msra.mxu0 %v6654_v41  ;;  %1636 = vmatpush1.bf16.msra.mxu1 %v6655_v42 }
 0x298   :  { %1596 = vmatprep.subr.bf16.mxu0 %v6656_v43  ;;  %1637 = vmatprep.subr.bf16.mxu1 %v6657_v44 }
 0x29b   :  { %1597 = vmatpush1.bf16.msra.mxu0 %v6658_v45  ;;  %1638 = vmatpush1.bf16.msra.mxu1 %v6659_v29 }
 0x29c   :  { %1598 = vmatprep.subr.bf16.mxu0 %v6660_v16  ;;  %1639 = vmatprep.subr.bf16.mxu1 %v6718_v50 }
 0x29f   :  { %1599 = vmatpush1.bf16.msra.mxu0 %v6719_v51  ;;  %1640 = vmatpush1.bf16.msra.mxu1 %v6720_v52 }
 0x2a0   :  { %1600 = vmatprep.subr.bf16.mxu0 %v6721_v53  ;;  %1641 = vmatprep.subr.bf16.mxu1 %v6722_v54 }
 0x2a3   :  { %1601 = vmatpush1.bf16.msra.mxu0 %v6723_v55  ;;  %1642 = vmatpush1.bf16.msra.mxu1 %v6724_v56  ;;  %v6727_v55 = vld [vmem:[#allocation13_spill] sm:$0xff] }
 0x2a4   :  { %1671 = vmatprep.subr.bf16.mxu0 %v6725_v57  ;;  %1712 = vmatprep.subr.bf16.mxu1 %v6726_v58 }
 0x304   :  { %v1298_v59 = vpop.f32.mrf.mxu0  ;;  %v1339_v60 = vpop.f32.mrf.mxu1 }
 0x306   :  { %v1300_v61 = vpop.f32.mrf.mxu0  ;;  %v1341_v62 = vpop.f32.mrf.mxu1 }
 0x308   :  { %v1302_v63 = vpop.f32.mrf.mxu0  ;;  %v1343_v5 = vpop.f32.mrf.mxu1 }
 0x30a   :  { %v1303_v32 = vpop.f32.mrf.mxu0  ;;  %v1344_v33 = vpop.f32.mrf.mxu1 }
 0x326   :  { %v1383_v35 = vpop.f32.mrf.mxu0  ;;  %v1424_v36 = vpop.f32.mrf.mxu1 }
 0x327   :  { %v1384_v37 = vadd.f32 %v1383_v35, %v1298_v59  ;;  %v1425_v50 = vadd.f32 %v1424_v36, %v1339_v60 }
 0x328   :  { %v1385_v38 = vpop.f32.mrf.mxu0  ;;  %v1426_v39 = vpop.f32.mrf.mxu1 }
 0x329   :  { %v1431_v40 = vadd.f32 %v1384_v37, %v5002_v3  ;;  %v1386_v41 = vadd.f32 %v1385_v38, %v1300_v61  ;;  %v1433_v51 = vadd.f32 %v1425_v50, %v5012_v13  ;;  %v1427_v52 = vadd.f32 %v1426_v39, %v1341_v62 }
 0x32a   :  { %v1387_v42 = vpop.f32.mrf.mxu0  ;;  %v1428_v43 = vpop.f32.mrf.mxu1 }
 0x32b   :  { %v3690_v44 = vmul.f32 -1.442695, %v1431_v40  ;;  %v1432_v45 = vadd.f32 %v1386_v41, %v5006_v19  ;;  %v3692_v53 = vmul.f32 -1.442695, %v1433_v51  ;;  %v1434_v56 = vadd.f32 %v1427_v52, %v6727_v55 }
 0x32c   :  { %v1388_v29 = vpop.f32.mrf.mxu0  ;;  %v1429_v16 = vpop.f32.mrf.mxu1 }
 0x32d   :  { %4004 = vpow2.f32 %v3690_v44  ;;  %v3691_v4 = vmul.f32 -1.442695, %v1432_v45 }
 0x32f   :  { %4006 = vpow2.f32 %v3691_v4 }
 0x330   :  { %4008 = vpow2.f32 %v3692_v53 }
 0x33a   :  { %v4005_v54 = vpop.eup %4004 }
 0x33b   :  { %v1444_v57 = vadd.f32 1.0, %v4005_v54 }
 0x33c   :  { %v4007_v58 = vpop.eup %4006 }
 0x33d   :  { %4010 = vrcp.f32 %v1444_v57  ;;  %v1445_v59 = vadd.f32 1.0, %v4007_v58  ;;  %v4009_v60 = vpop.eup %4008 }
 0x33e   :  { %4012 = vtanh.f32 %v1434_v56  ;;  %v1446_v43 = vadd.f32 1.0, %v4009_v60 }
 0x33f   :  { %4014 = vrcp.f32 %v1445_v59 }
 0x346   :  { %v1493_v61 = vpop.f32.mrf.mxu0  ;;  %v1534_v63 = vpop.f32.mrf.mxu1 }
 0x347   :  { %v1545_v5 = vrot.slane %v1493_v61, 4  ;;  %v1547_v51 = vrot.slane %v1534_v63, 4 }
 0x348   :  { %v1495_v32 = vpop.f32.mrf.mxu0  ;;  %v1536_v33 = vpop.f32.mrf.mxu1 }
 0x349   :  { %v1553_v35 = vadd.f32 %v1545_v5, %v4914_v7  ;;  %v1546_v62 = vrot.slane %v1495_v32, 4  ;;  %v1555_v52 = vadd.f32 %v1547_v51, %v4920_v9  ;;  %v1548_v53 = vrot.slane %v1536_v33, 4  ;;  %v6728_v33 = vld [vmem:[#allocation42_spill] sm:$0xff] }
 0x34a   :  { %v4011_v36 = vpop.eup %4010  ;;  %v1497_v37 = vpop.f32.mrf.mxu0 }
 0x34b   :  { %v1538_v38 = vpop.f32.mrf.mxu1  ;;  %v4013_v39 = vpop.eup %4012  ;;  %v3693_v40 = vmul.f32 -1.442695, %v1553_v35  ;;  %v1554_v41 = vadd.f32 %v1546_v62, %v4916_v21  ;;  %v3695_v54 = vmul.f32 -1.442695, %v1555_v52  ;;  %v1556_v57 = vadd.f32 %v1548_v53, %v4922_v23  ;;  %v6729_v35 = vld [vmem:[#allocation43_spill] sm:$0xff]  ;;  %v6730_v62 = vld [vmem:[#allocation44_spill] sm:$0xff] }
 0x34c   :  { %v4015_v42 = vpop.eup %4014  ;;  %v1498_v44 = vpop.f32.mrf.mxu0  ;;  %v1455_v16 = vmul.f32 %v4013_v39, %v4011_v36  ;;  %v6745_v52 = vld [vmem:[#allocation63_spill] sm:$0xff] }
 0x34d   :  { %v1539_v45 = vpop.f32.mrf.mxu1  ;;  %v1454_v29 = vmul.f32 %v4015_v42, %v5022_v12  ;;  %4016 = vpow2.f32 %v3693_v40  ;;  %v3694_v4 = vmul.f32 -1.442695, %v1554_v41  ;;  %v6732_v40 = vld [vmem:[#allocation49_spill] sm:$0xff]  ;;  %v6733_v41 = vld [vmem:[#allocation50_spill] sm:$0xff] }
 0x34e   :  { %v6736_v42 = vld [vmem:[#allocation53_spill] sm:$0xff]  ;;  %v6741_v45 = vld [vmem:[#allocation58_spill] sm:$0xff] }
 0x34f   :  { %v5186_v50 = vadd.f32 %v1455_v16, %v1454_v29  ;;  %4018 = vpow2.f32 %v3694_v4  ;;  %v6740_v44 = vld [vmem:[#allocation57_spill] sm:$0xff]  ;;  %v6742_v29 = vld [vmem:[#allocation60_spill] sm:$0xff]  ;;  %v6744_v4 = vld [vmem:[#allocation62_spill] sm:$0xff] }
 0x350   :  { %4020 = vrcp.f32 %v1446_v43  ;;  %v6737_v43 = vld [vmem:[#allocation54_spill] sm:$0xff]  ;;  %v6743_v16 = vld [vmem:[#allocation61_spill] sm:$0xff] }
 0x351   :  { %4022 = vtanh.f32 %v5186_v50 }
 0x352   :  { %4024 = vpow2.f32 %v3695_v54 }
 0x35a   :  { %v4017_v56 = vpop.eup %4016 }
 0x35b   :  { %v1566_v58 = vadd.f32 1.0, %v4017_v56  ;;  %v6746_v56 = vld [vmem:[#allocation16_spill] sm:$0xff] }
 0x35c   :  { %v4019_v59 = vpop.eup %4018 }
 0x35d   :  { %v4021_v12 = vpop.eup %4020  ;;  %4026 = vrcp.f32 %v1566_v58  ;;  %v1567_v61 = vadd.f32 1.0, %v4019_v59  ;;  %v6747_v58 = vld [vmem:[#allocation14_spill] sm:$0xff]  ;;  %v6748_v59 = vld [vmem:[#allocation19_spill] sm:$0xff] }
 0x35e   :  { %v4023_v5 = vpop.eup %4022  ;;  %4028 = vtanh.f32 %v1556_v57 }
 0x35f   :  { %4030 = vrcp.f32 %v1567_v61  ;;  %v1458_v32 = vmul.f32 %v4023_v5, %v4021_v12  ;;  %v4025_v60 = vpop.eup %4024  ;;  %v6749_v12 = vld [vmem:[#allocation15_spill] sm:$0xff]  ;;  %v6753_v61 = vld [vmem:[#allocation18_spill] sm:$0xff]  ;;  %v6754_v5 = vld [vmem:[#allocation24_spill] sm:$0xff] }
 0x360   :  { %v1568_v37 = vadd.f32 1.0, %v4025_v60  ;;  %v5244_v60 = vld [vmem:[#allocation2 + $0x88] ss:$16 sps:$4 sm:$0xff]  }
 0x361   :  { %v1585_v63 = vpack.c.bf16 %v1458_v32, %v1458_v32  ;;  %v6755_v32 = vld [vmem:[#allocation21_spill] sm:$0xff] }
 0x362   :  { %4032 = vrcp.f32 %v1568_v37  ;;  %v5272_v37 = vld [vmem:[#allocation2 + $0xc] ss:$16 sps:$4 sm:$0xff]  }
 0x363   :  { %1619 = vmatmul.mubr.bf16.vlgmr.msra.gmra.mxu0 %v1585_v63  ;;  %1660 = vmatmul.mubr.bf16.vlgmr.msra.gmra.mxu1 %v1585_v63  ;;  %v6756_v63 = vld [vmem:[#allocation27_spill] sm:$0xff] }
 0x364   :  { %1672 = vmatpush1.bf16.msra.mxu0 %v6676_v18  ;;  %1713 = vmatpush1.bf16.msra.mxu1 %v6677_v34  ;;  %v1577_v34 = vrot.slane %v5042_v0, 6  ;;  %v6734_v0 = vld [vmem:[#allocation51_spill] sm:$0xff] }
 0x365   :  { %1673 = vmatprep.subr.bf16.mxu0 %v6678_v14  ;;  %1714 = vmatprep.subr.bf16.mxu1 %v6679_v17  ;;  %v6731_v17 = vld [vmem:[#allocation46_spill] sm:$0xff] }
 0x366   :  { %1703 = vmatprep.mubr.bf16.mxu0 %v6608_v22  ;;  %1744 = vmatprep.mubr.bf16.mxu1 %v6608_v22 }
 0x368   :  { %1674 = vmatpush1.bf16.msra.mxu0 %v6680_v6  ;;  %1715 = vmatpush1.bf16.msra.mxu1 %v6728_v33  ;;  %v6757_v33 = vld [vmem:[#allocation22_spill] sm:$0xff] }
 0x369   :  { %1675 = vmatprep.subr.bf16.mxu0 %v6729_v35  ;;  %1716 = vmatprep.subr.bf16.mxu1 %v6730_v62  ;;  %v5248_v35 = vld [vmem:[#allocation2 + $0x6c] ss:$16 sps:$4 sm:$0xff]   ;;  %v5252_v62 = vld [vmem:[#allocation2 + $0x68] ss:$16 sps:$4 sm:$0xff]  }
 0x36a   :  { %v4027_v18 = vpop.eup %4026 }
 0x36b   :  { %v4029_v36 = vpop.eup %4028 }
 0x36c   :  { %v4031_v14 = vpop.eup %4030  ;;  %1676 = vmatpush1.bf16.msra.mxu0 %v6684_v1  ;;  %1717 = vmatpush1.bf16.msra.mxu1 %v6731_v17  ;;  %v1580_v39 = vmul.f32 %v4029_v36, %v4027_v18  ;;  %v6735_v1 = vld [vmem:[#allocation52_spill] sm:$0xff]  ;;  %v5256_v18 = vld [vmem:[#allocation2 + $0x4c] ss:$16 sps:$4 sm:$0xff]  }
 0x36d   :  { %v1579_v38 = vmul.f32 %v4031_v14, %v1577_v34  ;;  %1677 = vmatprep.subr.bf16.mxu0 %v6686_v10  ;;  %1718 = vmatprep.subr.bf16.mxu1 %v6687_v26  ;;  %v6738_v10 = vld [vmem:[#allocation55_spill] sm:$0xff]  ;;  %v6739_v26 = vld [vmem:[#allocation56_spill] sm:$0xff] }
 0x36e   :  { %v5260_v36 = vld [vmem:[#allocation2 + $0x48] ss:$16 sps:$4 sm:$0xff]   ;;  %v5264_v34 = vld [vmem:[#allocation2 + $0x2c] ss:$16 sps:$4 sm:$0xff]  }
 0x36f   :  { %v5206_v6 = vadd.f32 %v1580_v39, %v1579_v38  ;;  %v4033_v51 = vpop.eup %4032  ;;  %v5268_v14 = vld [vmem:[#allocation2 + $0x28] ss:$16 sps:$4 sm:$0xff]   ;;  %v5279_v38 = vld [vmem:[#allocation7 + $0xe4] ss:$16 sps:$4 sm:$0xff]   ;;  %v5282_v39 = vld [vmem:[#allocation7 + $0xec] ss:$16 sps:$4 sm:$0xff]  }
 0x370   :  { %1678 = vmatpush1.bf16.msra.mxu0 %v6732_v40  ;;  %1719 = vmatpush1.bf16.msra.mxu1 %v6733_v41  ;;  %v5276_v17 = vld [vmem:[#allocation2 + $0x8] ss:$16 sps:$4 sm:$0xff]   ;;  %6759 = vst [vmem:[#allocation25_spill] sm:$0xff] %v5279_v38  ;;  %6760 = vst [vmem:[#allocation12_spill] sm:$0xff] %v5282_v39  ;;  %v5285_v40 = vld [vmem:[#allocation7 + $0xe0] ss:$16 sps:$4 sm:$0xff]  }
 0x371   :  { %4034 = vtanh.f32 %v5206_v6  ;;  %1679 = vmatprep.subr.bf16.mxu0 %v6734_v0  ;;  %1720 = vmatprep.subr.bf16.mxu1 %v6735_v1  ;;  %6758 = vst [vmem:[#allocation28_spill] sm:$0xff] %v5276_v17  ;;  %6761 = vst [vmem:[#allocation37_spill] sm:$0xff] %v5285_v40  ;;  %v5288_v41 = vld [vmem:[#allocation7 + $0xe8] ss:$16 sps:$4 sm:$0xff]   ;;  %v5291_v0 = vld [vmem:[#allocation7 + $0xc4] ss:$16 sps:$4 sm:$0xff]  }
 0x372   :  { %6762 = vst [vmem:[#allocation38_spill] sm:$0xff] %v5288_v41  ;;  %6763 = vst [vmem:[#allocation39_spill] sm:$0xff] %v5291_v0  ;;  %v5294_v1 = vld [vmem:[#allocation7 + $0xcc] ss:$16 sps:$4 sm:$0xff]  }
 0x373   :  { %6764 = vst [vmem:[#allocation40_spill] sm:$0xff] %v5294_v1 }
 0x374   :  { %1680 = vmatpush1.bf16.msra.mxu0 %v6736_v42  ;;  %1721 = vmatpush1.bf16.msra.mxu1 %v6737_v43  ;;  %v5299_v42 = vld [vmem:[#allocation7 + $0xc0] ss:$16 sps:$4 sm:$0xff]   ;;  %v5302_v43 = vld [vmem:[#allocation7 + $0xc8] ss:$16 sps:$4 sm:$0xff]  }
 0x375   :  { %1681 = vmatprep.subr.bf16.mxu0 %v6738_v10  ;;  %1722 = vmatprep.subr.bf16.mxu1 %v6739_v26  ;;  %6765 = vst [vmem:[#allocation41_spill] sm:$0xff] %v5299_v42  ;;  %6766 = vst [vmem:[#allocation45_spill] sm:$0xff] %v5302_v43  ;;  %v5305_v10 = vld [vmem:[#allocation7 + $0xa4] ss:$16 sps:$4 sm:$0xff]   ;;  %v5308_v26 = vld [vmem:[#allocation7 + $0xac] ss:$16 sps:$4 sm:$0xff]  }
 0x376   :  { %6767 = vst [vmem:[#allocation47_spill] sm:$0xff] %v5305_v10  ;;  %6768 = vst [vmem:[#allocation48_spill] sm:$0xff] %v5308_v26 }
 0x378   :  { %1682 = vmatpush1.bf16.msra.mxu0 %v6740_v44  ;;  %1723 = vmatpush1.bf16.msra.mxu1 %v6741_v45  ;;  %v5311_v44 = vld [vmem:[#allocation7 + $0xa0] ss:$16 sps:$4 sm:$0xff]   ;;  %v5314_v45 = vld [vmem:[#allocation7 + $0xa8] ss:$16 sps:$4 sm:$0xff]  }
 0x379   :  { %1683 = vmatprep.subr.bf16.mxu0 %v6698_v20  ;;  %1724 = vmatprep.subr.bf16.mxu1 %v6742_v29  ;;  %6769 = vst [vmem:[#allocation59_spill] sm:$0xff] %v5311_v44  ;;  %6770 = vst [vmem:[#allocation64_spill] sm:$0xff] %v5314_v45  ;;  %v5317_v29 = vld [vmem:[#allocation7 + $0x84] ss:$16 sps:$4 sm:$0xff]  }
 0x37a   :  { %6771 = vst [vmem:[#allocation65_spill] sm:$0xff] %v5317_v29 }
 0x37c   :  { %1684 = vmatpush1.bf16.msra.mxu0 %v6743_v16  ;;  %1725 = vmatpush1.bf16.msra.mxu1 %v6744_v4  ;;  %v5320_v16 = vld [vmem:[#allocation7 + $0x8c] ss:$16 sps:$4 sm:$0xff]   ;;  %v5323_v4 = vld [vmem:[#allocation7 + $0x80] ss:$16 sps:$4 sm:$0xff]  }
 0x37d   :  { %1685 = vmatprep.subr.bf16.mxu0 %v6745_v52  ;;  %1726 = vmatprep.subr.bf16.mxu1 %v6703_v30  ;;  %v6750_v30 = vld [vmem:[#allocation20_spill] sm:$0xff]  ;;  %6772 = vst [vmem:[#allocation66_spill] sm:$0xff] %v5320_v16  ;;  %6773 = vst [vmem:[#allocation31_spill] sm:$0xff] %v5323_v4 }
 0x37e   :  { %v4035_v53 = vpop.eup %4034  ;;  %v5329_v52 = vld [vmem:[#allocation7 + $0x64] ss:$16 sps:$4 sm:$0xff]  }
 0x37f   :  { %v1583_v54 = vmul.f32 %v4035_v53, %v4033_v51  ;;  %v5326_v51 = vld [vmem:[#allocation7 + $0x88] ss:$16 sps:$4 sm:$0xff]   ;;  %6775 = vst [vmem:[#allocation32_spill] sm:$0xff] %v5329_v52  ;;  %v5332_v53 = vld [vmem:[#allocation7 + $0x6c] ss:$16 sps:$4 sm:$0xff]  }
 0x380   :  { %1686 = vmatpush1.bf16.msra.mxu0 %v6704_v2  ;;  %1727 = vmatpush1.bf16.msra.mxu1 %v6705_v24  ;;  %v6751_v2 = vld [vmem:[#allocation17_spill] sm:$0xff]  ;;  %v6752_v24 = vld [vmem:[#allocation23_spill] sm:$0xff]  ;;  %6774 = vst [vmem:[#allocation26_spill] sm:$0xff] %v5326_v51  ;;  %6776 = vst [vmem:[#allocation29_spill] sm:$0xff] %v5332_v53 }
 0x381   :  { %1781 = vmatprep.subr.bf16.mxu0 %v6746_v56  ;;  %1822 = vmatprep.subr.bf16.mxu1 %v5066_v31  ;;  %v1584_v20 = vpack.c.bf16 %v1583_v54, %v1583_v54  ;;  %v5335_v54 = vld [vmem:[#allocation7 + $0x60] ss:$16 sps:$4 sm:$0xff]  }
 0x382   :  { %6777 = vst [vmem:[#allocation33_spill] sm:$0xff] %v5335_v54 }
 0x383   :  { %v1669_v57 = vrot.slane %v1584_v20, 2  ;;  %v5338_v20 = vld [vmem:[#allocation7 + $0x68] ss:$16 sps:$4 sm:$0xff]  }
 0x384   :  { %6778 = vst [vmem:[#allocation30_spill] sm:$0xff] %v5338_v20 }
 0x385   :  { %1704 = vmatmul.mubr.bf16.vlgmr.msra.gmra.mxu0 %v1669_v57  ;;  %1745 = vmatmul.mubr.bf16.vlgmr.msra.gmra.mxu1 %v1669_v57 }
 0x386   :  { %1782 = vmatpush1.bf16.msra.mxu0 %v6747_v58  ;;  %1823 = vmatpush1.bf16.msra.mxu1 %v6748_v59 }
 0x387   :  { %1783 = vmatprep.subr.bf16.mxu0 %v6749_v12  ;;  %1824 = vmatprep.subr.bf16.mxu1 %v6750_v30 }
 0x388   :  { %1813 = vmatprep.mubr.bf16.mxu0 %v6608_v22  ;;  %1854 = vmatprep.mubr.bf16.mxu1 %v6608_v22 }
 0x38a   :  { %1784 = vmatpush1.bf16.msra.mxu0 %v6751_v2  ;;  %1825 = vmatpush1.bf16.msra.mxu1 %v6752_v24 }
 0x38b   :  { %1785 = vmatprep.subr.bf16.mxu0 %v6753_v61  ;;  %1826 = vmatprep.subr.bf16.mxu1 %v6754_v5 }
 0x38e   :  { %1786 = vmatpush1.bf16.msra.mxu0 %v5095_v8  ;;  %1827 = vmatpush1.bf16.msra.mxu1 %v6755_v32 }
 0x38f   :  { %1787 = vmatprep.subr.bf16.mxu0 %v6756_v63  ;;  %1828 = vmatprep.subr.bf16.mxu1 %v5104_v28 }
 0x392   :  { %1788 = vmatpush1.bf16.msra.mxu0 %v6757_v33  ;;  %1829 = vmatpush1.bf16.msra.mxu1 %v5244_v60 }
 0x393   :  { %1789 = vmatprep.subr.bf16.mxu0 %v5111_v15  ;;  %1830 = vmatprep.subr.bf16.mxu1 %v5248_v35 }
 0x396   :  { %1790 = vmatpush1.bf16.msra.mxu0 %v5115_v27  ;;  %1831 = vmatpush1.bf16.msra.mxu1 %v5252_v62 }
 0x397   :  { %1791 = vmatprep.subr.bf16.mxu0 %v5119_v25  ;;  %1832 = vmatprep.subr.bf16.mxu1 %v5256_v18 }
 0x39a   :  { %1792 = vmatpush1.bf16.msra.mxu0 %v5123_v11  ;;  %1833 = vmatpush1.bf16.msra.mxu1 %v5260_v36 }
 0x39b   :  { %1793 = vmatprep.subr.bf16.mxu0 %v5127_v46  ;;  %1834 = vmatprep.subr.bf16.mxu1 %v5264_v34 }
 0x39e   :  { %1794 = vmatpush1.bf16.msra.mxu0 %v5131_v47  ;;  %1835 = vmatpush1.bf16.msra.mxu1 %v5268_v14 }
 0x39f   :  { %1795 = vmatprep.subr.bf16.mxu0 %v5135_v48  ;;  %1836 = vmatprep.subr.bf16.mxu1 %v5272_v37 }
 0x3a2   :  { %1796 = vmatpush1.bf16.msra.mxu0 %v5139_v49  ;;  %1837 = vmatpush1.bf16.msra.mxu1 %v5276_v17 }
 0x3a3   :  { %1908 = vmatprep.subr.bf16.mxu0 %v5279_v38  ;;  %1949 = vmatprep.subr.bf16.mxu1 %v5282_v39 }
 0x3a5   :  { %1814 = vmatmul.mubr.bf16.vlgmr.msra.gmra.mxu0 %v1669_v57  ;;  %1855 = vmatmul.mubr.bf16.vlgmr.msra.gmra.mxu1 %v1669_v57  ;;  %v5341_v57 = vld [vmem:[#allocation7 + $0x44] ss:$16 sps:$4 sm:$0xff]  }
 0x3a6   :  { %1909 = vmatpush1.bf16.msra.mxu0 %v5285_v40  ;;  %1950 = vmatpush1.bf16.msra.mxu1 %v5288_v41  ;;  %6779 = vst [vmem:[#allocation34_spill] sm:$0xff] %v5341_v57 }
 0x3a7   :  { %1910 = vmatprep.subr.bf16.mxu0 %v5291_v0  ;;  %1951 = vmatprep.subr.bf16.mxu1 %v5294_v1 }
 0x3a8   :  { %1940 = vmatprep.mubr.bf16.mxu0 %v6608_v22  ;;  %1981 = vmatprep.mubr.bf16.mxu1 %v6608_v22 }
 0x3aa   :  { %1911 = vmatpush1.bf16.msra.mxu0 %v5299_v42  ;;  %1952 = vmatpush1.bf16.msra.mxu1 %v5302_v43 }
 0x3ab   :  { %1912 = vmatprep.subr.bf16.mxu0 %v5305_v10  ;;  %1953 = vmatprep.subr.bf16.mxu1 %v5308_v26 }
 0x3ae   :  { %1913 = vmatpush1.bf16.msra.mxu0 %v5311_v44  ;;  %1954 = vmatpush1.bf16.msra.mxu1 %v5314_v45 }
 0x3af   :  { %1914 = vmatprep.subr.bf16.mxu0 %v5317_v29  ;;  %1955 = vmatprep.subr.bf16.mxu1 %v5320_v16 }
 0x3b2   :  { %1915 = vmatpush1.bf16.msra.mxu0 %v5323_v4  ;;  %1956 = vmatpush1.bf16.msra.mxu1 %v5326_v51  ;;  %v5344_v51 = vld [vmem:[#allocation7 + $0x4c] ss:$16 sps:$4 sm:$0xff]  }
 0x3b3   :  { %1916 = vmatprep.subr.bf16.mxu0 %v5329_v52  ;;  %1957 = vmatprep.subr.bf16.mxu1 %v5332_v53  ;;  %6780 = vst [vmem:[#allocation35_spill] sm:$0xff] %v5344_v51  ;;  %v5347_v52 = vld [vmem:[#allocation7 + $0x40] ss:$16 sps:$4 sm:$0xff]   ;;  %v5350_v53 = vld [vmem:[#allocation7 + $0x48] ss:$16 sps:$4 sm:$0xff]  }
 0x3b4   :  { %6781 = vst [vmem:[#allocation36_spill] sm:$0xff] %v5347_v52  ;;  %6782 = vst [vmem:[#allocation13_spill] sm:$0xff] %v5350_v53 }
 0x3b6   :  { %1917 = vmatpush1.bf16.msra.mxu0 %v5335_v54  ;;  %1958 = vmatpush1.bf16.msra.mxu1 %v5338_v20  ;;  %v5353_v54 = vld [vmem:[#allocation7 + $0x24] ss:$16 sps:$4 sm:$0xff]   ;;  %v5356_v20 = vld [vmem:[#allocation7 + $0x2c] ss:$16 sps:$4 sm:$0xff]  }
 0x3b7   :  { %1918 = vmatprep.subr.bf16.mxu0 %v5341_v57  ;;  %1959 = vmatprep.subr.bf16.mxu1 %v5344_v51  ;;  %6783 = vst [vmem:[#allocation42_spill] sm:$0xff] %v5353_v54  ;;  %6784 = vst [vmem:[#allocation43_spill] sm:$0xff] %v5356_v20  ;;  %v5359_v57 = vld [vmem:[#allocation7 + $0x20] ss:$16 sps:$4 sm:$0xff]   ;;  %v5362_v51 = vld [vmem:[#allocation7 + $0x28] ss:$16 sps:$4 sm:$0xff]  }
 0x3b8   :  { %6785 = vst [vmem:[#allocation44_spill] sm:$0xff] %v5359_v57  ;;  %6786 = vst [vmem:[#allocation46_spill] sm:$0xff] %v5362_v51 }
 0x3ba   :  { %1919 = vmatpush1.bf16.msra.mxu0 %v5347_v52  ;;  %1960 = vmatpush1.bf16.msra.mxu1 %v5350_v53  ;;  %v5365_v52 = vld [vmem:[#allocation7 + $0x4] ss:$16 sps:$4 sm:$0xff]   ;;  %v5368_v53 = vld [vmem:[#allocation7 + $0xc] ss:$16 sps:$4 sm:$0xff]  }
 0x3bb   :  { %1920 = vmatprep.subr.bf16.mxu0 %v5353_v54  ;;  %1961 = vmatprep.subr.bf16.mxu1 %v5356_v20  ;;  %6787 = vst [vmem:[#allocation49_spill] sm:$0xff] %v5365_v52  ;;  %6788 = vst [vmem:[#allocation50_spill] sm:$0xff] %v5368_v53  ;;  %v5371_v54 = vld [vmem:[#allocation7] ss:$16 sps:$4 sm:$0xff]   ;;  %v5374_v20 = vld [vmem:[#allocation7 + $0x8] ss:$16 sps:$4 sm:$0xff]  }
 0x3bc   :  { %6789 = vst [vmem:[#allocation51_spill] sm:$0xff] %v5371_v54  ;;  %6790 = vst [vmem:[#allocation52_spill] sm:$0xff] %v5374_v20 }
 0x3be   :  { %1921 = vmatpush1.bf16.msra.mxu0 %v5359_v57  ;;  %1962 = vmatpush1.bf16.msra.mxu1 %v5362_v51  ;;  %v5377_v57 = vld [vmem:[#allocation5 + $0xe4] ss:$16 sps:$4 sm:$0xff]   ;;  %v5380_v51 = vld [vmem:[#allocation5 + $0xec] ss:$16 sps:$4 sm:$0xff]  }
 0x3bf   :  { %1922 = vmatprep.subr.bf16.mxu0 %v5365_v52  ;;  %1963 = vmatprep.subr.bf16.mxu1 %v5368_v53  ;;  %6791 = vst [vmem:[#allocation53_spill] sm:$0xff] %v5377_v57  ;;  %6792 = vst [vmem:[#allocation54_spill] sm:$0xff] %v5380_v51 }
 0x3c2   :  { %1923 = vmatpush1.bf16.msra.mxu0 %v5371_v54  ;;  %1964 = vmatpush1.bf16.msra.mxu1 %v5374_v20 }
 0x3c3   :  { %1993 = vmatprep.subr.bf16.mxu0 %v5377_v57  ;;  %2034 = vmatprep.subr.bf16.mxu1 %v5380_v51 }
 0x423   :  { %v1620_v52 = vpop.f32.mrf.mxu0  ;;  %v1661_v4 = vpop.f32.mrf.mxu1 }
 0x425   :  { %v1622_v16 = vpop.f32.mrf.mxu0  ;;  %v1663_v53 = vpop.f32.mrf.mxu1 }
 0x427   :  { %v1624_v29 = vpop.f32.mrf.mxu0  ;;  %v1665_v45 = vpop.f32.mrf.mxu1 }
 0x429   :  { %v1625_v44 = vpop.f32.mrf.mxu0  ;;  %v1666_v54 = vpop.f32.mrf.mxu1 }
 0x445   :  { %v1705_v26 = vpop.f32.mrf.mxu0  ;;  %v1746_v10 = vpop.f32.mrf.mxu1 }
 0x446   :  { %v1706_v43 = vadd.f32 %v1705_v26, %v1620_v52  ;;  %v1747_v44 = vadd.f32 %v1746_v10, %v1661_v4 }
 0x447   :  { %v1707_v20 = vpop.f32.mrf.mxu0  ;;  %v1748_v42 = vpop.f32.mrf.mxu1 }
 0x448   :  { %v1753_v1 = vadd.f32 %v1706_v43, %v5002_v3  ;;  %v1708_v57 = vadd.f32 %v1707_v20, %v1622_v16  ;;  %v1755_v45 = vadd.f32 %v1747_v44, %v5012_v13  ;;  %v1749_v54 = vadd.f32 %v1748_v42, %v1663_v53 }
 0x449   :  { %v1709_v0 = vpop.f32.mrf.mxu0  ;;  %v1750_v41 = vpop.f32.mrf.mxu1 }
 0x44a   :  { %v3696_v40 = vmul.f32 -1.442695, %v1753_v1  ;;  %v1754_v51 = vadd.f32 %v1708_v57, %v5006_v19  ;;  %v3698_v26 = vmul.f32 -1.442695, %v1755_v45  ;;  %v1756_v17 = vadd.f32 %v1749_v54, %v6727_v55 }
 0x44b   :  { %v1710_v39 = vpop.f32.mrf.mxu0  ;;  %v1751_v38 = vpop.f32.mrf.mxu1 }
 0x44c   :  { %4036 = vpow2.f32 %v3696_v40  ;;  %v3697_v29 = vmul.f32 -1.442695, %v1754_v51 }
 0x44e   :  { %4038 = vpow2.f32 %v3697_v29 }
 0x44f   :  { %4040 = vpow2.f32 %v3698_v26 }
 0x459   :  { %v4037_v52 = vpop.eup %4036 }
 0x45a   :  { %v1766_v43 = vadd.f32 1.0, %v4037_v52 }
 0x45b   :  { %v4039_v16 = vpop.eup %4038 }
 0x45c   :  { %4042 = vrcp.f32 %v1766_v43  ;;  %v1767_v41 = vadd.f32 1.0, %v4039_v16  ;;  %v4041_v10 = vpop.eup %4040 }
 0x45d   :  { %4044 = vtanh.f32 %v1756_v17  ;;  %v1768_v54 = vadd.f32 1.0, %v4041_v10 }
 0x45e   :  { %4046 = vrcp.f32 %v1767_v41 }
 0x465   :  { %v1815_v39 = vpop.f32.mrf.mxu0  ;;  %v1856_v38 = vpop.f32.mrf.mxu1 }
 0x466   :  { %v1867_v40 = vrot.slane %v1815_v39, 2 }
 0x467   :  { %v1817_v0 = vpop.f32.mrf.mxu0  ;;  %v1858_v1 = vpop.f32.mrf.mxu1 }
 0x468   :  { %v1875_v4 = vadd.f32 %v1867_v40, %v4914_v7  ;;  %v1868_v42 = vrot.slane %v1817_v0, 2  ;;  %v1869_v7 = vrot.slane %v1856_v38, 2  ;;  %v1870_v40 = vrot.slane %v1858_v1, 2  ;;  %v5404_v1 = vld [vmem:[#allocation5 + $0xcc] ss:$16 sps:$4 sm:$0xff]  }
 0x469   :  { %v4043_v51 = vpop.eup %4042  ;;  %v1819_v53 = vpop.f32.mrf.mxu0 }
 0x46a   :  { %v1860_v20 = vpop.f32.mrf.mxu1  ;;  %v4045_v57 = vpop.eup %4044  ;;  %v3699_v29 = vmul.f32 -1.442695, %v1875_v4  ;;  %v1876_v44 = vadd.f32 %v1868_v42, %v4916_v21  ;;  %v1877_v39 = vadd.f32 %v1869_v7, %v4920_v9  ;;  %v1878_v10 = vadd.f32 %v1870_v40, %v4922_v23  ;;  %v5398_v9 = vld [vmem:[#allocation5 + $0xe8] ss:$16 sps:$4 sm:$0xff]   ;;  %v5401_v23 = vld [vmem:[#allocation5 + $0xc4] ss:$16 sps:$4 sm:$0xff]  }
 0x46b   :  { %v4047_v45 = vpop.eup %4046  ;;  %v1820_v17 = vpop.f32.mrf.mxu0  ;;  %v1777_v43 = vmul.f32 %v4045_v57, %v4043_v51  ;;  %v5395_v57 = vld [vmem:[#allocation5 + $0xe0] ss:$16 sps:$4 sm:$0xff]   ;;  %v5425_v40 = vld [vmem:[#allocation5 + $0xa8] ss:$16 sps:$4 sm:$0xff]  }
 0x46c   :  { %v1861_v26 = vpop.f32.mrf.mxu1  ;;  %v1776_v52 = vmul.f32 %v4047_v45, %v5186_v50  ;;  %4048 = vpow2.f32 %v3699_v29  ;;  %v3700_v16 = vmul.f32 -1.442695, %v1876_v44  ;;  %v3701_v21 = vmul.f32 -1.442695, %v1877_v39  ;;  %v5409_v29 = vld [vmem:[#allocation5 + $0xc0] ss:$16 sps:$4 sm:$0xff]  }
 0x46d   :  { %v5412_v44 = vld [vmem:[#allocation5 + $0xc8] ss:$16 sps:$4 sm:$0xff]   ;;  %v5418_v17 = vld [vmem:[#allocation5 + $0xac] ss:$16 sps:$4 sm:$0xff]   ;;  %v5422_v39 = vld [vmem:[#allocation5 + $0xa0] ss:$16 sps:$4 sm:$0xff]  }
 0x46e   :  { %v5390_v41 = vadd.f32 %v1777_v43, %v1776_v52  ;;  %4050 = vpow2.f32 %v3700_v16  ;;  %v1899_v43 = vrot.slane %v5206_v6, 6 }
 0x46f   :  { %4052 = vrcp.f32 %v1768_v54  ;;  %v5415_v54 = vld [vmem:[#allocation5 + $0xa4] ss:$16 sps:$4 sm:$0xff]  }
 0x470   :  { %4054 = vtanh.f32 %v5390_v41 }
 0x471   :  { %4056 = vpow2.f32 %v3701_v21 }
 0x479   :  { %v4049_v0 = vpop.eup %4048 }
 0x47a   :  { %v1888_v4 = vadd.f32 1.0, %v4049_v0 }
 0x47b   :  { %v4051_v42 = vpop.eup %4050 }
 0x47c   :  { %v4053_v50 = vpop.eup %4052  ;;  %4058 = vrcp.f32 %v1888_v4  ;;  %v1889_v51 = vadd.f32 1.0, %v4051_v42  ;;  %v5431_v4 = vld [vmem:[#allocation5 + $0x8c] ss:$16 sps:$4 sm:$0xff]   ;;  %v5436_v42 = vld [vmem:[#allocation5 + $0x80] ss:$16 sps:$4 sm:$0xff]  }
 0x47d   :  { %v4055_v53 = vpop.eup %4054  ;;  %4060 = vtanh.f32 %v1878_v10  ;;  %v5428_v10 = vld [vmem:[#allocation5 + $0x84] ss:$16 sps:$4 sm:$0xff]  }
 0x47e   :  { %4062 = vrcp.f32 %v1889_v51  ;;  %v1780_v20 = vmul.f32 %v4055_v53, %v4053_v50  ;;  %v4057_v45 = vpop.eup %4056  ;;  %v5439_v50 = vld [vmem:[#allocation5 + $0x88] ss:$16 sps:$4 sm:$0xff]   ;;  %v5443_v51 = vld [vmem:[#allocation5 + $0x64] ss:$16 sps:$4 sm:$0xff]   ;;  %v5446_v53 = vld [vmem:[#allocation5 + $0x6c] ss:$16 sps:$4 sm:$0xff]  }
 0x47f   :  { %v1890_v7 = vadd.f32 1.0, %v4057_v45  ;;  %v5455_v45 = vld [vmem:[#allocation5 + $0x44] ss:$16 sps:$4 sm:$0xff]  }
 0x480   :  { %v1907_v38 = vpack.c.bf16 %v1780_v20, %v1780_v20  ;;  %v5449_v20 = vld [vmem:[#allocation5 + $0x60] ss:$16 sps:$4 sm:$0xff]   ;;  %6793 = vst [vmem:[#allocation55_spill] sm:$0xff] %v5455_v45 }
 0x481   :  { %4064 = vrcp.f32 %v1890_v7  ;;  %v5470_v7 = vld [vmem:[#allocation5 + $0x2c] ss:$16 sps:$4 sm:$0xff]  }
 0x482   :  { %1941 = vmatmul.mubr.bf16.vlgmr.msra.gmra.mxu0 %v1907_v38  ;;  %1982 = vmatmul.mubr.bf16.vlgmr.msra.gmra.mxu1 %v1907_v38  ;;  %v5452_v38 = vld [vmem:[#allocation5 + $0x68] ss:$16 sps:$4 sm:$0xff]   ;;  %6798 = vst [vmem:[#allocation61_spill] sm:$0xff] %v5470_v7 }
 0x483   :  { %1994 = vmatpush1.bf16.msra.mxu0 %v5395_v57  ;;  %2035 = vmatpush1.bf16.msra.mxu1 %v5398_v9 }
 0x484   :  { %1995 = vmatprep.subr.bf16.mxu0 %v5401_v23  ;;  %2036 = vmatprep.subr.bf16.mxu1 %v5404_v1 }
 0x485   :  { %2025 = vmatprep.mubr.bf16.mxu0 %v6608_v22  ;;  %2066 = vmatprep.mubr.bf16.mxu1 %v6608_v22 }
 0x487   :  { %1996 = vmatpush1.bf16.msra.mxu0 %v5409_v29  ;;  %2037 = vmatpush1.bf16.msra.mxu1 %v5412_v44 }
 0x488   :  { %1997 = vmatprep.subr.bf16.mxu0 %v5415_v54  ;;  %2038 = vmatprep.subr.bf16.mxu1 %v5418_v17 }
 0x489   :  { %v4059_v26 = vpop.eup %4058 }
 0x48a   :  { %v4061_v52 = vpop.eup %4060 }
 0x48b   :  { %v4063_v16 = vpop.eup %4062  ;;  %1998 = vmatpush1.bf16.msra.mxu0 %v5422_v39  ;;  %2039 = vmatpush1.bf16.msra.mxu1 %v5425_v40  ;;  %v1902_v0 = vmul.f32 %v4061_v52, %v4059_v26  ;;  %v5458_v26 = vld [vmem:[#allocation5 + $0x4c] ss:$16 sps:$4 sm:$0xff]   ;;  %v5461_v52 = vld [vmem:[#allocation5 + $0x40] ss:$16 sps:$4 sm:$0xff]  }
 0x48c   :  { %v1901_v21 = vmul.f32 %v4063_v16, %v1899_v43  ;;  %1999 = vmatprep.subr.bf16.mxu0 %v5428_v10  ;;  %2040 = vmatprep.subr.bf16.mxu1 %v5431_v4  ;;  %6794 = vst [vmem:[#allocation56_spill] sm:$0xff] %v5458_v26  ;;  %6795 = vst [vmem:[#allocation57_spill] sm:$0xff] %v5461_v52  ;;  %v5464_v43 = vld [vmem:[#allocation5 + $0x48] ss:$16 sps:$4 sm:$0xff]   ;;  %v5467_v16 = vld [vmem:[#allocation5 + $0x24] ss:$16 sps:$4 sm:$0xff]  }
 0x48d   :  { %6796 = vst [vmem:[#allocation58_spill] sm:$0xff] %v5464_v43  ;;  %6797 = vst [vmem:[#allocation60_spill] sm:$0xff] %v5467_v16 }
 0x48e   :  { %v5434_v6 = vadd.f32 %v1902_v0, %v1901_v21  ;;  %v5473_v21 = vld [vmem:[#allocation5 + $0x20] ss:$16 sps:$4 sm:$0xff]   ;;  %v5476_v0 = vld [vmem:[#allocation5 + $0x28] ss:$16 sps:$4 sm:$0xff]  }
 0x48f   :  { %2000 = vmatpush1.bf16.msra.mxu0 %v5436_v42  ;;  %2041 = vmatpush1.bf16.msra.mxu1 %v5439_v50  ;;  %6799 = vst [vmem:[#allocation62_spill] sm:$0xff] %v5473_v21  ;;  %6800 = vst [vmem:[#allocation63_spill] sm:$0xff] %v5476_v0 }
 0x490   :  { %4066 = vtanh.f32 %v5434_v6  ;;  %2001 = vmatprep.subr.bf16.mxu0 %v5443_v51  ;;  %2042 = vmatprep.subr.bf16.mxu1 %v5446_v53 }
 0x493   :  { %2002 = vmatpush1.bf16.msra.mxu0 %v5449_v20  ;;  %2043 = vmatpush1.bf16.msra.mxu1 %v5452_v38 }
 0x494   :  { %2003 = vmatprep.subr.bf16.mxu0 %v5455_v45  ;;  %2044 = vmatprep.subr.bf16.mxu1 %v5458_v26  ;;  %v5479_v26 = vld [vmem:[#allocation5 + $0x4] ss:$16 sps:$4 sm:$0xff]  }
 0x495   :  { %6801 = vst [vmem:[#allocation16_spill] sm:$0xff] %v5479_v26 }
 0x497   :  { %2004 = vmatpush1.bf16.msra.mxu0 %v5461_v52  ;;  %2045 = vmatpush1.bf16.msra.mxu1 %v5464_v43  ;;  %v4065_v52 = vpop.eup %4064  ;;  %v5482_v43 = vld [vmem:[#allocation5 + $0xc] ss:$16 sps:$4 sm:$0xff]  }
 0x498   :  { %2005 = vmatprep.subr.bf16.mxu0 %v5467_v16  ;;  %2046 = vmatprep.subr.bf16.mxu1 %v5470_v7  ;;  %v5485_v7 = vld [vmem:[#allocation5] ss:$16 sps:$4 sm:$0xff]  }
 0x49b   :  { %2006 = vmatpush1.bf16.msra.mxu0 %v5473_v21  ;;  %2047 = vmatpush1.bf16.msra.mxu1 %v5476_v0  ;;  %v5488_v21 = vld [vmem:[#allocation5 + $0x8] ss:$16 sps:$4 sm:$0xff]  }
 0x49c   :  { %2007 = vmatprep.subr.bf16.mxu0 %v5479_v26  ;;  %2048 = vmatprep.subr.bf16.mxu1 %v5482_v43 }
 0x49d   :  { %v4067_v16 = vpop.eup %4066 }
 0x49e   :  { %v1905_v45 = vmul.f32 %v4067_v16, %v4065_v52  ;;  %v6827_v52 = vld [vmem:[#allocation42_spill] sm:$0xff]  ;;  %v6828_v16 = vld [vmem:[#allocation43_spill] sm:$0xff] }
 0x49f   :  { %2008 = vmatpush1.bf16.msra.mxu0 %v5485_v7  ;;  %2049 = vmatpush1.bf16.msra.mxu1 %v5488_v21 }
 0x4a0   :  { %2103 = vmatprep.subr.bf16.mxu0 %v6746_v56  ;;  %2144 = vmatprep.subr.bf16.mxu1 %v5066_v31  ;;  %v1906_v0 = vpack.c.bf16 %v1905_v45, %v1905_v45  ;;  %v6804_v31 = vld [vmem:[#allocation12_spill] sm:$0xff]  ;;  %v6813_v56 = vld [vmem:[#allocation59_spill] sm:$0xff] }
 0x4a1   :  { %v6825_v45 = vld [vmem:[#allocation36_spill] sm:$0xff] }
 0x4a2   :  { %v1991_v26 = vrot.slane %v1906_v0, 3  ;;  %v6829_v0 = vld [vmem:[#allocation44_spill] sm:$0xff] }
 0x4a4   :  { %2026 = vmatmul.mubr.bf16.vlgmr.msra.gmra.mxu0 %v1991_v26  ;;  %2067 = vmatmul.mubr.bf16.vlgmr.msra.gmra.mxu1 %v1991_v26 }
 0x4a5   :  { %2104 = vmatpush1.bf16.msra.mxu0 %v6747_v58  ;;  %2145 = vmatpush1.bf16.msra.mxu1 %v6748_v59  ;;  %v6814_v58 = vld [vmem:[#allocation64_spill] sm:$0xff]  ;;  %v6815_v59 = vld [vmem:[#allocation65_spill] sm:$0xff] }
 0x4a6   :  { %2105 = vmatprep.subr.bf16.mxu0 %v6749_v12  ;;  %2146 = vmatprep.subr.bf16.mxu1 %v6750_v30  ;;  %v6816_v12 = vld [vmem:[#allocation66_spill] sm:$0xff]  ;;  %v6817_v30 = vld [vmem:[#allocation31_spill] sm:$0xff] }
 0x4a7   :  { %2135 = vmatprep.mubr.bf16.mxu0 %v6608_v22  ;;  %2176 = vmatprep.mubr.bf16.mxu1 %v6608_v22 }
 0x4a9   :  { %2106 = vmatpush1.bf16.msra.mxu0 %v6751_v2  ;;  %2147 = vmatpush1.bf16.msra.mxu1 %v6752_v24  ;;  %v6818_v2 = vld [vmem:[#allocation26_spill] sm:$0xff]  ;;  %v6819_v24 = vld [vmem:[#allocation32_spill] sm:$0xff] }
 0x4aa   :  { %2107 = vmatprep.subr.bf16.mxu0 %v6753_v61  ;;  %2148 = vmatprep.subr.bf16.mxu1 %v6754_v5  ;;  %v6820_v61 = vld [vmem:[#allocation29_spill] sm:$0xff] }
 0x4ab   :  { %v6821_v5 = vld [vmem:[#allocation33_spill] sm:$0xff] }
 0x4ad   :  { %2108 = vmatpush1.bf16.msra.mxu0 %v5095_v8  ;;  %2149 = vmatpush1.bf16.msra.mxu1 %v6755_v32  ;;  %v6803_v8 = vld [vmem:[#allocation25_spill] sm:$0xff]  ;;  %v6822_v32 = vld [vmem:[#allocation30_spill] sm:$0xff] }
 0x4ae   :  { %2109 = vmatprep.subr.bf16.mxu0 %v6756_v63  ;;  %2150 = vmatprep.subr.bf16.mxu1 %v5104_v28  ;;  %v6808_v28 = vld [vmem:[#allocation40_spill] sm:$0xff]  ;;  %v6823_v63 = vld [vmem:[#allocation34_spill] sm:$0xff] }
 0x4b1   :  { %2110 = vmatpush1.bf16.msra.mxu0 %v6757_v33  ;;  %2151 = vmatpush1.bf16.msra.mxu1 %v5244_v60  ;;  %v6824_v33 = vld [vmem:[#allocation35_spill] sm:$0xff] }
 0x4b2   :  { %2111 = vmatprep.subr.bf16.mxu0 %v5111_v15  ;;  %2152 = vmatprep.subr.bf16.mxu1 %v5248_v35  ;;  %v6806_v15 = vld [vmem:[#allocation38_spill] sm:$0xff] }
 0x4b5   :  { %2112 = vmatpush1.bf16.msra.mxu0 %v5115_v27  ;;  %2153 = vmatpush1.bf16.msra.mxu1 %v5252_v62  ;;  %v6802_v27 = vld [vmem:[#allocation28_spill] sm:$0xff] }
 0x4b6   :  { %2113 = vmatprep.subr.bf16.mxu0 %v5119_v25  ;;  %2154 = vmatprep.subr.bf16.mxu1 %v5256_v18  ;;  %v6807_v25 = vld [vmem:[#allocation39_spill] sm:$0xff] }
 0x4b9   :  { %2114 = vmatpush1.bf16.msra.mxu0 %v5123_v11  ;;  %2155 = vmatpush1.bf16.msra.mxu1 %v5260_v36  ;;  %v6805_v11 = vld [vmem:[#allocation37_spill] sm:$0xff] }
 0x4ba   :  { %2115 = vmatprep.subr.bf16.mxu0 %v5127_v46  ;;  %2156 = vmatprep.subr.bf16.mxu1 %v5264_v34  ;;  %v6809_v46 = vld [vmem:[#allocation41_spill] sm:$0xff] }
 0x4bd   :  { %2116 = vmatpush1.bf16.msra.mxu0 %v5131_v47  ;;  %2157 = vmatpush1.bf16.msra.mxu1 %v5268_v14  ;;  %v6810_v47 = vld [vmem:[#allocation45_spill] sm:$0xff] }
 0x4be   :  { %2117 = vmatprep.subr.bf16.mxu0 %v5135_v48  ;;  %2158 = vmatprep.subr.bf16.mxu1 %v5272_v37  ;;  %v6811_v48 = vld [vmem:[#allocation47_spill] sm:$0xff] }
 0x4c1   :  { %2118 = vmatpush1.bf16.msra.mxu0 %v5139_v49  ;;  %2159 = vmatpush1.bf16.msra.mxu1 %v6802_v27  ;;  %v6812_v49 = vld [vmem:[#allocation48_spill] sm:$0xff] }
 0x4c2   :  { %2218 = vmatprep.subr.bf16.mxu0 %v6803_v8  ;;  %2259 = vmatprep.subr.bf16.mxu1 %v6804_v31 }
 0x4c4   :  { %2136 = vmatmul.mubr.bf16.vlgmr.msra.gmra.mxu0 %v1991_v26  ;;  %2177 = vmatmul.mubr.bf16.vlgmr.msra.gmra.mxu1 %v1991_v26  ;;  %v6826_v26 = vld [vmem:[#allocation13_spill] sm:$0xff] }
 0x4c5   :  { %2219 = vmatpush1.bf16.msra.mxu0 %v6805_v11  ;;  %2260 = vmatpush1.bf16.msra.mxu1 %v6806_v15 }
 0x4c6   :  { %2220 = vmatprep.subr.bf16.mxu0 %v6807_v25  ;;  %2261 = vmatprep.subr.bf16.mxu1 %v6808_v28 }
 0x4c7   :  { %2250 = vmatprep.mubr.bf16.mxu0 %v6608_v22  ;;  %2291 = vmatprep.mubr.bf16.mxu1 %v6608_v22 }
 0x4c9   :  { %2221 = vmatpush1.bf16.msra.mxu0 %v6809_v46  ;;  %2262 = vmatpush1.bf16.msra.mxu1 %v6810_v47 }
 0x4ca   :  { %2222 = vmatprep.subr.bf16.mxu0 %v6811_v48  ;;  %2263 = vmatprep.subr.bf16.mxu1 %v6812_v49 }
 0x4cd   :  { %2223 = vmatpush1.bf16.msra.mxu0 %v6813_v56  ;;  %2264 = vmatpush1.bf16.msra.mxu1 %v6814_v58 }
 0x4ce   :  { %2224 = vmatprep.subr.bf16.mxu0 %v6815_v59  ;;  %2265 = vmatprep.subr.bf16.mxu1 %v6816_v12 }
 0x4d1   :  { %2225 = vmatpush1.bf16.msra.mxu0 %v6817_v30  ;;  %2266 = vmatpush1.bf16.msra.mxu1 %v6818_v2 }
 0x4d2   :  { %2226 = vmatprep.subr.bf16.mxu0 %v6819_v24  ;;  %2267 = vmatprep.subr.bf16.mxu1 %v6820_v61  ;;  %v6830_v24 = vld [vmem:[#allocation46_spill] sm:$0xff]  ;;  %v6831_v61 = vld [vmem:[#allocation49_spill] sm:$0xff] }
 0x4d5   :  { %2227 = vmatpush1.bf16.msra.mxu0 %v6821_v5  ;;  %2268 = vmatpush1.bf16.msra.mxu1 %v6822_v32  ;;  %v6832_v5 = vld [vmem:[#allocation50_spill] sm:$0xff]  ;;  %v6833_v32 = vld [vmem:[#allocation51_spill] sm:$0xff] }
 0x4d6   :  { %2228 = vmatprep.subr.bf16.mxu0 %v6823_v63  ;;  %2269 = vmatprep.subr.bf16.mxu1 %v6824_v33  ;;  %v6834_v63 = vld [vmem:[#allocation52_spill] sm:$0xff]  ;;  %v6835_v33 = vld [vmem:[#allocation53_spill] sm:$0xff] }
 0x4d9   :  { %2229 = vmatpush1.bf16.msra.mxu0 %v6825_v45  ;;  %2270 = vmatpush1.bf16.msra.mxu1 %v6826_v26  ;;  %v6836_v45 = vld [vmem:[#allocation54_spill] sm:$0xff] }
 0x4da   :  { %2230 = vmatprep.subr.bf16.mxu0 %v6827_v52  ;;  %2271 = vmatprep.subr.bf16.mxu1 %v6828_v16 }
 0x4dd   :  { %2231 = vmatpush1.bf16.msra.mxu0 %v6829_v0  ;;  %2272 = vmatpush1.bf16.msra.mxu1 %v6830_v24 }
 0x4de   :  { %2232 = vmatprep.subr.bf16.mxu0 %v6831_v61  ;;  %2273 = vmatprep.subr.bf16.mxu1 %v6832_v5 }
 0x4e1   :  { %2233 = vmatpush1.bf16.msra.mxu0 %v6833_v32  ;;  %2274 = vmatpush1.bf16.msra.mxu1 %v6834_v63 }
 0x4e2   :  { %2300 = vmatprep.subr.bf16.mxu0 %v6835_v33  ;;  %2341 = vmatprep.subr.bf16.mxu1 %v6836_v45 }
 0x542   :  { %v1942_v26 = vpop.f32.mrf.mxu0  ;;  %v1983_v52 = vpop.f32.mrf.mxu1 }
 0x544   :  { %v1944_v2 = vpop.f32.mrf.mxu0  ;;  %v1985_v16 = vpop.f32.mrf.mxu1 }
 0x546   :  { %v1946_v30 = vpop.f32.mrf.mxu0  ;;  %v1987_v0 = vpop.f32.mrf.mxu1 }
 0x548   :  { %v1947_v12 = vpop.f32.mrf.mxu0  ;;  %v1988_v24 = vpop.f32.mrf.mxu1 }
 0x564   :  { %v2027_v59 = vpop.f32.mrf.mxu0  ;;  %v2068_v61 = vpop.f32.mrf.mxu1 }
 0x565   :  { %v2028_v58 = vadd.f32 %v2027_v59, %v1942_v26  ;;  %v2069_v12 = vadd.f32 %v2068_v61, %v1983_v52 }
 0x566   :  { %v2029_v5 = vpop.f32.mrf.mxu0  ;;  %v2070_v56 = vpop.f32.mrf.mxu1 }
 0x567   :  { %v2075_v32 = vadd.f32 %v2028_v58, %v5002_v3  ;;  %v2030_v63 = vadd.f32 %v2029_v5, %v1944_v2  ;;  %v2077_v24 = vadd.f32 %v2069_v12, %v5012_v13  ;;  %v2071_v0 = vadd.f32 %v2070_v56, %v1985_v16  ;;  %v6838_v56 = vld [vmem:[#allocation68_spill] sm:$0xff] }
 0x568   :  { %v2031_v49 = vpop.f32.mrf.mxu0  ;;  %v2072_v33 = vpop.f32.mrf.mxu1 }
 0x569   :  { %v3702_v48 = vmul.f32 -1.442695, %v2075_v32  ;;  %v2076_v45 = vadd.f32 %v2030_v63, %v5006_v19  ;;  %v3704_v59 = vmul.f32 -1.442695, %v2077_v24  ;;  %v2078_v28 = vadd.f32 %v2071_v0, %v6727_v55 }
 0x56a   :  { %v2032_v47 = vpop.f32.mrf.mxu0  ;;  %v2073_v46 = vpop.f32.mrf.mxu1 }
 0x56b   :  { %4068 = vpow2.f32 %v3702_v48  ;;  %v3703_v30 = vmul.f32 -1.442695, %v2076_v45  ;;  %v6837_v48 = vld [vmem:[#allocation67_spill] sm:$0xff] }
 0x56d   :  { %4070 = vpow2.f32 %v3703_v30 }
 0x56e   :  { %4072 = vpow2.f32 %v3704_v59 }
 0x578   :  { %v4069_v26 = vpop.eup %4068 }
 0x579   :  { %v2088_v58 = vadd.f32 1.0, %v4069_v26 }
 0x57a   :  { %v4071_v2 = vpop.eup %4070 }
 0x57b   :  { %4074 = vrcp.f32 %v2088_v58  ;;  %v2089_v49 = vadd.f32 1.0, %v4071_v2  ;;  %v4073_v63 = vpop.eup %4072 }
 0x57c   :  { %4076 = vtanh.f32 %v2078_v28  ;;  %v2090_v59 = vadd.f32 1.0, %v4073_v63 }
 0x57d   :  { %4078 = vrcp.f32 %v2089_v49 }
 0x584   :  { %v2137_v47 = vpop.f32.mrf.mxu0  ;;  %v2178_v46 = vpop.f32.mrf.mxu1 }
 0x585   :  { %v2185_v5 = vadd.f32 %v2137_v47, %v6837_v48  ;;  %v6839_v47 = vld [vmem:[#allocation69_spill] sm:$0xff] }
 0x586   :  { %v2139_v32 = vpop.f32.mrf.mxu0  ;;  %v2180_v61 = vpop.f32.mrf.mxu1 }
 0x587   :  { %v3705_v33 = vmul.f32 -1.442695, %v2185_v5  ;;  %v2186_v45 = vadd.f32 %v2139_v32, %v6838_v56  ;;  %v2187_v5 = vadd.f32 %v2178_v46, %v6839_v47 }
 0x588   :  { %v4075_v52 = vpop.eup %4074  ;;  %v2141_v16 = vpop.f32.mrf.mxu0 }
 0x589   :  { %v2182_v30 = vpop.f32.mrf.mxu1  ;;  %v4077_v12 = vpop.eup %4076  ;;  %4080 = vpow2.f32 %v3705_v33  ;;  %v3706_v24 = vmul.f32 -1.442695, %v2186_v45  ;;  %v3707_v32 = vmul.f32 -1.442695, %v2187_v5  ;;  %v6842_v5 = vld [vmem:[#allocation56_spill] sm:$0xff] }
 0x58a   :  { %v4079_v0 = vpop.eup %4078  ;;  %v2142_v28 = vpop.f32.mrf.mxu0  ;;  %v2099_v2 = vmul.f32 %v4077_v12, %v4075_v52  ;;  %v6840_v30 = vld [vmem:[#allocation70_spill] sm:$0xff] }
 0x58b   :  { %v2183_v26 = vpop.f32.mrf.mxu1  ;;  %v2098_v58 = vmul.f32 %v4079_v0, %v5390_v41  ;;  %4082 = vpow2.f32 %v3706_v24  ;;  %v2188_v33 = vadd.f32 %v2180_v61, %v6840_v30  ;;  %v2209_v0 = vrot.slane %v5434_v6, 6  ;;  %v6841_v6 = vld [vmem:[#allocation55_spill] sm:$0xff] }
 0x58c   :  { %4084 = vrcp.f32 %v2090_v59 }
 0x58d   :  { %v5568_v49 = vadd.f32 %v2099_v2, %v2098_v58 }
 0x58f   :  { %4086 = vtanh.f32 %v5568_v49 }
 0x590   :  { %4088 = vpow2.f32 %v3707_v32  ;;  %v6843_v32 = vld [vmem:[#allocation57_spill] sm:$0xff] }
 0x596   :  { %v4081_v16 = vpop.eup %4080 }
 0x597   :  { %v2198_v45 = vadd.f32 1.0, %v4081_v16  ;;  %v6844_v16 = vld [vmem:[#allocation58_spill] sm:$0xff] }
 0x598   :  { %v4083_v56 = vpop.eup %4082 }
 0x599   :  { %4090 = vrcp.f32 %v2198_v45  ;;  %v2199_v63 = vadd.f32 1.0, %v4083_v56  ;;  %v4085_v41 = vpop.eup %4084  ;;  %v6846_v45 = vld [vmem:[#allocation61_spill] sm:$0xff] }
 0x59a   :  { %4092 = vtanh.f32 %v2188_v33  ;;  %v6845_v33 = vld [vmem:[#allocation60_spill] sm:$0xff] }
 0x59b   :  { %4094 = vrcp.f32 %v2199_v63 }
 0x59c   :  { %v4087_v52 = vpop.eup %4086 }
 0x59d   :  { %v2102_v12 = vmul.f32 %v4087_v52, %v4085_v41  ;;  %v4089_v46 = vpop.eup %4088  ;;  %v6847_v52 = vld [vmem:[#allocation62_spill] sm:$0xff] }
 0x59e   :  { %v2200_v28 = vadd.f32 1.0, %v4089_v46 }
 0x59f   :  { %v2217_v24 = vpack.c.bf16 %v2102_v12, %v2102_v12  ;;  %v6848_v12 = vld [vmem:[#allocation63_spill] sm:$0xff] }
 0x5a0   :  { %4096 = vrcp.f32 %v2200_v28  ;;  %v5618_v28 = vld [vmem:[#allocation2 + $0xe8] ss:$16 sps:$4 sm:$0xff]  }
 0x5a1   :  { %2251 = vmatmul.mubr.bf16.vlgmr.msra.gmra.mxu0 %v2217_v24  ;;  %2292 = vmatmul.mubr.bf16.vlgmr.msra.gmra.mxu1 %v2217_v24  ;;  %v6849_v24 = vld [vmem:[#allocation16_spill] sm:$0xff]  ;;  %6851 = vst [vmem:[#allocation19_spill] sm:$0xff] %v5618_v28 }
 0x5a2   :  { %2301 = vmatpush1.bf16.msra.mxu0 %v5395_v57  ;;  %2342 = vmatpush1.bf16.msra.mxu1 %v5398_v9 }
 0x5a3   :  { %2302 = vmatprep.subr.bf16.mxu0 %v5401_v23  ;;  %2343 = vmatprep.subr.bf16.mxu1 %v5404_v1 }
 0x5a4   :  { %2332 = vmatprep.mubr.bf16.mxu0 %v6608_v22  ;;  %2373 = vmatprep.mubr.bf16.mxu1 %v6608_v22 }
 0x5a6   :  { %v4091_v61 = vpop.eup %4090  ;;  %2303 = vmatpush1.bf16.msra.mxu0 %v5409_v29  ;;  %2344 = vmatpush1.bf16.msra.mxu1 %v5412_v44 }
 0x5a7   :  { %v4093_v56 = vpop.eup %4092  ;;  %2304 = vmatprep.subr.bf16.mxu0 %v5415_v54  ;;  %2345 = vmatprep.subr.bf16.mxu1 %v5418_v17 }
 0x5a8   :  { %v4095_v59 = vpop.eup %4094  ;;  %v2212_v58 = vmul.f32 %v4093_v56, %v4091_v61  ;;  %v5609_v56 = vld [vmem:[#allocation2 + $0xe4] ss:$16 sps:$4 sm:$0xff]  }
 0x5a9   :  { %v2211_v26 = vmul.f32 %v4095_v59, %v2209_v0  ;;  %v5612_v0 = vld [vmem:[#allocation2 + $0xec] ss:$16 sps:$4 sm:$0xff]   ;;  %v5615_v59 = vld [vmem:[#allocation2 + $0xe0] ss:$16 sps:$4 sm:$0xff]  }
 0x5aa   :  { %2305 = vmatpush1.bf16.msra.mxu0 %v5422_v39  ;;  %2346 = vmatpush1.bf16.msra.mxu1 %v5425_v40  ;;  %6850 = vst [vmem:[#allocation14_spill] sm:$0xff] %v5615_v59 }
 0x5ab   :  { %v5586_v2 = vadd.f32 %v2212_v58, %v2211_v26  ;;  %2306 = vmatprep.subr.bf16.mxu0 %v5428_v10  ;;  %2347 = vmatprep.subr.bf16.mxu1 %v5431_v4  ;;  %v5621_v26 = vld [vmem:[#allocation2 + $0xc4] ss:$16 sps:$4 sm:$0xff]   ;;  %v5624_v58 = vld [vmem:[#allocation2 + $0xcc] ss:$16 sps:$4 sm:$0xff]  }
 0x5ac   :  { %6852 = vst [vmem:[#allocation15_spill] sm:$0xff] %v5621_v26  ;;  %6853 = vst [vmem:[#allocation20_spill] sm:$0xff] %v5624_v58 }
 0x5ad   :  { %4098 = vtanh.f32 %v5586_v2  ;;  %v4097_v63 = vpop.eup %4096 }
 0x5ae   :  { %2307 = vmatpush1.bf16.msra.mxu0 %v5436_v42  ;;  %2348 = vmatpush1.bf16.msra.mxu1 %v5439_v50 }
 0x5af   :  { %2308 = vmatprep.subr.bf16.mxu0 %v5443_v51  ;;  %2349 = vmatprep.subr.bf16.mxu1 %v5446_v53 }
 0x5b2   :  { %2309 = vmatpush1.bf16.msra.mxu0 %v5449_v20  ;;  %2350 = vmatpush1.bf16.msra.mxu1 %v5452_v38 }
 0x5b3   :  { %2310 = vmatprep.subr.bf16.mxu0 %v6841_v6  ;;  %2351 = vmatprep.subr.bf16.mxu1 %v6842_v5 }
 0x5b6   :  { %2311 = vmatpush1.bf16.msra.mxu0 %v6843_v32  ;;  %2352 = vmatpush1.bf16.msra.mxu1 %v6844_v16 }
 0x5b7   :  { %2312 = vmatprep.subr.bf16.mxu0 %v6845_v33  ;;  %2353 = vmatprep.subr.bf16.mxu1 %v6846_v45 }
 0x5ba   :  { %v4099_v41 = vpop.eup %4098  ;;  %2313 = vmatpush1.bf16.msra.mxu0 %v6847_v52  ;;  %2354 = vmatpush1.bf16.msra.mxu1 %v6848_v12 }
 0x5bb   :  { %2314 = vmatprep.subr.bf16.mxu0 %v6849_v24  ;;  %2355 = vmatprep.subr.bf16.mxu1 %v5482_v43  ;;  %v2215_v46 = vmul.f32 %v4099_v41, %v4097_v63  ;;  %v5629_v63 = vld [vmem:[#allocation2 + $0xc0] ss:$16 sps:$4 sm:$0xff]   ;;  %v5632_v41 = vld [vmem:[#allocation2 + $0xc8] ss:$16 sps:$4 sm:$0xff]  }
 0x5bc   :  { %6854 = vst [vmem:[#allocation17_spill] sm:$0xff] %v5629_v63  ;;  %6855 = vst [vmem:[#allocation23_spill] sm:$0xff] %v5632_v41 }
 0x5bd   :  { %v2216_v61 = vpack.c.bf16 %v2215_v46, %v2215_v46  ;;  %v5635_v46 = vld [vmem:[#allocation2 + $0xa4] ss:$16 sps:$4 sm:$0xff]  }
 0x5be   :  { %2315 = vmatpush1.bf16.msra.mxu0 %v5485_v7  ;;  %2356 = vmatpush1.bf16.msra.mxu1 %v5488_v21  ;;  %6856 = vst [vmem:[#allocation18_spill] sm:$0xff] %v5635_v46 }
 0x5bf   :  { %2410 = vmatprep.subr.bf16.mxu0 %v5609_v56  ;;  %2451 = vmatprep.subr.bf16.mxu1 %v5612_v0 }
 0x5c1   :  { %2333 = vmatmul.mubr.bf16.vlgmr.msra.gmra.mxu0 %v2216_v61  ;;  %2374 = vmatmul.mubr.bf16.vlgmr.msra.gmra.mxu1 %v2216_v61 }
 0x5c2   :  { %2411 = vmatpush1.bf16.msra.mxu0 %v5615_v59  ;;  %2452 = vmatpush1.bf16.msra.mxu1 %v5618_v28  ;;  %v5644_v28 = vld [vmem:[#allocation2 + $0xa8] ss:$16 sps:$4 sm:$0xff]  }
 0x5c3   :  { %2412 = vmatprep.subr.bf16.mxu0 %v5621_v26  ;;  %2453 = vmatprep.subr.bf16.mxu1 %v5624_v58  ;;  %v5638_v26 = vld [vmem:[#allocation2 + $0xac] ss:$16 sps:$4 sm:$0xff]   ;;  %v5641_v58 = vld [vmem:[#allocation2 + $0xa0] ss:$16 sps:$4 sm:$0xff]   ;;  %6859 = vst [vmem:[#allocation27_spill] sm:$0xff] %v5644_v28 }
 0x5c4   :  { %2442 = vmatprep.mubr.bf16.mxu0 %v6608_v22  ;;  %2483 = vmatprep.mubr.bf16.mxu1 %v6608_v22  ;;  %6857 = vst [vmem:[#allocation24_spill] sm:$0xff] %v5638_v26  ;;  %6858 = vst [vmem:[#allocation21_spill] sm:$0xff] %v5641_v58 }
 0x5c6   :  { %2413 = vmatpush1.bf16.msra.mxu0 %v5629_v63  ;;  %2454 = vmatpush1.bf16.msra.mxu1 %v5632_v41  ;;  %v5647_v63 = vld [vmem:[#allocation2 + $0x84] ss:$16 sps:$4 sm:$0xff]   ;;  %v5650_v41 = vld [vmem:[#allocation2 + $0x8c] ss:$16 sps:$4 sm:$0xff]  }
 0x5c7   :  { %2414 = vmatprep.subr.bf16.mxu0 %v5635_v46  ;;  %2455 = vmatprep.subr.bf16.mxu1 %v5638_v26  ;;  %6860 = vst [vmem:[#allocation22_spill] sm:$0xff] %v5647_v63  ;;  %6861 = vst [vmem:[#allocation28_spill] sm:$0xff] %v5650_v41  ;;  %v5653_v46 = vld [vmem:[#allocation2 + $0x80] ss:$16 sps:$4 sm:$0xff]   ;;  %v5657_v26 = vld [vmem:[#allocation2 + $0x64] ss:$16 sps:$4 sm:$0xff]  }
 0x5c8   :  { %6862 = vst [vmem:[#allocation25_spill] sm:$0xff] %v5653_v46  ;;  %6863 = vst [vmem:[#allocation12_spill] sm:$0xff] %v5657_v26 }
 0x5ca   :  { %2415 = vmatpush1.bf16.msra.mxu0 %v5641_v58  ;;  %2456 = vmatpush1.bf16.msra.mxu1 %v5644_v28  ;;  %v5661_v28 = vld [vmem:[#allocation2 + $0x60] ss:$16 sps:$4 sm:$0xff]  }
 0x5cb   :  { %2416 = vmatprep.subr.bf16.mxu0 %v5647_v63  ;;  %2457 = vmatprep.subr.bf16.mxu1 %v5650_v41  ;;  %6864 = vst [vmem:[#allocation37_spill] sm:$0xff] %v5661_v28  ;;  %v5665_v63 = vld [vmem:[#allocation2 + $0x44] ss:$16 sps:$4 sm:$0xff]  }
 0x5cc   :  { %6865 = vst [vmem:[#allocation38_spill] sm:$0xff] %v5665_v63 }
 0x5ce   :  { %2417 = vmatpush1.bf16.msra.mxu0 %v5653_v46  ;;  %2458 = vmatpush1.bf16.msra.mxu1 %v5244_v60  ;;  %v5669_v46 = vld [vmem:[#allocation2 + $0x40] ss:$16 sps:$4 sm:$0xff]   ;;  %v5673_v60 = vld [vmem:[#allocation2 + $0x24] ss:$16 sps:$4 sm:$0xff]  }
 0x5cf   :  { %2418 = vmatprep.subr.bf16.mxu0 %v5657_v26  ;;  %2459 = vmatprep.subr.bf16.mxu1 %v5248_v35  ;;  %6866 = vst [vmem:[#allocation39_spill] sm:$0xff] %v5669_v46  ;;  %6867 = vst [vmem:[#allocation67_spill] sm:$0xff] %v5673_v60  ;;  %v5677_v35 = vld [vmem:[#allocation2 + $0x20] ss:$16 sps:$4 sm:$0xff]  }
 0x5d0   :  { %6868 = vst [vmem:[#allocation69_spill] sm:$0xff] %v5677_v35 }
 0x5d2   :  { %2419 = vmatpush1.bf16.msra.mxu0 %v5661_v28  ;;  %2460 = vmatpush1.bf16.msra.mxu1 %v5252_v62  ;;  %v5681_v62 = vld [vmem:[#allocation2 + $0x4] ss:$16 sps:$4 sm:$0xff]  }
 0x5d3   :  { %2420 = vmatprep.subr.bf16.mxu0 %v5665_v63  ;;  %2461 = vmatprep.subr.bf16.mxu1 %v5256_v18  ;;  %6869 = vst [vmem:[#allocation70_spill] sm:$0xff] %v5681_v62  ;;  %v5685_v18 = vld [vmem:[#allocation2] ss:$16 sps:$4 sm:$0xff]  }
 0x5d4   :  { %6870 = vst [vmem:[#allocation55_spill] sm:$0xff] %v5685_v18 }
 0x5d6   :  { %2421 = vmatpush1.bf16.msra.mxu0 %v5669_v46  ;;  %2462 = vmatpush1.bf16.msra.mxu1 %v5260_v36  ;;  %v6871_v36 = vld [vmem:[#allocation40_spill] sm:$0xff] }
 0x5d7   :  { %2422 = vmatprep.subr.bf16.mxu0 %v5673_v60  ;;  %2463 = vmatprep.subr.bf16.mxu1 %v5264_v34  ;;  %v6872_v34 = vld [vmem:[#allocation41_spill] sm:$0xff] }
 0x5da   :  { %2423 = vmatpush1.bf16.msra.mxu0 %v5677_v35  ;;  %2464 = vmatpush1.bf16.msra.mxu1 %v5268_v14  ;;  %v6873_v14 = vld [vmem:[#allocation45_spill] sm:$0xff] }
 0x5db   :  { %2424 = vmatprep.subr.bf16.mxu0 %v5681_v62  ;;  %2465 = vmatprep.subr.bf16.mxu1 %v5272_v37  ;;  %v6874_v37 = vld [vmem:[#allocation47_spill] sm:$0xff] }
 0x5de   :  { %2425 = vmatpush1.bf16.msra.mxu0 %v5685_v18  ;;  %2466 = vmatpush1.bf16.msra.mxu1 %v6802_v27  ;;  %v6875_v27 = vld [vmem:[#allocation48_spill] sm:$0xff] }
 0x5df   :  { %2537 = vmatprep.subr.bf16.mxu0 %v6803_v8  ;;  %2578 = vmatprep.subr.bf16.mxu1 %v6804_v31  ;;  %v6876_v8 = vld [vmem:[#allocation59_spill] sm:$0xff]  ;;  %v6877_v31 = vld [vmem:[#allocation64_spill] sm:$0xff] }
 0x5e1   :  { %2443 = vmatmul.mubr.bf16.vlgmr.msra.gmra.mxu0 %v2216_v61  ;;  %2484 = vmatmul.mubr.bf16.vlgmr.msra.gmra.mxu1 %v2216_v61  ;;  %v6881_v61 = vld [vmem:[#allocation26_spill] sm:$0xff] }
 0x5e2   :  { %2538 = vmatpush1.bf16.msra.mxu0 %v6805_v11  ;;  %2579 = vmatpush1.bf16.msra.mxu1 %v6806_v15  ;;  %v6878_v11 = vld [vmem:[#allocation65_spill] sm:$0xff]  ;;  %v6879_v15 = vld [vmem:[#allocation66_spill] sm:$0xff] }
 0x5e3   :  { %2539 = vmatprep.subr.bf16.mxu0 %v6807_v25  ;;  %2580 = vmatprep.subr.bf16.mxu1 %v6871_v36  ;;  %v6880_v25 = vld [vmem:[#allocation31_spill] sm:$0xff]  ;;  %v6882_v36 = vld [vmem:[#allocation32_spill] sm:$0xff] }
 0x5e4   :  { %2569 = vmatprep.mubr.bf16.mxu0 %v6608_v22  ;;  %2610 = vmatprep.mubr.bf16.mxu1 %v6608_v22 }
 0x5e6   :  { %2540 = vmatpush1.bf16.msra.mxu0 %v6872_v34  ;;  %2581 = vmatpush1.bf16.msra.mxu1 %v6873_v14  ;;  %v6883_v34 = vld [vmem:[#allocation29_spill] sm:$0xff] }
 0x5e7   :  { %2541 = vmatprep.subr.bf16.mxu0 %v6874_v37  ;;  %2582 = vmatprep.subr.bf16.mxu1 %v6875_v27  ;;  %v6884_v14 = vld [vmem:[#allocation33_spill] sm:$0xff]  ;;  %v6885_v37 = vld [vmem:[#allocation30_spill] sm:$0xff] }
 0x5e8   :  { %v6886_v27 = vld [vmem:[#allocation34_spill] sm:$0xff] }
 0x5ea   :  { %2542 = vmatpush1.bf16.msra.mxu0 %v6876_v8  ;;  %2583 = vmatpush1.bf16.msra.mxu1 %v6877_v31  ;;  %v6887_v8 = vld [vmem:[#allocation35_spill] sm:$0xff]  ;;  %v6888_v31 = vld [vmem:[#allocation36_spill] sm:$0xff] }
 0x5eb   :  { %2543 = vmatprep.subr.bf16.mxu0 %v6878_v11  ;;  %2584 = vmatprep.subr.bf16.mxu1 %v6879_v15  ;;  %v6889_v11 = vld [vmem:[#allocation13_spill] sm:$0xff]  ;;  %v6890_v15 = vld [vmem:[#allocation42_spill] sm:$0xff] }
 0x5ee   :  { %2544 = vmatpush1.bf16.msra.mxu0 %v6880_v25  ;;  %2585 = vmatpush1.bf16.msra.mxu1 %v6881_v61  ;;  %v6891_v25 = vld [vmem:[#allocation43_spill] sm:$0xff]  ;;  %v6892_v61 = vld [vmem:[#allocation44_spill] sm:$0xff] }
 0x5ef   :  { %2545 = vmatprep.subr.bf16.mxu0 %v6882_v36  ;;  %2586 = vmatprep.subr.bf16.mxu1 %v6883_v34  ;;  %v6893_v36 = vld [vmem:[#allocation46_spill] sm:$0xff]  ;;  %v6894_v34 = vld [vmem:[#allocation49_spill] sm:$0xff] }
 0x5f2   :  { %2546 = vmatpush1.bf16.msra.mxu0 %v6884_v14  ;;  %2587 = vmatpush1.bf16.msra.mxu1 %v6885_v37  ;;  %v6895_v14 = vld [vmem:[#allocation50_spill] sm:$0xff]  ;;  %v6896_v37 = vld [vmem:[#allocation51_spill] sm:$0xff] }
 0x5f3   :  { %2547 = vmatprep.subr.bf16.mxu0 %v6886_v27  ;;  %2588 = vmatprep.subr.bf16.mxu1 %v6887_v8  ;;  %v6897_v27 = vld [vmem:[#allocation52_spill] sm:$0xff]  ;;  %v6898_v8 = vld [vmem:[#allocation53_spill] sm:$0xff] }
 0x5f6   :  { %2548 = vmatpush1.bf16.msra.mxu0 %v6888_v31  ;;  %2589 = vmatpush1.bf16.msra.mxu1 %v6889_v11  ;;  %v6899_v31 = vld [vmem:[#allocation54_spill] sm:$0xff] }
 0x5f7   :  { %2549 = vmatprep.subr.bf16.mxu0 %v6890_v15  ;;  %2590 = vmatprep.subr.bf16.mxu1 %v6891_v25 }
 0x5fa   :  { %2550 = vmatpush1.bf16.msra.mxu0 %v6892_v61  ;;  %2591 = vmatpush1.bf16.msra.mxu1 %v6893_v36 }
 0x5fb   :  { %2551 = vmatprep.subr.bf16.mxu0 %v6894_v34  ;;  %2592 = vmatprep.subr.bf16.mxu1 %v6895_v14 }
 0x5fe   :  { %2552 = vmatpush1.bf16.msra.mxu0 %v6896_v37  ;;  %2593 = vmatpush1.bf16.msra.mxu1 %v6897_v27 }
 0x5ff   :  { %2622 = vmatprep.subr.bf16.mxu0 %v6898_v8  ;;  %2663 = vmatprep.subr.bf16.mxu1 %v6899_v31 }
 0x661   :  { %v2252_v11 = vpop.f32.mrf.mxu0  ;;  %v2293_v15 = vpop.f32.mrf.mxu1 }
 0x663   :  { %v2254_v18 = vpop.f32.mrf.mxu0  ;;  %v2295_v25 = vpop.f32.mrf.mxu1 }
 0x665   :  { %v2256_v62 = vpop.f32.mrf.mxu0  ;;  %v2297_v61 = vpop.f32.mrf.mxu1 }
 0x667   :  { %v2257_v35 = vpop.f32.mrf.mxu0  ;;  %v2298_v36 = vpop.f32.mrf.mxu1 }
 0x681   :  { %v2334_v60 = vpop.f32.mrf.mxu0  ;;  %v2375_v34 = vpop.f32.mrf.mxu1 }
 0x682   :  { %v2335_v46 = vadd.f32 %v2334_v60, %v2252_v11  ;;  %v2376_v35 = vadd.f32 %v2375_v34, %v2293_v15 }
 0x683   :  { %v2336_v14 = vpop.f32.mrf.mxu0  ;;  %v2377_v63 = vpop.f32.mrf.mxu1 }
 0x684   :  { %v2382_v37 = vadd.f32 %v2335_v46, %v5002_v3  ;;  %v2337_v27 = vadd.f32 %v2336_v14, %v2254_v18  ;;  %v2384_v61 = vadd.f32 %v2376_v35, %v5012_v13  ;;  %v2378_v36 = vadd.f32 %v2377_v63, %v2295_v25  ;;  %v6900_v35 = vld [vmem:[#allocation68_spill] sm:$0xff] }
 0x685   :  { %v2338_v28 = vpop.f32.mrf.mxu0  ;;  %v2379_v8 = vpop.f32.mrf.mxu1 }
 0x686   :  { %v3708_v26 = vmul.f32 -1.442695, %v2382_v37  ;;  %v2383_v31 = vadd.f32 %v2337_v27, %v5006_v19  ;;  %v3710_v60 = vmul.f32 -1.442695, %v2384_v61  ;;  %v2385_v59 = vadd.f32 %v2378_v36, %v6727_v55 }
 0x687   :  { %v2339_v41 = vpop.f32.mrf.mxu0  ;;  %v2380_v58 = vpop.f32.mrf.mxu1 }
 0x688   :  { %4100 = vpow2.f32 %v3708_v26  ;;  %v3709_v62 = vmul.f32 -1.442695, %v2383_v31 }
 0x68a   :  { %4102 = vpow2.f32 %v3709_v62 }
 0x68b   :  { %4104 = vpow2.f32 %v3710_v60 }
 0x695   :  { %v4101_v11 = vpop.eup %4100 }
 0x696   :  { %v2395_v46 = vadd.f32 1.0, %v4101_v11 }
 0x697   :  { %v4103_v18 = vpop.eup %4102 }
 0x698   :  { %4106 = vrcp.f32 %v2395_v46  ;;  %v2396_v28 = vadd.f32 1.0, %v4103_v18  ;;  %v4105_v15 = vpop.eup %4104 }
 0x699   :  { %4108 = vtanh.f32 %v2385_v59  ;;  %v2397_v60 = vadd.f32 1.0, %v4105_v15 }
 0x69a   :  { %4110 = vrcp.f32 %v2396_v28 }
 0x6a1   :  { %v2444_v41 = vpop.f32.mrf.mxu0  ;;  %v2485_v58 = vpop.f32.mrf.mxu1 }
 0x6a2   :  { %v2496_v26 = vrot.slane %v2444_v41, 6 }
 0x6a3   :  { %v2446_v14 = vpop.f32.mrf.mxu0  ;;  %v2487_v37 = vpop.f32.mrf.mxu1 }
 0x6a4   :  { %v2504_v34 = vadd.f32 %v2496_v26, %v6837_v48  ;;  %v2497_v63 = vrot.slane %v2446_v14, 6  ;;  %v2498_v26 = vrot.slane %v2485_v58, 6 }
 0x6a5   :  { %v4107_v25 = vpop.eup %4106  ;;  %v2448_v27 = vpop.f32.mrf.mxu0 }
 0x6a6   :  { %v2489_v8 = vpop.f32.mrf.mxu1  ;;  %v4109_v31 = vpop.eup %4108  ;;  %v3711_v62 = vmul.f32 -1.442695, %v2504_v34  ;;  %v2505_v61 = vadd.f32 %v2497_v63, %v6900_v35  ;;  %v2506_v14 = vadd.f32 %v2498_v26, %v6839_v47  ;;  %v2499_v34 = vrot.slane %v2487_v37, 6  ;;  %v5814_v26 = vld [vmem:[#allocation2 + $0x28] ss:$16 sps:$4 sm:$0xff]  }
 0x6a7   :  { %v4111_v36 = vpop.eup %4110  ;;  %v2449_v59 = vpop.f32.mrf.mxu0  ;;  %v2406_v18 = vmul.f32 %v4109_v31, %v4107_v25 }
 0x6a8   :  { %v2490_v11 = vpop.f32.mrf.mxu1  ;;  %v2405_v46 = vmul.f32 %v4111_v36, %v5568_v49  ;;  %4112 = vpow2.f32 %v3711_v62  ;;  %v3712_v28 = vmul.f32 -1.442695, %v2505_v61  ;;  %v3713_v63 = vmul.f32 -1.442695, %v2506_v14  ;;  %v6920_v14 = vld [vmem:[#allocation70_spill] sm:$0xff] }
 0x6a9   :  { %v2507_v15 = vadd.f32 %v2499_v34, %v6840_v30  ;;  %v5806_v11 = vld [vmem:[#allocation2 + $0x48] ss:$16 sps:$4 sm:$0xff]   ;;  %v5818_v34 = vld [vmem:[#allocation2 + $0xc] ss:$16 sps:$4 sm:$0xff]  }
 0x6aa   :  { %v5732_v41 = vadd.f32 %v2406_v18, %v2405_v46  ;;  %4114 = vpow2.f32 %v3712_v28  ;;  %v6918_v46 = vld [vmem:[#allocation67_spill] sm:$0xff]  ;;  %v6919_v28 = vld [vmem:[#allocation69_spill] sm:$0xff] }
 0x6ab   :  { %4116 = vrcp.f32 %v2397_v60  ;;  %v5810_v18 = vld [vmem:[#allocation2 + $0x2c] ss:$16 sps:$4 sm:$0xff]  }
 0x6ac   :  { %4118 = vtanh.f32 %v5732_v41 }
 0x6ad   :  { %4120 = vpow2.f32 %v3713_v63  ;;  %v6921_v63 = vld [vmem:[#allocation55_spill] sm:$0xff] }
 0x6b5   :  { %v4113_v27 = vpop.eup %4112 }
 0x6b6   :  { %v2517_v8 = vadd.f32 1.0, %v4113_v27  ;;  %v5822_v27 = vld [vmem:[#allocation2 + $0x8] ss:$16 sps:$4 sm:$0xff]  }
 0x6b7   :  { %v4115_v59 = vpop.eup %4114  ;;  %6922 = vst [vmem:[#allocation56_spill] sm:$0xff] %v5822_v27 }
 0x6b8   :  { %v4117_v49 = vpop.eup %4116  ;;  %4122 = vrcp.f32 %v2517_v8  ;;  %v2518_v25 = vadd.f32 1.0, %v4115_v59  ;;  %v5828_v8 = vld [vmem:[#allocation7 + $0xec] ss:$16 sps:$4 sm:$0xff]   ;;  %v5831_v59 = vld [vmem:[#allocation7 + $0xe0] ss:$16 sps:$4 sm:$0xff]  }
 0x6b9   :  { %v4119_v31 = vpop.eup %4118  ;;  %4124 = vtanh.f32 %v2507_v15  ;;  %v5825_v15 = vld [vmem:[#allocation7 + $0xe4] ss:$16 sps:$4 sm:$0xff]   ;;  %6924 = vst [vmem:[#allocation58_spill] sm:$0xff] %v5828_v8  ;;  %6925 = vst [vmem:[#allocation60_spill] sm:$0xff] %v5831_v59 }
 0x6ba   :  { %4126 = vrcp.f32 %v2518_v25  ;;  %v2409_v62 = vmul.f32 %v4119_v31, %v4117_v49  ;;  %v4121_v37 = vpop.eup %4120  ;;  %6923 = vst [vmem:[#allocation57_spill] sm:$0xff] %v5825_v15  ;;  %v5834_v49 = vld [vmem:[#allocation7 + $0xe8] ss:$16 sps:$4 sm:$0xff]   ;;  %v5837_v25 = vld [vmem:[#allocation7 + $0xc4] ss:$16 sps:$4 sm:$0xff]  }
 0x6bb   :  { %v2519_v36 = vadd.f32 1.0, %v4121_v37  ;;  %6926 = vst [vmem:[#allocation61_spill] sm:$0xff] %v5834_v49  ;;  %6927 = vst [vmem:[#allocation62_spill] sm:$0xff] %v5837_v25  ;;  %v5840_v31 = vld [vmem:[#allocation7 + $0xcc] ss:$16 sps:$4 sm:$0xff]  }
 0x6bc   :  { %v2536_v58 = vpack.c.bf16 %v2409_v62, %v2409_v62  ;;  %6928 = vst [vmem:[#allocation63_spill] sm:$0xff] %v5840_v31  ;;  %v5845_v62 = vld [vmem:[#allocation7 + $0xc0] ss:$16 sps:$4 sm:$0xff]   ;;  %v5851_v37 = vld [vmem:[#allocation7 + $0xa4] ss:$16 sps:$4 sm:$0xff]  }
 0x6bd   :  { %4128 = vrcp.f32 %v2519_v36  ;;  %6929 = vst [vmem:[#allocation16_spill] sm:$0xff] %v5845_v62  ;;  %6931 = vst [vmem:[#allocation41_spill] sm:$0xff] %v5851_v37  ;;  %v5866_v36 = vld [vmem:[#allocation7 + $0x8c] ss:$16 sps:$4 sm:$0xff]  }
 0x6be   :  { %2570 = vmatmul.mubr.bf16.vlgmr.msra.gmra.mxu0 %v2536_v58  ;;  %2611 = vmatmul.mubr.bf16.vlgmr.msra.gmra.mxu1 %v2536_v58  ;;  %v5848_v58 = vld [vmem:[#allocation7 + $0xc8] ss:$16 sps:$4 sm:$0xff]   ;;  %6936 = vst [vmem:[#allocation64_spill] sm:$0xff] %v5866_v36 }
 0x6bf   :  { %2623 = vmatpush1.bf16.msra.mxu0 %v5395_v57  ;;  %2664 = vmatpush1.bf16.msra.mxu1 %v5398_v9  ;;  %v2528_v9 = vrot.slane %v5586_v2, 6  ;;  %v6912_v2 = vld [vmem:[#allocation28_spill] sm:$0xff]  ;;  %6930 = vst [vmem:[#allocation40_spill] sm:$0xff] %v5848_v58 }
 0x6c0   :  { %2624 = vmatprep.subr.bf16.mxu0 %v5401_v23  ;;  %2665 = vmatprep.subr.bf16.mxu1 %v5404_v1 }
 0x6c1   :  { %2654 = vmatprep.mubr.bf16.mxu0 %v6608_v22  ;;  %2695 = vmatprep.mubr.bf16.mxu1 %v6608_v22 }
 0x6c3   :  { %2625 = vmatpush1.bf16.msra.mxu0 %v5409_v29  ;;  %2666 = vmatpush1.bf16.msra.mxu1 %v5412_v44 }
 0x6c4   :  { %2626 = vmatprep.subr.bf16.mxu0 %v5415_v54  ;;  %2667 = vmatprep.subr.bf16.mxu1 %v5418_v17 }
 0x6c5   :  { %v4123_v57 = vpop.eup %4122 }
 0x6c6   :  { %v4125_v61 = vpop.eup %4124 }
 0x6c7   :  { %v4127_v23 = vpop.eup %4126  ;;  %2627 = vmatpush1.bf16.msra.mxu0 %v5422_v39  ;;  %2668 = vmatpush1.bf16.msra.mxu1 %v5425_v40  ;;  %v2531_v60 = vmul.f32 %v4125_v61, %v4123_v57  ;;  %v5854_v57 = vld [vmem:[#allocation7 + $0xac] ss:$16 sps:$4 sm:$0xff]   ;;  %v5857_v61 = vld [vmem:[#allocation7 + $0xa0] ss:$16 sps:$4 sm:$0xff]  }
 0x6c8   :  { %v2530_v1 = vmul.f32 %v4127_v23, %v2528_v9  ;;  %2628 = vmatprep.subr.bf16.mxu0 %v5428_v10  ;;  %2669 = vmatprep.subr.bf16.mxu1 %v5431_v4  ;;  %v6901_v10 = vld [vmem:[#allocation14_spill] sm:$0xff]  ;;  %v6902_v4 = vld [vmem:[#allocation19_spill] sm:$0xff]  ;;  %6932 = vst [vmem:[#allocation45_spill] sm:$0xff] %v5854_v57  ;;  %6933 = vst [vmem:[#allocation47_spill] sm:$0xff] %v5857_v61 }
 0x6c9   :  { %v5860_v9 = vld [vmem:[#allocation7 + $0xa8] ss:$16 sps:$4 sm:$0xff]   ;;  %v5863_v23 = vld [vmem:[#allocation7 + $0x84] ss:$16 sps:$4 sm:$0xff]  }
 0x6ca   :  { %v5752_v29 = vadd.f32 %v2531_v60, %v2530_v1  ;;  %v4129_v44 = vpop.eup %4128  ;;  %6934 = vst [vmem:[#allocation48_spill] sm:$0xff] %v5860_v9  ;;  %6935 = vst [vmem:[#allocation59_spill] sm:$0xff] %v5863_v23  ;;  %v5869_v1 = vld [vmem:[#allocation7 + $0x80] ss:$16 sps:$4 sm:$0xff]   ;;  %v5872_v60 = vld [vmem:[#allocation7 + $0x88] ss:$16 sps:$4 sm:$0xff]  }
 0x6cb   :  { %2629 = vmatpush1.bf16.msra.mxu0 %v5436_v42  ;;  %2670 = vmatpush1.bf16.msra.mxu1 %v5439_v50  ;;  %v6903_v42 = vld [vmem:[#allocation15_spill] sm:$0xff]  ;;  %v6904_v50 = vld [vmem:[#allocation20_spill] sm:$0xff]  ;;  %6937 = vst [vmem:[#allocation65_spill] sm:$0xff] %v5869_v1  ;;  %6938 = vst [vmem:[#allocation66_spill] sm:$0xff] %v5872_v60 }
 0x6cc   :  { %4130 = vtanh.f32 %v5752_v29  ;;  %2630 = vmatprep.subr.bf16.mxu0 %v5443_v51  ;;  %2671 = vmatprep.subr.bf16.mxu1 %v5446_v53  ;;  %v6905_v51 = vld [vmem:[#allocation17_spill] sm:$0xff]  ;;  %v6906_v53 = vld [vmem:[#allocation23_spill] sm:$0xff] }
 0x6cf   :  { %2631 = vmatpush1.bf16.msra.mxu0 %v5449_v20  ;;  %2672 = vmatpush1.bf16.msra.mxu1 %v5452_v38  ;;  %v6907_v20 = vld [vmem:[#allocation18_spill] sm:$0xff]  ;;  %v6908_v38 = vld [vmem:[#allocation24_spill] sm:$0xff] }
 0x6d0   :  { %2632 = vmatprep.subr.bf16.mxu0 %v6841_v6  ;;  %2673 = vmatprep.subr.bf16.mxu1 %v6842_v5  ;;  %v6913_v6 = vld [vmem:[#allocation25_spill] sm:$0xff] }
 0x6d1   :  { %v5790_v5 = vld [vmem:[#allocation2 + $0x88] ss:$16 sps:$4 sm:$0xff]  }
 0x6d3   :  { %2633 = vmatpush1.bf16.msra.mxu0 %v6843_v32  ;;  %2674 = vmatpush1.bf16.msra.mxu1 %v6844_v16  ;;  %v6914_v32 = vld [vmem:[#allocation12_spill] sm:$0xff]  ;;  %v5794_v16 = vld [vmem:[#allocation2 + $0x6c] ss:$16 sps:$4 sm:$0xff]  }
 0x6d4   :  { %2634 = vmatprep.subr.bf16.mxu0 %v6845_v33  ;;  %2675 = vmatprep.subr.bf16.mxu1 %v6846_v45  ;;  %v6915_v33 = vld [vmem:[#allocation37_spill] sm:$0xff] }
 0x6d5   :  { %v5798_v45 = vld [vmem:[#allocation2 + $0x68] ss:$16 sps:$4 sm:$0xff]  }
 0x6d7   :  { %2635 = vmatpush1.bf16.msra.mxu0 %v6847_v52  ;;  %2676 = vmatpush1.bf16.msra.mxu1 %v6848_v12  ;;  %v6916_v52 = vld [vmem:[#allocation38_spill] sm:$0xff]  ;;  %v5802_v12 = vld [vmem:[#allocation2 + $0x4c] ss:$16 sps:$4 sm:$0xff]  }
 0x6d8   :  { %2636 = vmatprep.subr.bf16.mxu0 %v6849_v24  ;;  %2677 = vmatprep.subr.bf16.mxu1 %v5482_v43  ;;  %v6909_v43 = vld [vmem:[#allocation21_spill] sm:$0xff]  ;;  %v6917_v24 = vld [vmem:[#allocation39_spill] sm:$0xff] }
 0x6d9   :  { %v4131_v54 = vpop.eup %4130 }
 0x6da   :  { %v2534_v17 = vmul.f32 %v4131_v54, %v4129_v44  ;;  %v5875_v44 = vld [vmem:[#allocation7 + $0x64] ss:$16 sps:$4 sm:$0xff]   ;;  %v5878_v54 = vld [vmem:[#allocation7 + $0x6c] ss:$16 sps:$4 sm:$0xff]  }
 0x6db   :  { %2637 = vmatpush1.bf16.msra.mxu0 %v5485_v7  ;;  %2678 = vmatpush1.bf16.msra.mxu1 %v5488_v21  ;;  %v6910_v7 = vld [vmem:[#allocation27_spill] sm:$0xff]  ;;  %v6911_v21 = vld [vmem:[#allocation22_spill] sm:$0xff]  ;;  %6939 = vst [vmem:[#allocation31_spill] sm:$0xff] %v5875_v44  ;;  %6940 = vst [vmem:[#allocation26_spill] sm:$0xff] %v5878_v54 }
 0x6dc   :  { %2732 = vmatprep.subr.bf16.mxu0 %v5609_v56  ;;  %2773 = vmatprep.subr.bf16.mxu1 %v5612_v0  ;;  %v2535_v39 = vpack.c.bf16 %v2534_v17, %v2534_v17  ;;  %v5881_v17 = vld [vmem:[#allocation7 + $0x60] ss:$16 sps:$4 sm:$0xff]  }
 0x6dd   :  { %6941 = vst [vmem:[#allocation32_spill] sm:$0xff] %v5881_v17 }
 0x6de   :  { %v2620_v40 = vrot.slane %v2535_v39, 1  ;;  %v5884_v39 = vld [vmem:[#allocation7 + $0x68] ss:$16 sps:$4 sm:$0xff]  }
 0x6df   :  { %6942 = vst [vmem:[#allocation29_spill] sm:$0xff] %v5884_v39 }
 0x6e0   :  { %2655 = vmatmul.mubr.bf16.vlgmr.msra.gmra.mxu0 %v2620_v40  ;;  %2696 = vmatmul.mubr.bf16.vlgmr.msra.gmra.mxu1 %v2620_v40 }
 0x6e1   :  { %2733 = vmatpush1.bf16.msra.mxu0 %v6901_v10  ;;  %2774 = vmatpush1.bf16.msra.mxu1 %v6902_v4 }
 0x6e2   :  { %2734 = vmatprep.subr.bf16.mxu0 %v6903_v42  ;;  %2775 = vmatprep.subr.bf16.mxu1 %v6904_v50 }
 0x6e3   :  { %2764 = vmatprep.mubr.bf16.mxu0 %v6608_v22  ;;  %2805 = vmatprep.mubr.bf16.mxu1 %v6608_v22 }
 0x6e5   :  { %2735 = vmatpush1.bf16.msra.mxu0 %v6905_v51  ;;  %2776 = vmatpush1.bf16.msra.mxu1 %v6906_v53 }
 0x6e6   :  { %2736 = vmatprep.subr.bf16.mxu0 %v6907_v20  ;;  %2777 = vmatprep.subr.bf16.mxu1 %v6908_v38 }
 0x6e9   :  { %2737 = vmatpush1.bf16.msra.mxu0 %v6909_v43  ;;  %2778 = vmatpush1.bf16.msra.mxu1 %v6910_v7 }
 0x6ea   :  { %2738 = vmatprep.subr.bf16.mxu0 %v6911_v21  ;;  %2779 = vmatprep.subr.bf16.mxu1 %v6912_v2 }
 0x6ed   :  { %2739 = vmatpush1.bf16.msra.mxu0 %v6913_v6  ;;  %2780 = vmatpush1.bf16.msra.mxu1 %v5790_v5 }
 0x6ee   :  { %2740 = vmatprep.subr.bf16.mxu0 %v6914_v32  ;;  %2781 = vmatprep.subr.bf16.mxu1 %v5794_v16 }
 0x6f1   :  { %2741 = vmatpush1.bf16.msra.mxu0 %v6915_v33  ;;  %2782 = vmatpush1.bf16.msra.mxu1 %v5798_v45 }
 0x6f2   :  { %2742 = vmatprep.subr.bf16.mxu0 %v6916_v52  ;;  %2783 = vmatprep.subr.bf16.mxu1 %v5802_v12 }
 0x6f5   :  { %2743 = vmatpush1.bf16.msra.mxu0 %v6917_v24  ;;  %2784 = vmatpush1.bf16.msra.mxu1 %v5806_v11 }
 0x6f6   :  { %2744 = vmatprep.subr.bf16.mxu0 %v6918_v46  ;;  %2785 = vmatprep.subr.bf16.mxu1 %v5810_v18 }
 0x6f9   :  { %2745 = vmatpush1.bf16.msra.mxu0 %v6919_v28  ;;  %2786 = vmatpush1.bf16.msra.mxu1 %v5814_v26 }
 0x6fa   :  { %2746 = vmatprep.subr.bf16.mxu0 %v6920_v14  ;;  %2787 = vmatprep.subr.bf16.mxu1 %v5818_v34 }
 0x6fd   :  { %2747 = vmatpush1.bf16.msra.mxu0 %v6921_v63  ;;  %2788 = vmatpush1.bf16.msra.mxu1 %v5822_v27 }
 0x6fe   :  { %2859 = vmatprep.subr.bf16.mxu0 %v5825_v15  ;;  %2900 = vmatprep.subr.bf16.mxu1 %v5828_v8 }
 0x700   :  { %2765 = vmatmul.mubr.bf16.vlgmr.msra.gmra.mxu0 %v2620_v40  ;;  %2806 = vmatmul.mubr.bf16.vlgmr.msra.gmra.mxu1 %v2620_v40  ;;  %v5887_v40 = vld [vmem:[#allocation7 + $0x44] ss:$16 sps:$4 sm:$0xff]  }
 0x701   :  { %2860 = vmatpush1.bf16.msra.mxu0 %v5831_v59  ;;  %2901 = vmatpush1.bf16.msra.mxu1 %v5834_v49  ;;  %6943 = vst [vmem:[#allocation33_spill] sm:$0xff] %v5887_v40 }
 0x702   :  { %2861 = vmatprep.subr.bf16.mxu0 %v5837_v25  ;;  %2902 = vmatprep.subr.bf16.mxu1 %v5840_v31 }
 0x703   :  { %2891 = vmatprep.mubr.bf16.mxu0 %v6608_v22  ;;  %2932 = vmatprep.mubr.bf16.mxu1 %v6608_v22 }
 0x705   :  { %2862 = vmatpush1.bf16.msra.mxu0 %v5845_v62  ;;  %2903 = vmatpush1.bf16.msra.mxu1 %v5848_v58 }
 0x706   :  { %2863 = vmatprep.subr.bf16.mxu0 %v5851_v37  ;;  %2904 = vmatprep.subr.bf16.mxu1 %v5854_v57 }
 0x709   :  { %2864 = vmatpush1.bf16.msra.mxu0 %v5857_v61  ;;  %2905 = vmatpush1.bf16.msra.mxu1 %v5860_v9 }
 0x70a   :  { %2865 = vmatprep.subr.bf16.mxu0 %v5863_v23  ;;  %2906 = vmatprep.subr.bf16.mxu1 %v5866_v36 }
 0x70d   :  { %2866 = vmatpush1.bf16.msra.mxu0 %v5869_v1  ;;  %2907 = vmatpush1.bf16.msra.mxu1 %v5872_v60  ;;  %v5890_v60 = vld [vmem:[#allocation7 + $0x4c] ss:$16 sps:$4 sm:$0xff]  }
 0x70e   :  { %2867 = vmatprep.subr.bf16.mxu0 %v5875_v44  ;;  %2908 = vmatprep.subr.bf16.mxu1 %v5878_v54  ;;  %6944 = vst [vmem:[#allocation30_spill] sm:$0xff] %v5890_v60  ;;  %v5893_v44 = vld [vmem:[#allocation7 + $0x40] ss:$16 sps:$4 sm:$0xff]   ;;  %v5896_v54 = vld [vmem:[#allocation7 + $0x48] ss:$16 sps:$4 sm:$0xff]  }
 0x70f   :  { %6945 = vst [vmem:[#allocation34_spill] sm:$0xff] %v5893_v44  ;;  %6946 = vst [vmem:[#allocation35_spill] sm:$0xff] %v5896_v54 }
 0x711   :  { %2868 = vmatpush1.bf16.msra.mxu0 %v5881_v17  ;;  %2909 = vmatpush1.bf16.msra.mxu1 %v5884_v39  ;;  %v5899_v17 = vld [vmem:[#allocation7 + $0x24] ss:$16 sps:$4 sm:$0xff]   ;;  %v5902_v39 = vld [vmem:[#allocation7 + $0x2c] ss:$16 sps:$4 sm:$0xff]  }
 0x712   :  { %2869 = vmatprep.subr.bf16.mxu0 %v5887_v40  ;;  %2910 = vmatprep.subr.bf16.mxu1 %v5890_v60  ;;  %6947 = vst [vmem:[#allocation36_spill] sm:$0xff] %v5899_v17  ;;  %6948 = vst [vmem:[#allocation13_spill] sm:$0xff] %v5902_v39  ;;  %v5905_v40 = vld [vmem:[#allocation7 + $0x20] ss:$16 sps:$4 sm:$0xff]   ;;  %v5908_v60 = vld [vmem:[#allocation7 + $0x28] ss:$16 sps:$4 sm:$0xff]  }
 0x713   :  { %6949 = vst [vmem:[#allocation42_spill] sm:$0xff] %v5905_v40  ;;  %6950 = vst [vmem:[#allocation43_spill] sm:$0xff] %v5908_v60 }
 0x715   :  { %2870 = vmatpush1.bf16.msra.mxu0 %v5893_v44  ;;  %2911 = vmatpush1.bf16.msra.mxu1 %v5896_v54  ;;  %v5911_v44 = vld [vmem:[#allocation7 + $0x4] ss:$16 sps:$4 sm:$0xff]   ;;  %v5914_v54 = vld [vmem:[#allocation7 + $0xc] ss:$16 sps:$4 sm:$0xff]  }
 0x716   :  { %2871 = vmatprep.subr.bf16.mxu0 %v5899_v17  ;;  %2912 = vmatprep.subr.bf16.mxu1 %v5902_v39  ;;  %6951 = vst [vmem:[#allocation44_spill] sm:$0xff] %v5911_v44  ;;  %6952 = vst [vmem:[#allocation46_spill] sm:$0xff] %v5914_v54  ;;  %v5917_v17 = vld [vmem:[#allocation7] ss:$16 sps:$4 sm:$0xff]   ;;  %v5920_v39 = vld [vmem:[#allocation7 + $0x8] ss:$16 sps:$4 sm:$0xff]  }
 0x717   :  { %6953 = vst [vmem:[#allocation49_spill] sm:$0xff] %v5917_v17  ;;  %6954 = vst [vmem:[#allocation50_spill] sm:$0xff] %v5920_v39 }
 0x719   :  { %2872 = vmatpush1.bf16.msra.mxu0 %v5905_v40  ;;  %2913 = vmatpush1.bf16.msra.mxu1 %v5908_v60  ;;  %v5923_v40 = vld [vmem:[#allocation5 + $0xe4] ss:$16 sps:$4 sm:$0xff]   ;;  %v5926_v60 = vld [vmem:[#allocation5 + $0xec] ss:$16 sps:$4 sm:$0xff]  }
 0x71a   :  { %2873 = vmatprep.subr.bf16.mxu0 %v5911_v44  ;;  %2914 = vmatprep.subr.bf16.mxu1 %v5914_v54  ;;  %6955 = vst [vmem:[#allocation51_spill] sm:$0xff] %v5923_v40  ;;  %6956 = vst [vmem:[#allocation52_spill] sm:$0xff] %v5926_v60 }
 0x71d   :  { %2874 = vmatpush1.bf16.msra.mxu0 %v5917_v17  ;;  %2915 = vmatpush1.bf16.msra.mxu1 %v5920_v39 }
 0x71e   :  { %2944 = vmatprep.subr.bf16.mxu0 %v5923_v40  ;;  %2985 = vmatprep.subr.bf16.mxu1 %v5926_v60 }
 0x77e   :  { %v2571_v44 = vpop.f32.mrf.mxu0  ;;  %v2612_v1 = vpop.f32.mrf.mxu1 }
 0x780   :  { %v2573_v36 = vpop.f32.mrf.mxu0  ;;  %v2614_v54 = vpop.f32.mrf.mxu1 }
 0x782   :  { %v2575_v23 = vpop.f32.mrf.mxu0  ;;  %v2616_v9 = vpop.f32.mrf.mxu1 }
 0x784   :  { %v2576_v61 = vpop.f32.mrf.mxu0  ;;  %v2617_v17 = vpop.f32.mrf.mxu1 }
 0x7a0   :  { %v2656_v57 = vpop.f32.mrf.mxu0  ;;  %v2697_v37 = vpop.f32.mrf.mxu1 }
 0x7a1   :  { %v2657_v58 = vadd.f32 %v2656_v57, %v2571_v44  ;;  %v2698_v61 = vadd.f32 %v2697_v37, %v2612_v1 }
 0x7a2   :  { %v2658_v39 = vpop.f32.mrf.mxu0  ;;  %v2699_v62 = vpop.f32.mrf.mxu1 }
 0x7a3   :  { %v2704_v31 = vadd.f32 %v2657_v58, %v5002_v3  ;;  %v2659_v40 = vadd.f32 %v2658_v39, %v2573_v36  ;;  %v2706_v9 = vadd.f32 %v2698_v61, %v5012_v13  ;;  %v2700_v17 = vadd.f32 %v2699_v62, %v2614_v54 }
 0x7a4   :  { %v2660_v25 = vpop.f32.mrf.mxu0  ;;  %v2701_v49 = vpop.f32.mrf.mxu1 }
 0x7a5   :  { %v3714_v59 = vmul.f32 -1.442695, %v2704_v31  ;;  %v2705_v60 = vadd.f32 %v2659_v40, %v5006_v19  ;;  %v3716_v57 = vmul.f32 -1.442695, %v2706_v9  ;;  %v2707_v27 = vadd.f32 %v2700_v17, %v6727_v55 }
 0x7a6   :  { %v2661_v8 = vpop.f32.mrf.mxu0  ;;  %v2702_v15 = vpop.f32.mrf.mxu1 }
 0x7a7   :  { %4132 = vpow2.f32 %v3714_v59  ;;  %v3715_v23 = vmul.f32 -1.442695, %v2705_v60 }
 0x7a9   :  { %4134 = vpow2.f32 %v3715_v23 }
 0x7aa   :  { %4136 = vpow2.f32 %v3716_v57 }
 0x7b4   :  { %v4133_v44 = vpop.eup %4132 }
 0x7b5   :  { %v2717_v58 = vadd.f32 1.0, %v4133_v44 }
 0x7b6   :  { %v4135_v36 = vpop.eup %4134 }
 0x7b7   :  { %4138 = vrcp.f32 %v2717_v58  ;;  %v2718_v49 = vadd.f32 1.0, %v4135_v36  ;;  %v4137_v37 = vpop.eup %4136 }
 0x7b8   :  { %4140 = vtanh.f32 %v2707_v27  ;;  %v2719_v17 = vadd.f32 1.0, %v4137_v37 }
 0x7b9   :  { %4142 = vrcp.f32 %v2718_v49 }
 0x7c0   :  { %v2766_v8 = vpop.f32.mrf.mxu0  ;;  %v2807_v15 = vpop.f32.mrf.mxu1 }
 0x7c1   :  { %v2818_v59 = vrot.slane %v2766_v8, 4  ;;  %v2820_v8 = vrot.slane %v2807_v15, 4 }
 0x7c2   :  { %v2768_v25 = vpop.f32.mrf.mxu0  ;;  %v2809_v31 = vpop.f32.mrf.mxu1 }
 0x7c3   :  { %v2826_v1 = vadd.f32 %v2818_v59, %v6837_v48  ;;  %v2819_v62 = vrot.slane %v2768_v25, 4  ;;  %v2828_v59 = vadd.f32 %v2820_v8, %v6839_v47  ;;  %v2821_v25 = vrot.slane %v2809_v31, 4  ;;  %v5944_v31 = vld [vmem:[#allocation5 + $0xe8] ss:$16 sps:$4 sm:$0xff]  }
 0x7c4   :  { %v4139_v60 = vpop.eup %4138  ;;  %v2770_v54 = vpop.f32.mrf.mxu0 }
 0x7c5   :  { %v2811_v39 = vpop.f32.mrf.mxu1  ;;  %v4141_v40 = vpop.eup %4140  ;;  %v3717_v23 = vmul.f32 -1.442695, %v2826_v1  ;;  %v2827_v61 = vadd.f32 %v2819_v62, %v6900_v35  ;;  %v3719_v1 = vmul.f32 -1.442695, %v2828_v59  ;;  %v2829_v37 = vadd.f32 %v2821_v25, %v6840_v30 }
 0x7c6   :  { %v4143_v9 = vpop.eup %4142  ;;  %v2771_v27 = vpop.f32.mrf.mxu0  ;;  %v2728_v58 = vmul.f32 %v4141_v40, %v4139_v60  ;;  %v2850_v25 = vrot.slane %v5752_v29, 6 }
 0x7c7   :  { %v2812_v57 = vpop.f32.mrf.mxu1  ;;  %v2727_v44 = vmul.f32 %v4143_v9, %v5732_v41  ;;  %4144 = vpow2.f32 %v3717_v23  ;;  %v3718_v36 = vmul.f32 -1.442695, %v2827_v61  ;;  %v5941_v61 = vld [vmem:[#allocation5 + $0xe0] ss:$16 sps:$4 sm:$0xff]   ;;  %v5947_v9 = vld [vmem:[#allocation5 + $0xc4] ss:$16 sps:$4 sm:$0xff]  }
 0x7c8   :  { %v5955_v27 = vld [vmem:[#allocation5 + $0xc0] ss:$16 sps:$4 sm:$0xff]   ;;  %v5958_v57 = vld [vmem:[#allocation5 + $0xc8] ss:$16 sps:$4 sm:$0xff]  }
 0x7c9   :  { %v5936_v49 = vadd.f32 %v2728_v58, %v2727_v44  ;;  %4146 = vpow2.f32 %v3718_v36  ;;  %v5961_v58 = vld [vmem:[#allocation5 + $0xa4] ss:$16 sps:$4 sm:$0xff]   ;;  %v5964_v36 = vld [vmem:[#allocation5 + $0xac] ss:$16 sps:$4 sm:$0xff]  }
 0x7ca   :  { %4148 = vrcp.f32 %v2719_v17  ;;  %v5950_v17 = vld [vmem:[#allocation5 + $0xcc] ss:$16 sps:$4 sm:$0xff]  }
 0x7cb   :  { %4150 = vtanh.f32 %v5936_v49 }
 0x7cc   :  { %4152 = vpow2.f32 %v3719_v1 }
 0x7d4   :  { %v4145_v62 = vpop.eup %4144 }
 0x7d5   :  { %v2839_v54 = vadd.f32 1.0, %v4145_v62 }
 0x7d6   :  { %v4147_v39 = vpop.eup %4146 }
 0x7d7   :  { %v4149_v41 = vpop.eup %4148  ;;  %4154 = vrcp.f32 %v2839_v54  ;;  %v2840_v60 = vadd.f32 1.0, %v4147_v39  ;;  %v5971_v54 = vld [vmem:[#allocation5 + $0xa8] ss:$16 sps:$4 sm:$0xff]  }
 0x7d8   :  { %v4151_v40 = vpop.eup %4150  ;;  %4156 = vtanh.f32 %v2829_v37  ;;  %v5968_v37 = vld [vmem:[#allocation5 + $0xa0] ss:$16 sps:$4 sm:$0xff]  }
 0x7d9   :  { %4158 = vrcp.f32 %v2840_v60  ;;  %v2731_v23 = vmul.f32 %v4151_v40, %v4149_v41  ;;  %v4153_v44 = vpop.eup %4152  ;;  %v5974_v60 = vld [vmem:[#allocation5 + $0x84] ss:$16 sps:$4 sm:$0xff]   ;;  %v5977_v40 = vld [vmem:[#allocation5 + $0x8c] ss:$16 sps:$4 sm:$0xff]  }
 0x7da   :  { %v2841_v62 = vadd.f32 1.0, %v4153_v44  ;;  %v5989_v44 = vld [vmem:[#allocation5 + $0x64] ss:$16 sps:$4 sm:$0xff]  }
 0x7db   :  { %v2858_v15 = vpack.c.bf16 %v2731_v23, %v2731_v23  ;;  %v5982_v23 = vld [vmem:[#allocation5 + $0x80] ss:$16 sps:$4 sm:$0xff]   ;;  %6957 = vst [vmem:[#allocation53_spill] sm:$0xff] %v5989_v44 }
 0x7dc   :  { %4160 = vrcp.f32 %v2841_v62  ;;  %v6004_v62 = vld [vmem:[#allocation5 + $0x4c] ss:$16 sps:$4 sm:$0xff]  }
 0x7dd   :  { %2892 = vmatmul.mubr.bf16.vlgmr.msra.gmra.mxu0 %v2858_v15  ;;  %2933 = vmatmul.mubr.bf16.vlgmr.msra.gmra.mxu1 %v2858_v15  ;;  %v5985_v15 = vld [vmem:[#allocation5 + $0x88] ss:$16 sps:$4 sm:$0xff]   ;;  %6962 = vst [vmem:[#allocation15_spill] sm:$0xff] %v6004_v62 }
 0x7de   :  { %2945 = vmatpush1.bf16.msra.mxu0 %v5941_v61  ;;  %2986 = vmatpush1.bf16.msra.mxu1 %v5944_v31 }
 0x7df   :  { %2946 = vmatprep.subr.bf16.mxu0 %v5947_v9  ;;  %2987 = vmatprep.subr.bf16.mxu1 %v5950_v17 }
 0x7e0   :  { %2976 = vmatprep.mubr.bf16.mxu0 %v6608_v22  ;;  %3017 = vmatprep.mubr.bf16.mxu1 %v6608_v22 }
 0x7e2   :  { %2947 = vmatpush1.bf16.msra.mxu0 %v5955_v27  ;;  %2988 = vmatpush1.bf16.msra.mxu1 %v5958_v57 }
 0x7e3   :  { %2948 = vmatprep.subr.bf16.mxu0 %v5961_v58  ;;  %2989 = vmatprep.subr.bf16.mxu1 %v5964_v36 }
 0x7e4   :  { %v4155_v8 = vpop.eup %4154 }
 0x7e5   :  { %v4157_v59 = vpop.eup %4156 }
 0x7e6   :  { %v4159_v1 = vpop.eup %4158  ;;  %2949 = vmatpush1.bf16.msra.mxu0 %v5968_v37  ;;  %2990 = vmatpush1.bf16.msra.mxu1 %v5971_v54  ;;  %v2853_v41 = vmul.f32 %v4157_v59, %v4155_v8  ;;  %v5992_v8 = vld [vmem:[#allocation5 + $0x6c] ss:$16 sps:$4 sm:$0xff]   ;;  %v5995_v59 = vld [vmem:[#allocation5 + $0x60] ss:$16 sps:$4 sm:$0xff]  }
 0x7e7   :  { %v2852_v39 = vmul.f32 %v4159_v1, %v2850_v25  ;;  %2950 = vmatprep.subr.bf16.mxu0 %v5974_v60  ;;  %2991 = vmatprep.subr.bf16.mxu1 %v5977_v40  ;;  %6958 = vst [vmem:[#allocation54_spill] sm:$0xff] %v5992_v8  ;;  %6959 = vst [vmem:[#allocation68_spill] sm:$0xff] %v5995_v59  ;;  %v5998_v25 = vld [vmem:[#allocation5 + $0x68] ss:$16 sps:$4 sm:$0xff]   ;;  %v6001_v1 = vld [vmem:[#allocation5 + $0x44] ss:$16 sps:$4 sm:$0xff]  }
 0x7e8   :  { %6960 = vst [vmem:[#allocation14_spill] sm:$0xff] %v5998_v25  ;;  %6961 = vst [vmem:[#allocation19_spill] sm:$0xff] %v6001_v1 }
 0x7e9   :  { %v5980_v29 = vadd.f32 %v2853_v41, %v2852_v39  ;;  %v6007_v39 = vld [vmem:[#allocation5 + $0x40] ss:$16 sps:$4 sm:$0xff]   ;;  %v6010_v41 = vld [vmem:[#allocation5 + $0x48] ss:$16 sps:$4 sm:$0xff]  }
 0x7ea   :  { %2951 = vmatpush1.bf16.msra.mxu0 %v5982_v23  ;;  %2992 = vmatpush1.bf16.msra.mxu1 %v5985_v15  ;;  %6963 = vst [vmem:[#allocation20_spill] sm:$0xff] %v6007_v39  ;;  %6964 = vst [vmem:[#allocation17_spill] sm:$0xff] %v6010_v41 }
 0x7eb   :  { %4162 = vtanh.f32 %v5980_v29  ;;  %2952 = vmatprep.subr.bf16.mxu0 %v5989_v44  ;;  %2993 = vmatprep.subr.bf16.mxu1 %v5992_v8  ;;  %v6025_v8 = vld [vmem:[#allocation5 + $0x4] ss:$16 sps:$4 sm:$0xff]  }
 0x7ec   :  { %6969 = vst [vmem:[#allocation27_spill] sm:$0xff] %v6025_v8 }
 0x7ee   :  { %2953 = vmatpush1.bf16.msra.mxu0 %v5995_v59  ;;  %2994 = vmatpush1.bf16.msra.mxu1 %v5998_v25  ;;  %v6013_v59 = vld [vmem:[#allocation5 + $0x24] ss:$16 sps:$4 sm:$0xff]   ;;  %v6016_v25 = vld [vmem:[#allocation5 + $0x2c] ss:$16 sps:$4 sm:$0xff]  }
 0x7ef   :  { %2954 = vmatprep.subr.bf16.mxu0 %v6001_v1  ;;  %2995 = vmatprep.subr.bf16.mxu1 %v6004_v62  ;;  %6965 = vst [vmem:[#allocation23_spill] sm:$0xff] %v6013_v59  ;;  %6966 = vst [vmem:[#allocation18_spill] sm:$0xff] %v6016_v25  ;;  %v6019_v1 = vld [vmem:[#allocation5 + $0x20] ss:$16 sps:$4 sm:$0xff]   ;;  %v6022_v62 = vld [vmem:[#allocation5 + $0x28] ss:$16 sps:$4 sm:$0xff]  }
 0x7f0   :  { %6967 = vst [vmem:[#allocation24_spill] sm:$0xff] %v6019_v1  ;;  %6968 = vst [vmem:[#allocation21_spill] sm:$0xff] %v6022_v62 }
 0x7f2   :  { %2955 = vmatpush1.bf16.msra.mxu0 %v6007_v39  ;;  %2996 = vmatpush1.bf16.msra.mxu1 %v6010_v41  ;;  %v4161_v39 = vpop.eup %4160  ;;  %v6028_v41 = vld [vmem:[#allocation5 + $0xc] ss:$16 sps:$4 sm:$0xff]  }
 0x7f3   :  { %2956 = vmatprep.subr.bf16.mxu0 %v6013_v59  ;;  %2997 = vmatprep.subr.bf16.mxu1 %v6016_v25  ;;  %v6031_v25 = vld [vmem:[#allocation5] ss:$16 sps:$4 sm:$0xff]  }
 0x7f6   :  { %2957 = vmatpush1.bf16.msra.mxu0 %v6019_v1  ;;  %2998 = vmatpush1.bf16.msra.mxu1 %v6022_v62  ;;  %v6034_v1 = vld [vmem:[#allocation5 + $0x8] ss:$16 sps:$4 sm:$0xff]  }
 0x7f7   :  { %2958 = vmatprep.subr.bf16.mxu0 %v6025_v8  ;;  %2999 = vmatprep.subr.bf16.mxu1 %v6028_v41 }
 0x7f8   :  { %v4163_v59 = vpop.eup %4162 }
 0x7f9   :  { %v2856_v44 = vmul.f32 %v4163_v59, %v4161_v39  ;;  %v7003_v59 = vld [vmem:[#allocation51_spill] sm:$0xff] }
 0x7fa   :  { %2959 = vmatpush1.bf16.msra.mxu0 %v6031_v25  ;;  %3000 = vmatpush1.bf16.msra.mxu1 %v6034_v1 }
 0x7fb   :  { %3054 = vmatprep.subr.bf16.mxu0 %v5609_v56  ;;  %3095 = vmatprep.subr.bf16.mxu1 %v5612_v0  ;;  %v2857_v62 = vpack.c.bf16 %v2856_v44, %v2856_v44  ;;  %v6970_v56 = vld [vmem:[#allocation56_spill] sm:$0xff]  ;;  %v6971_v0 = vld [vmem:[#allocation57_spill] sm:$0xff] }
 0x7fc   :  { %v7001_v44 = vld [vmem:[#allocation49_spill] sm:$0xff] }
 0x7fd   :  { %v2942_v8 = vrot.slane %v2857_v62, 2  ;;  %v7004_v62 = vld [vmem:[#allocation52_spill] sm:$0xff] }
 0x7ff   :  { %2977 = vmatmul.mubr.bf16.vlgmr.msra.gmra.mxu0 %v2942_v8  ;;  %3018 = vmatmul.mubr.bf16.vlgmr.msra.gmra.mxu1 %v2942_v8 }
 0x800   :  { %3055 = vmatpush1.bf16.msra.mxu0 %v6901_v10  ;;  %3096 = vmatpush1.bf16.msra.mxu1 %v6902_v4  ;;  %v6972_v10 = vld [vmem:[#allocation58_spill] sm:$0xff]  ;;  %v6973_v4 = vld [vmem:[#allocation60_spill] sm:$0xff] }
 0x801   :  { %3056 = vmatprep.subr.bf16.mxu0 %v6903_v42  ;;  %3097 = vmatprep.subr.bf16.mxu1 %v6904_v50  ;;  %v6974_v42 = vld [vmem:[#allocation61_spill] sm:$0xff]  ;;  %v6975_v50 = vld [vmem:[#allocation62_spill] sm:$0xff] }
 0x802   :  { %3086 = vmatprep.mubr.bf16.mxu0 %v6608_v22  ;;  %3127 = vmatprep.mubr.bf16.mxu1 %v6608_v22 }
 0x804   :  { %3057 = vmatpush1.bf16.msra.mxu0 %v6905_v51  ;;  %3098 = vmatpush1.bf16.msra.mxu1 %v6906_v53  ;;  %v6976_v51 = vld [vmem:[#allocation63_spill] sm:$0xff]  ;;  %v6977_v53 = vld [vmem:[#allocation16_spill] sm:$0xff] }
 0x805   :  { %3058 = vmatprep.subr.bf16.mxu0 %v6907_v20  ;;  %3099 = vmatprep.subr.bf16.mxu1 %v6908_v38  ;;  %v6978_v20 = vld [vmem:[#allocation40_spill] sm:$0xff]  ;;  %v6979_v38 = vld [vmem:[#allocation41_spill] sm:$0xff] }
 0x808   :  { %3059 = vmatpush1.bf16.msra.mxu0 %v6909_v43  ;;  %3100 = vmatpush1.bf16.msra.mxu1 %v6910_v7  ;;  %v6980_v43 = vld [vmem:[#allocation45_spill] sm:$0xff]  ;;  %v6981_v7 = vld [vmem:[#allocation47_spill] sm:$0xff] }
 0x809   :  { %3060 = vmatprep.subr.bf16.mxu0 %v6911_v21  ;;  %3101 = vmatprep.subr.bf16.mxu1 %v6912_v2  ;;  %v6982_v21 = vld [vmem:[#allocation48_spill] sm:$0xff]  ;;  %v6983_v2 = vld [vmem:[#allocation59_spill] sm:$0xff] }
 0x80c   :  { %3061 = vmatpush1.bf16.msra.mxu0 %v6913_v6  ;;  %3102 = vmatpush1.bf16.msra.mxu1 %v5790_v5  ;;  %v6984_v6 = vld [vmem:[#allocation64_spill] sm:$0xff]  ;;  %v6985_v5 = vld [vmem:[#allocation65_spill] sm:$0xff] }
 0x80d   :  { %3062 = vmatprep.subr.bf16.mxu0 %v6914_v32  ;;  %3103 = vmatprep.subr.bf16.mxu1 %v5794_v16  ;;  %v6986_v32 = vld [vmem:[#allocation66_spill] sm:$0xff]  ;;  %v6987_v16 = vld [vmem:[#allocation31_spill] sm:$0xff] }
 0x810   :  { %3063 = vmatpush1.bf16.msra.mxu0 %v6915_v33  ;;  %3104 = vmatpush1.bf16.msra.mxu1 %v5798_v45  ;;  %v6988_v33 = vld [vmem:[#allocation26_spill] sm:$0xff]  ;;  %v6989_v45 = vld [vmem:[#allocation32_spill] sm:$0xff] }
 0x811   :  { %3064 = vmatprep.subr.bf16.mxu0 %v6916_v52  ;;  %3105 = vmatprep.subr.bf16.mxu1 %v5802_v12  ;;  %v6990_v52 = vld [vmem:[#allocation29_spill] sm:$0xff] }
 0x812   :  { %v6991_v12 = vld [vmem:[#allocation33_spill] sm:$0xff] }
 0x814   :  { %3065 = vmatpush1.bf16.msra.mxu0 %v6917_v24  ;;  %3106 = vmatpush1.bf16.msra.mxu1 %v5806_v11  ;;  %v6992_v24 = vld [vmem:[#allocation30_spill] sm:$0xff] }
 0x815   :  { %3066 = vmatprep.subr.bf16.mxu0 %v6918_v46  ;;  %3107 = vmatprep.subr.bf16.mxu1 %v5810_v18  ;;  %v6993_v11 = vld [vmem:[#allocation34_spill] sm:$0xff]  ;;  %v6994_v46 = vld [vmem:[#allocation35_spill] sm:$0xff]  ;;  %v6995_v18 = vld [vmem:[#allocation36_spill] sm:$0xff] }
 0x818   :  { %3067 = vmatpush1.bf16.msra.mxu0 %v6919_v28  ;;  %3108 = vmatpush1.bf16.msra.mxu1 %v5814_v26  ;;  %v6996_v28 = vld [vmem:[#allocation13_spill] sm:$0xff]  ;;  %v6997_v26 = vld [vmem:[#allocation42_spill] sm:$0xff] }
 0x819   :  { %3068 = vmatprep.subr.bf16.mxu0 %v6920_v14  ;;  %3109 = vmatprep.subr.bf16.mxu1 %v5818_v34  ;;  %v6998_v14 = vld [vmem:[#allocation43_spill] sm:$0xff]  ;;  %v6999_v34 = vld [vmem:[#allocation44_spill] sm:$0xff] }
 0x81c   :  { %3069 = vmatpush1.bf16.msra.mxu0 %v6921_v63  ;;  %3110 = vmatpush1.bf16.msra.mxu1 %v6970_v56  ;;  %v7000_v63 = vld [vmem:[#allocation46_spill] sm:$0xff] }
 0x81d   :  { %3181 = vmatprep.subr.bf16.mxu0 %v6971_v0  ;;  %3222 = vmatprep.subr.bf16.mxu1 %v6972_v10 }
 0x81f   :  { %3087 = vmatmul.mubr.bf16.vlgmr.msra.gmra.mxu0 %v2942_v8  ;;  %3128 = vmatmul.mubr.bf16.vlgmr.msra.gmra.mxu1 %v2942_v8  ;;  %v7002_v8 = vld [vmem:[#allocation50_spill] sm:$0xff] }
 0x820   :  { %3182 = vmatpush1.bf16.msra.mxu0 %v6973_v4  ;;  %3223 = vmatpush1.bf16.msra.mxu1 %v6974_v42 }
 0x821   :  { %3183 = vmatprep.subr.bf16.mxu0 %v6975_v50  ;;  %3224 = vmatprep.subr.bf16.mxu1 %v6976_v51 }
 0x822   :  { %3213 = vmatprep.mubr.bf16.mxu0 %v6608_v22  ;;  %3254 = vmatprep.mubr.bf16.mxu1 %v6608_v22 }
 0x824   :  { %3184 = vmatpush1.bf16.msra.mxu0 %v6977_v53  ;;  %3225 = vmatpush1.bf16.msra.mxu1 %v6978_v20 }
 0x825   :  { %3185 = vmatprep.subr.bf16.mxu0 %v6979_v38  ;;  %3226 = vmatprep.subr.bf16.mxu1 %v6980_v43 }
 0x828   :  { %3186 = vmatpush1.bf16.msra.mxu0 %v6981_v7  ;;  %3227 = vmatpush1.bf16.msra.mxu1 %v6982_v21 }
 0x829   :  { %3187 = vmatprep.subr.bf16.mxu0 %v6983_v2  ;;  %3228 = vmatprep.subr.bf16.mxu1 %v6984_v6 }
 0x82c   :  { %3188 = vmatpush1.bf16.msra.mxu0 %v6985_v5  ;;  %3229 = vmatpush1.bf16.msra.mxu1 %v6986_v32 }
 0x82d   :  { %3189 = vmatprep.subr.bf16.mxu0 %v6987_v16  ;;  %3230 = vmatprep.subr.bf16.mxu1 %v6988_v33 }
 0x830   :  { %3190 = vmatpush1.bf16.msra.mxu0 %v6989_v45  ;;  %3231 = vmatpush1.bf16.msra.mxu1 %v6990_v52 }
 0x831   :  { %3191 = vmatprep.subr.bf16.mxu0 %v6991_v12  ;;  %3232 = vmatprep.subr.bf16.mxu1 %v6992_v24 }
 0x834   :  { %3192 = vmatpush1.bf16.msra.mxu0 %v6993_v11  ;;  %3233 = vmatpush1.bf16.msra.mxu1 %v6994_v46 }
 0x835   :  { %3193 = vmatprep.subr.bf16.mxu0 %v6995_v18  ;;  %3234 = vmatprep.subr.bf16.mxu1 %v6996_v28 }
 0x838   :  { %3194 = vmatpush1.bf16.msra.mxu0 %v6997_v26  ;;  %3235 = vmatpush1.bf16.msra.mxu1 %v6998_v14 }
 0x839   :  { %3195 = vmatprep.subr.bf16.mxu0 %v6999_v34  ;;  %3236 = vmatprep.subr.bf16.mxu1 %v7000_v63 }
 0x83c   :  { %3196 = vmatpush1.bf16.msra.mxu0 %v7001_v44  ;;  %3237 = vmatpush1.bf16.msra.mxu1 %v7002_v8 }
 0x83d   :  { %3266 = vmatprep.subr.bf16.mxu0 %v7003_v59  ;;  %3307 = vmatprep.subr.bf16.mxu1 %v7004_v62 }
 0x89d   :  { %v2893_v39 = vpop.f32.mrf.mxu0  ;;  %v2934_v56 = vpop.f32.mrf.mxu1 }
 0x89f   :  { %v2895_v0 = vpop.f32.mrf.mxu0  ;;  %v2936_v10 = vpop.f32.mrf.mxu1 }
 0x8a1   :  { %v2897_v4 = vpop.f32.mrf.mxu0  ;;  %v2938_v42 = vpop.f32.mrf.mxu1 }
 0x8a3   :  { %v2898_v50 = vpop.f32.mrf.mxu0  ;;  %v2939_v51 = vpop.f32.mrf.mxu1 }
 0x8bf   :  { %v2978_v53 = vpop.f32.mrf.mxu0  ;;  %v3019_v20 = vpop.f32.mrf.mxu1 }
 0x8c0   :  { %v2979_v38 = vadd.f32 %v2978_v53, %v2893_v39  ;;  %v3020_v12 = vadd.f32 %v3019_v20, %v2934_v56 }
 0x8c1   :  { %v2980_v43 = vpop.f32.mrf.mxu0  ;;  %v3021_v7 = vpop.f32.mrf.mxu1 }
 0x8c2   :  { %v3026_v21 = vadd.f32 %v2979_v38, %v5002_v3  ;;  %v2981_v2 = vadd.f32 %v2980_v43, %v2895_v0  ;;  %v3028_v24 = vadd.f32 %v3020_v12, %v5012_v13  ;;  %v3022_v11 = vadd.f32 %v3021_v7, %v2936_v10 }
 0x8c3   :  { %v2982_v6 = vpop.f32.mrf.mxu0  ;;  %v3023_v5 = vpop.f32.mrf.mxu1 }
 0x8c4   :  { %v3720_v32 = vmul.f32 -1.442695, %v3026_v21  ;;  %v3027_v16 = vadd.f32 %v2981_v2, %v5006_v19  ;;  %v3722_v46 = vmul.f32 -1.442695, %v3028_v24  ;;  %v3029_v28 = vadd.f32 %v3022_v11, %v6727_v55 }
 0x8c5   :  { %v2983_v33 = vpop.f32.mrf.mxu0  ;;  %v3024_v45 = vpop.f32.mrf.mxu1 }
 0x8c6   :  { %4164 = vpow2.f32 %v3720_v32  ;;  %v3721_v52 = vmul.f32 -1.442695, %v3027_v16 }
 0x8c8   :  { %4166 = vpow2.f32 %v3721_v52 }
 0x8c9   :  { %4168 = vpow2.f32 %v3722_v46 }
 0x8d3   :  { %v4165_v18 = vpop.eup %4164 }
 0x8d4   :  { %v3039_v26 = vadd.f32 1.0, %v4165_v18 }
 0x8d5   :  { %v4167_v14 = vpop.eup %4166 }
 0x8d6   :  { %4170 = vrcp.f32 %v3039_v26  ;;  %v3040_v34 = vadd.f32 1.0, %v4167_v14  ;;  %v4169_v39 = vpop.eup %4168  ;;  %v7015_v26 = vld [vmem:[#allocation24_spill] sm:$0xff]  ;;  %v7016_v14 = vld [vmem:[#allocation21_spill] sm:$0xff] }
 0x8d7   :  { %4172 = vtanh.f32 %v3029_v28  ;;  %v3041_v38 = vadd.f32 1.0, %v4169_v39 }
 0x8d8   :  { %4174 = vrcp.f32 %v3040_v34 }
 0x8df   :  { %v3088_v63 = vpop.f32.mrf.mxu0  ;;  %v3129_v44 = vpop.f32.mrf.mxu1 }
 0x8e0   :  { %v3140_v8 = vrot.slane %v3088_v63, 2  ;;  %v7017_v63 = vld [vmem:[#allocation27_spill] sm:$0xff] }
 0x8e1   :  { %v3090_v59 = vpop.f32.mrf.mxu0  ;;  %v3131_v62 = vpop.f32.mrf.mxu1 }
 0x8e2   :  { %v3148_v56 = vadd.f32 %v3140_v8, %v6837_v48  ;;  %v3141_v0 = vrot.slane %v3090_v59, 2  ;;  %v3142_v48 = vrot.slane %v3129_v44, 2  ;;  %v3143_v16 = vrot.slane %v3131_v62, 2 }
 0x8e3   :  { %v4171_v10 = vpop.eup %4170  ;;  %v3092_v4 = vpop.f32.mrf.mxu0  ;;  %v7018_v62 = vmov 0.0  }
 0x8e4   :  { %v3133_v42 = vpop.f32.mrf.mxu1  ;;  %v4173_v50 = vpop.eup %4172  ;;  %v3723_v51 = vmul.f32 -1.442695, %v3148_v56  ;;  %v3149_v53 = vadd.f32 %v3141_v0, %v6900_v35  ;;  %v3150_v32 = vadd.f32 %v3142_v48, %v6839_v47  ;;  %v3151_v45 = vadd.f32 %v3143_v16, %v6840_v30  ;;  %v3391_v56 = vld [vmem:[%s6255_s7 + $0x78] sm:$0xff]  ;;  %v3385_v4 = vld [vmem:[%s6255_s7 + $0x48] sm:$0xff] }
 0x8e5   :  { %v4175_v20 = vpop.eup %4174  ;;  %v3093_v43 = vpop.f32.mrf.mxu0  ;;  %v3050_v2 = vmul.f32 %v4173_v50, %v4171_v10  ;;  %v3387_v0 = vld [vmem:[%s6255_s7 + $0x58] sm:$0xff]  ;;  %v3386_v10 = vld [vmem:[%s6255_s7 + $0x50] sm:$0xff]  ;;  %v3384_v42 = vld [vmem:[%s6255_s7 + $0x40] sm:$0xff] }
 0x8e6   :  { %v3134_v7 = vpop.f32.mrf.mxu1  ;;  %v3049_v21 = vmul.f32 %v4175_v20, %v5936_v49  ;;  %4176 = vpow2.f32 %v3723_v51  ;;  %v3724_v6 = vmul.f32 -1.442695, %v3149_v53  ;;  %v3725_v35 = vmul.f32 -1.442695, %v3150_v32  ;;  %v3383_v50 = vld [vmem:[%s6255_s7 + $0x38] sm:$0xff]  ;;  %v3382_v51 = vld [vmem:[%s6255_s7 + $0x30] sm:$0xff] }
 0x8e7   :  { %v3381_v53 = vld [vmem:[%s6255_s7 + $0x28] sm:$0xff]  ;;  %v3380_v20 = vld [vmem:[%s6255_s7 + $0x20] sm:$0xff]  ;;  %v3378_v43 = vld [vmem:[%s6255_s7 + $0x10] sm:$0xff] }
 0x8e8   :  { %v6114_v5 = vadd.f32 %v3050_v2, %v3049_v21  ;;  %4178 = vpow2.f32 %v3724_v6  ;;  %v3377_v7 = vld [vmem:[%s6255_s7 + $0x8] sm:$0xff]  ;;  %v3376_v21 = vld [vmem:[%s6255_s7] sm:$0xff]  ;;  %v3475_v2 = vld [vmem:[%s6257_s9 + $0x18] sm:$0xf] }
 0x8e9   :  { %4180 = vrcp.f32 %v3041_v38  ;;  %v3379_v38 = vld [vmem:[%s6255_s7 + $0x18] sm:$0xff] }
 0x8ea   :  { %4182 = vtanh.f32 %v6114_v5 }
 0x8eb   :  { %4184 = vpow2.f32 %v3725_v35 }
 0x8f3   :  { %v4177_v33 = vpop.eup %4176 }
 0x8f4   :  { %v3161_v52 = vadd.f32 1.0, %v4177_v33 }
 0x8f5   :  { %v4179_v12 = vpop.eup %4178 }
 0x8f6   :  { %v4181_v49 = vpop.eup %4180  ;;  %4186 = vrcp.f32 %v3161_v52  ;;  %v3162_v24 = vadd.f32 1.0, %v4179_v12 }
 0x8f7   :  { %v4183_v11 = vpop.eup %4182  ;;  %4188 = vtanh.f32 %v3151_v45 }
 0x8f8   :  { %4190 = vrcp.f32 %v3162_v24  ;;  %v3053_v46 = vmul.f32 %v4183_v11, %v4181_v49  ;;  %v4185_v47 = vpop.eup %4184 }
 0x8f9   :  { %v3163_v28 = vadd.f32 1.0, %v4185_v47 }
 0x8fa   :  { %v3180_v18 = vpack.c.bf16 %v3053_v46, %v3053_v46 }
 0x8fb   :  { %4192 = vrcp.f32 %v3163_v28 }
 0x8fc   :  { %3214 = vmatmul.mubr.bf16.vlgmr.msra.gmra.mxu0 %v3180_v18  ;;  %3255 = vmatmul.mubr.bf16.vlgmr.msra.gmra.mxu1 %v3180_v18 }
 0x8fd   :  { %3267 = vmatpush1.bf16.msra.mxu0 %v5941_v61  ;;  %3308 = vmatpush1.bf16.msra.mxu1 %v5944_v31  ;;  %v3172_v31 = vrot.slane %v5980_v29, 6  ;;  %v7012_v29 = vld [vmem:[#allocation17_spill] sm:$0xff] }
 0x8fe   :  { %3268 = vmatprep.subr.bf16.mxu0 %v5947_v9  ;;  %3309 = vmatprep.subr.bf16.mxu1 %v5950_v17 }
 0x8ff   :  { %3298 = vmatprep.mubr.bf16.mxu0 %v6608_v22  ;;  %3339 = vmatprep.mubr.bf16.mxu1 %v6608_v22 }
 0x901   :  { %3269 = vmatpush1.bf16.msra.mxu0 %v5955_v27  ;;  %3310 = vmatpush1.bf16.msra.mxu1 %v5958_v57  ;;  %v7005_v57 = vld [vmem:[#allocation53_spill] sm:$0xff] }
 0x902   :  { %3270 = vmatprep.subr.bf16.mxu0 %v5961_v58  ;;  %3311 = vmatprep.subr.bf16.mxu1 %v5964_v36  ;;  %v7006_v58 = vld [vmem:[#allocation54_spill] sm:$0xff]  ;;  %v7007_v36 = vld [vmem:[#allocation68_spill] sm:$0xff] }
 0x903   :  { %v4187_v30 = vpop.eup %4186 }
 0x904   :  { %v4189_v61 = vpop.eup %4188 }
 0x905   :  { %v4191_v9 = vpop.eup %4190  ;;  %3271 = vmatpush1.bf16.msra.mxu0 %v5968_v37  ;;  %3312 = vmatpush1.bf16.msra.mxu1 %v5971_v54  ;;  %v3175_v17 = vmul.f32 %v4189_v61, %v4187_v30  ;;  %v7008_v37 = vld [vmem:[#allocation14_spill] sm:$0xff]  ;;  %v7009_v54 = vld [vmem:[#allocation19_spill] sm:$0xff] }
 0x906   :  { %v3174_v22 = vmul.f32 %v4191_v9, %v3172_v31  ;;  %3272 = vmatprep.subr.bf16.mxu0 %v5974_v60  ;;  %3313 = vmatprep.subr.bf16.mxu1 %v5977_v40  ;;  %v7010_v60 = vld [vmem:[#allocation15_spill] sm:$0xff]  ;;  %v7011_v40 = vld [vmem:[#allocation20_spill] sm:$0xff] }
 0x908   :  { %v3176_v27 = vadd.f32 %v3175_v17, %v3174_v22  ;;  %v4193_v34 = vpop.eup %4192 }
 0x909   :  { %3273 = vmatpush1.bf16.msra.mxu0 %v5982_v23  ;;  %3314 = vmatpush1.bf16.msra.mxu1 %v5985_v15  ;;  %v7013_v23 = vld [vmem:[#allocation23_spill] sm:$0xff]  ;;  %v7014_v15 = vld [vmem:[#allocation18_spill] sm:$0xff] }
 0x90a   :  { %4194 = vtanh.f32 %v3176_v27  ;;  %3274 = vmatprep.subr.bf16.mxu0 %v7005_v57  ;;  %3315 = vmatprep.subr.bf16.mxu1 %v7006_v58 }
 0x90d   :  { %3275 = vmatpush1.bf16.msra.mxu0 %v7007_v36  ;;  %3316 = vmatpush1.bf16.msra.mxu1 %v7008_v37 }
 0x90e   :  { %3276 = vmatprep.subr.bf16.mxu0 %v7009_v54  ;;  %3317 = vmatprep.subr.bf16.mxu1 %v7010_v60 }
 0x911   :  { %3277 = vmatpush1.bf16.msra.mxu0 %v7011_v40  ;;  %3318 = vmatpush1.bf16.msra.mxu1 %v7012_v29 }
 0x912   :  { %3278 = vmatprep.subr.bf16.mxu0 %v7013_v23  ;;  %3319 = vmatprep.subr.bf16.mxu1 %v7014_v15 }
 0x915   :  { %3279 = vmatpush1.bf16.msra.mxu0 %v7015_v26  ;;  %3320 = vmatpush1.bf16.msra.mxu1 %v7016_v14 }
 0x916   :  { %3280 = vmatprep.subr.bf16.mxu0 %v7017_v63  ;;  %3321 = vmatprep.subr.bf16.mxu1 %v6028_v41  ;;  %v3388_v41 = vld [vmem:[%s6255_s7 + $0x60] sm:$0xff] }
 0x917   :  { %v4195_v44 = vpop.eup %4194 }
 0x918   :  { %v3178_v8 = vmul.f32 %v4195_v44, %v4193_v34 }
 0x919   :  { %3281 = vmatpush1.bf16.msra.mxu0 %v6031_v25  ;;  %3322 = vmatpush1.bf16.msra.mxu1 %v6034_v1  ;;  %v3390_v25 = vld [vmem:[%s6255_s7 + $0x70] sm:$0xff]  ;;  %v3389_v1 = vld [vmem:[%s6255_s7 + $0x68] sm:$0xff] }
 0x91a   :  { %v3179_v59 = vpack.c.bf16 %v3178_v8, %v3178_v8  ;;  %3755 = vmatprep.subr.mxu0 %v7018_v62  ;;  %3790 = vmatprep.subr.mxu1 %v7018_v62  ;;  %v3474_v8 = vld [vmem:[%s6257_s9 + $0x10] sm:$0xff] }
 0x91c   :  { %v3264_v39 = vrot.slane %v3179_v59, 3  ;;  %v3473_v59 = vld [vmem:[%s6257_s9 + $0x8] sm:$0xff] }
 0x91e   :  { %3299 = vmatmul.mubr.bf16.vlgmr.msra.gmra.mxu0 %v3264_v39  ;;  %3340 = vmatmul.mubr.bf16.vlgmr.msra.gmra.mxu1 %v3264_v39  ;;  %v3729_v39 = vld [vmem:[%s6256_s8] ss:$0 sm:$0xff] }
 0x91f   :  { %3756 = vmatpush3.msra.mxu0 %v3391_v56  ;;  %3787 = vmatprep.mubr.msk.f32.mxu0 %vm4498_vm4, %v7018_v62 }
 0x920   :  { %3757 = vmatprep.subr.mxu0 %v7018_v62  ;;  %3798 = vmatprep.mubr.msk.f32.mxu1 %vm4498_vm4, %v7018_v62 }
 0x921   :  { %3758 = vmatpush3.msra.mxu0 %v3390_v25  ;;  %3791 = vmatpush3.msk.msra.mxu1 %vm3487_vm5, %v3475_v2 }
 0x922   :  { %3759 = vmatprep.subr.mxu0 %v7018_v62  ;;  %3792 = vmatprep.subr.mxu1 %v7018_v62 }
 0x923   :  { %3760 = vmatpush3.msra.mxu0 %v3389_v1  ;;  %3793 = vmatpush3.msra.mxu1 %v3474_v8 }
 0x924   :  { %3761 = vmatprep.subr.mxu0 %v7018_v62  ;;  %3794 = vmatprep.subr.mxu1 %v7018_v62 }
 0x925   :  { %3762 = vmatpush3.msra.mxu0 %v3388_v41  ;;  %3795 = vmatpush3.msra.mxu1 %v3473_v59 }
 0x926   :  { %3763 = vmatprep.subr.mxu0 %v7018_v62  ;;  %3796 = vmatprep.subr.mxu1 %v7018_v62 }
 0x927   :  { %3764 = vmatpush3.msra.mxu0 %v3387_v0 }
 0x928   :  { %3765 = vmatprep.subr.mxu0 %v7018_v62 }
 0x929   :  { %3766 = vmatpush3.msra.mxu0 %v3386_v10  ;;  %v3730_v10 = vld [vmem:[%s6258_s10] ss:$0 sm:$0xff] }
 0x92a   :  { %3767 = vmatprep.subr.mxu0 %v7018_v62 }
 0x92b   :  { %3768 = vmatpush3.msra.mxu0 %v3385_v4 }
 0x92c   :  { %3769 = vmatprep.subr.mxu0 %v7018_v62 }
 0x92d   :  { %3770 = vmatpush3.msra.mxu0 %v3384_v42 }
 0x92e   :  { %3771 = vmatprep.subr.mxu0 %v7018_v62 }
 0x92f   :  { %3772 = vmatpush3.msra.mxu0 %v3383_v50 }
 0x930   :  { %3773 = vmatprep.subr.mxu0 %v7018_v62 }
 0x931   :  { %3774 = vmatpush3.msra.mxu0 %v3382_v51 }
 0x932   :  { %3775 = vmatprep.subr.mxu0 %v7018_v62 }
 0x933   :  { %3776 = vmatpush3.msra.mxu0 %v3381_v53 }
 0x934   :  { %3777 = vmatprep.subr.mxu0 %v7018_v62 }
 0x935   :  { %3778 = vmatpush3.msra.mxu0 %v3380_v20 }
 0x936   :  { %3779 = vmatprep.subr.mxu0 %v7018_v62 }
 0x937   :  { %3780 = vmatpush3.msra.mxu0 %v3379_v38 }
 0x938   :  { %3781 = vmatprep.subr.mxu0 %v7018_v62 }
 0x939   :  { %3782 = vmatpush3.msra.mxu0 %v3378_v43 }
 0x93a   :  { %3783 = vmatprep.subr.mxu0 %v7018_v62 }
 0x93b   :  { %3784 = vmatpush3.msra.mxu0 %v3377_v7 }
 0x93c   :  { %3785 = vmatprep.subr.mxu0 %v7018_v62 }
 0x93d   :  { %3786 = vmatpush3.msra.mxu0 %v3376_v21 }
 0x9bc   :  { %v3215_v6 = vpop.f32.mrf.mxu0  ;;  %v3256_v48 = vpop.f32.mrf.mxu1 }
 0x9be   :  { %v3217_v32 = vpop.f32.mrf.mxu0  ;;  %v3258_v16 = vpop.f32.mrf.mxu1 }
 0x9c0   :  { %v3219_v35 = vpop.f32.mrf.mxu0  ;;  %v3260_v33 = vpop.f32.mrf.mxu1 }
 0x9c2   :  { %v3220_v45 = vpop.f32.mrf.mxu0  ;;  %v3261_v52 = vpop.f32.mrf.mxu1 }
 0x9de   :  { %v3300_v12 = vpop.f32.mrf.mxu0  ;;  %v3341_v49 = vpop.f32.mrf.mxu1 }
 0x9df   :  { %v3301_v24 = vadd.f32 %v3300_v12, %v3215_v6  ;;  %v3342_v27 = vadd.f32 %v3341_v49, %v3256_v48 }
 0x9e0   :  { %v3302_v11 = vpop.f32.mrf.mxu0  ;;  %v3343_v46 = vpop.f32.mrf.mxu1 }
 0x9e1   :  { %v3348_v18 = vadd.f32 %v3301_v24, %v5002_v3  ;;  %v3303_v47 = vadd.f32 %v3302_v11, %v3217_v32  ;;  %v3350_v57 = vadd.f32 %v3342_v27, %v5012_v13  ;;  %v3344_v58 = vadd.f32 %v3343_v46, %v3258_v16 }
 0x9e2   :  { %v3304_v30 = vpop.f32.mrf.mxu0  ;;  %v3345_v61 = vpop.f32.mrf.mxu1 }
 0x9e3   :  { %v3726_v31 = vmul.f32 -1.442695, %v3348_v18  ;;  %v3349_v9 = vadd.f32 %v3303_v47, %v5006_v19  ;;  %v3728_v36 = vmul.f32 -1.442695, %v3350_v57  ;;  %v3351_v54 = vadd.f32 %v3344_v58, %v6727_v55 }
 0x9e4   :  { %v3305_v28 = vpop.f32.mrf.mxu0  ;;  %v3346_v22 = vpop.f32.mrf.mxu1 }
 0x9e5   :  { %4196 = vpow2.f32 %v3726_v31  ;;  %v3727_v17 = vmul.f32 -1.442695, %v3349_v9 }
 0x9e7   :  { %4198 = vpow2.f32 %v3727_v17 }
 0x9e8   :  { %4200 = vpow2.f32 %v3728_v36 }
 0x9f2   :  { %v4197_v37 = vpop.eup %4196 }
 0x9f3   :  { %v3361_v3 = vadd.f32 1.0, %v4197_v37 }
 0x9f4   :  { %v4199_v60 = vpop.eup %4198 }
 0x9f5   :  { %4202 = vrcp.f32 %v3361_v3  ;;  %v3362_v40 = vadd.f32 1.0, %v4199_v60  ;;  %v4201_v19 = vpop.eup %4200 }
 0x9f6   :  { %4204 = vtanh.f32 %v3351_v54  ;;  %v3363_v26 = vadd.f32 1.0, %v4201_v19 }
 0x9f7   :  { %4206 = vrcp.f32 %v3362_v40 }
 0x9f8   :  { %4208 = vrcp.f32 %v3363_v26 }
 0xa02   :  { %v4203_v29 = vpop.eup %4202 }
 0xa03   :  { %v4205_v23 = vpop.eup %4204 }
 0xa04   :  { %v4207_v15 = vpop.eup %4206  ;;  %v3372_v13 = vmul.f32 %v4205_v23, %v4203_v29 }
 0xa05   :  { %v3371_v14 = vmul.f32 %v4207_v15, %v6114_v5  ;;  %v4209_v63 = vpop.eup %4208  ;;  %v3472_v5 = vld [vmem:[%s6257_s9] sm:$0xff]  ;;  %s4499_s9 = smov [#allocation8]  }
 0xa06   :  { %3797 = vmatpush3.msra.mxu1 %v3472_v5  ;;  %s3569_s5 = sshll.u32 %s4499_s9, 4  ;;  %s3570_s5 = int_to_ptr.vmem [resolvable:$true] %s3569_s5 }
 0xa07   :  { %v3373_v34 = vadd.f32 %v3372_v13, %v3371_v14  ;;  %s4464_s8 = scalar_lea.vmem %s3570_s5, 32  ;;  %p4469_p2 = scmp.lt.s32.totalorder %s3570_s5, %s3570_s5 }
 0xa08   :  { %p4465_p1 = scmp.ne.s32.totalorder %s3570_s5, %s4464_s8  ;;  %p4470_p3 = scmp.lt.s32.totalorder %s4464_s8, %s4464_s8 }
 0xa09   :  { %4210 = vtanh.f32 %v3373_v34 }
 0xa0a   :  { %p4471_p4 = por %p4470_p3, %p4469_p2 }
 0xa0c   :  { %p4472_p5 = pnand %p4471_p4, %p4465_p1 }
 0xa16   :  { %v4211_v55 = vpop.eup %4210 }
 0xa17   :  { %v3375_v44 = vmul.f32 %v4211_v55, %v4209_v63 }
 0xa19   :  { %3788 = vmatmul.mubr.f32.vlgmr.msra.gmra.mxu0 %v3375_v44 }
 0xad9   :  { %v3465_v56 = vpop.f32.mrf.mxu0 }
 0xada   :  { %v3466_v25 = vadd.f32 %v3729_v39, %v3465_v56 }
 0xadb   :  { %v3789_v1 = vpop.f32.mrf.mxu0 }
 0xadc   :  { %vm3469_vm6 = vcmp.ge.f32.partialorder %v3466_v25, 0.0  ;;  %v3470_v41 = vmul.f32 0.2, %v3466_v25 }
 0xade   :  { %v3471_v0 = vsel %vm3469_vm6, %v3466_v25, %v3470_v41 }
 0xadf   :  { %3799 = vmatmul.mubr.msk.f32.vlgmr.msra.gmra.mxu1 %vm3483_vm7, %v3471_v0 }
 0xb9f   :  { %v3557_v62 = vpop.f32.mrf.mxu1 }
 0xba0   :  { %v3558_v4 = vadd.f32 %v3730_v10, %v3557_v62 }
 0xba1   :  { %v3800_v42 = vpop.f32.mrf.mxu1 }
 0xba2   :  { %3562 = vst.msk [vmem:[#allocation8] sm:$0x3] %vm3561_vm8, %v3558_v4 }
 0xba3   :  { %4475 = shalt.err (!%p4472_p5)
}
 0xba4   :  { %3572 = dma.vmem_to_hbm [thread:$0]  %s3570_s5, 32, %s6259_s11, [#allocation4]  }
 0xba5   :  { %4488 = dma.done.wait [#allocation4], 32  }
 0xba6   :  { %4489 = vsyncadd [#allocation4], 4294967264 }
 0xba7   :  { %3576 = vsyncpa [#allocation3], 1 }
 0xba8   :  { %3577 = vsyncpa [#allocation6], 1 }
 0xba9   :  { %3578 = vsyncpa [#allocation4], 1 }

</bundles_post_ra>
